<compile_context>
chip_gen: v7x
topology: tpu7x:2x2x1
jax: 0.10.0
libtpu: 0.0.40
codegen_flags: <defaults>
</compile_context>

<pallas_src>
import functools

import numpy as np

import jax
import jax.numpy as jnp
from jax import lax
from jax.experimental import pallas as pl
from jax.experimental.pallas import tpu as pltpu


# ----------------------------------------------------------------------------
# Helpers
# ----------------------------------------------------------------------------
def _full_spec(shape):
    """BlockSpec covering the full array (single grid step)."""
    return pl.BlockSpec(shape, lambda *_: (0,) * len(shape))


def _im2col(x_cbhw):
    """(Cin, B, H, W) -> patches^T (16*Cin, B*(H//2)*(W//2)) for 4x4 / stride 2 / pad 1."""
    Cin, B, H, W = x_cbhw.shape
    OH, OW = H // 2, W // 2
    xp = jnp.pad(x_cbhw, ((0, 0), (0, 0), (1, 1), (1, 1)))
    taps = []
    for kh in range(4):
        for kw in range(4):
            taps.append(
                jax.lax.slice(
                    xp,
                    (0, 0, kh, kw),
                    (Cin, B, kh + 2 * (OH - 1) + 1, kw + 2 * (OW - 1) + 1),
                    (1, 1, 2, 2),
                )
            )  # (Cin, B, OH, OW)
    # K = 16*Cin (tap-major, channel-minor); M = B*OH*OW (b-major, spatial-minor)
    return jnp.stack(taps, axis=0).reshape(16 * Cin, B * OH * OW)


def _conv_lrelu_bn(pT, w, b, g, beta):
    """Conv-as-GEMM + bias + LeakyReLU(0.2) + BatchNorm2d (training-mode batch stats).

    pT: (K, M) patches^T (f32 or bf16), w: (Cout, K) f32, b/g/beta: (Cout, 1) f32.
    Returns (Cout, M) f32.
    """
    y = jnp.dot(w, pT.astype(jnp.float32), preferred_element_type=jnp.float32) + b
    y = jnp.where(y >= 0.0, y, 0.2 * y)                    # LeakyReLU(0.2)
    inv_m = 1.0 / y.shape[1]
    mean = jnp.sum(y, axis=1, keepdims=True) * inv_m       # one-pass BN stats
    msq = jnp.sum(y * y, axis=1, keepdims=True) * inv_m
    var = msq - mean * mean                                # biased variance (PyTorch norm)
    inv = lax.rsqrt(var + 1e-5)
    return (y - mean) * (inv * g) + beta


# ----------------------------------------------------------------------------
# Kernels
# ----------------------------------------------------------------------------
def _conv_block_kernel(pT_ref, w_ref, b_ref, g_ref, beta_ref, o_ref):
    y = _conv_lrelu_bn(pT_ref[...], w_ref[...], b_ref[...], g_ref[...], beta_ref[...])
    o_ref[...] = y.astype(o_ref.dtype)


def _conv_attn_kernel(pT_ref, w_ref, b_ref, g_ref, beta_ref,
                      wq_ref, bq_ref, wk_ref, bk_ref, wv_ref, bv_ref, gamma_ref,
                      o_ref, *, batch, hw):
    # conv3 + LeakyReLU + BN  -> x : (C, B*HW) f32, lane-dense
    x = _conv_lrelu_bn(pT_ref[...], w_ref[...], b_ref[...], g_ref[...], beta_ref[...])
    # 1x1-conv projections over channels
    q = jnp.dot(wq_ref[...], x, preferred_element_type=jnp.float32) + bq_ref[...]  # (C8, B*HW)
    k = jnp.dot(wk_ref[...], x, preferred_element_type=jnp.float32) + bk_ref[...]  # (C8, B*HW)
    v = jnp.dot(wv_ref[...], x, preferred_element_type=jnp.float32) + bv_ref[...]  # (C,  B*HW)
    outs = []
    for bi in range(batch):                    # batch is a small static int
        sl = slice(bi * hw, (bi + 1) * hw)
        qb, kb, vb = q[:, sl], k[:, sl], v[:, sl]
        # s[i, j] = sum_c q[c, i] * k[c, j]   (contract C8 axes directly, no transpose)
        s = lax.dot_general(qb, kb, (((0,), (0,)), ((), ())),
                            preferred_element_type=jnp.float32)       # (HW, HW)
        s = s - jnp.max(s, axis=-1, keepdims=True)
        e = jnp.exp(s)
        attn = e / jnp.sum(e, axis=-1, keepdims=True)                  # softmax, dim=-1
        # out[c, i] = sum_j v[c, j] * attn[i, j]   (contract HW axes, no transpose)
        outs.append(lax.dot_general(vb, attn, (((1,), (1,)), ((), ())),
                                    preferred_element_type=jnp.float32))
    out = outs[0] if batch == 1 else jnp.concatenate(outs, axis=1)     # (C, B*HW)
    o_ref[...] = (gamma_ref[...] * out + x).astype(o_ref.dtype)


def _conv_fc_kernel(pT_ref, w_ref, b_ref, g_ref, beta_ref,
                    fcw_ref, fcb_ref, gsum_ref, o_ref):
    # conv4 + LeakyReLU + BN -> y : (C4, B*16) f32
    y = _conv_lrelu_bn(pT_ref[...], w_ref[...], b_ref[...], g_ref[...], beta_ref[...])
    # Linear over PyTorch flatten order (c-major, hw-minor): VPU multiply + column
    # reduce, then a tiny (1, B*16) @ (B*16, B) group-sum to get per-batch logits.
    colsum = jnp.sum(y * fcw_ref[...], axis=0, keepdims=True)                     # (1, B*16)
    z = jnp.dot(colsum, gsum_ref[...], preferred_element_type=jnp.float32) + fcb_ref[...]
    o_ref[...] = 0.5 * (jnp.tanh(0.5 * z) + 1.0)     # numerically stable sigmoid


# ----------------------------------------------------------------------------
# pallas_call wrappers
# ----------------------------------------------------------------------------
def conv_block(x_cbhw, p):
    """(Cin, B, H, W) -> (Cout, B, H/2, W/2) bf16  (conv4x4/s2/p1 + LeakyReLU + BN)."""
    _, B, H, W = x_cbhw.shape
    OH, OW = H // 2, W // 2
    pT = _im2col(x_cbhw)
    K, M = pT.shape
    Cout = p["w2d"].shape[0]
    y = pl.pallas_call(
        _conv_block_kernel,
        out_shape=jax.ShapeDtypeStruct((Cout, M), jnp.bfloat16),
        grid=(1,),
        in_specs=[_full_spec((K, M)), _full_spec((Cout, K)),
                  _full_spec((Cout, 1)), _full_spec((Cout, 1)), _full_spec((Cout, 1))],
        out_specs=_full_spec((Cout, M)),
        compiler_params=pltpu.CompilerParams(dimension_semantics=("arbitrary",)),
    )(pT, p["w2d"], p["b"], p["bn_g"], p["bn_b"])
    return y.reshape(Cout, B, OH, OW)


def conv_attn_block(x_cbhw, p, ap):
    """conv3 block fused with SelfAttention; returns (C, B, H/2, W/2) bf16."""
    _, B, H, W = x_cbhw.shape
    OH, OW = H // 2, W // 2
    hw = OH * OW
    pT = _im2col(x_cbhw)
    K, M = pT.shape
    C = p["w2d"].shape[0]
    C8 = ap["wq"].shape[0]
    kern = functools.partial(_conv_attn_kernel, batch=B, hw=hw)
    y = pl.pallas_call(
        kern,
        out_shape=jax.ShapeDtypeStruct((C, M), jnp.bfloat16),
        grid=(1,),
        in_specs=[_full_spec((K, M)), _full_spec((C, K)),
                  _full_spec((C, 1)), _full_spec((C, 1)), _full_spec((C, 1)),
                  _full_spec((C8, C)), _full_spec((C8, 1)),
                  _full_spec((C8, C)), _full_spec((C8, 1)),
                  _full_spec((C, C)), _full_spec((C, 1)),
                  _full_spec((1, 1))],
        out_specs=_full_spec((C, M)),
        compiler_params=pltpu.CompilerParams(dimension_semantics=("arbitrary",)),
    )(pT, p["w2d"], p["b"], p["bn_g"], p["bn_b"],
      ap["wq"], ap["bq"], ap["wk"], ap["bk"], ap["wv"], ap["bv"], ap["gamma"])
    return y.reshape(C, B, OH, OW)


def conv_fc_block(x_cbhw, p, fc):
    """conv4 block fused with flatten + Linear + Sigmoid; returns (B, 1) f32."""
    _, B, H, W = x_cbhw.shape
    OH, OW = H // 2, W // 2
    hw = OH * OW                                   # 16
    pT = _im2col(x_cbhw)
    K, M = pT.shape                                # M = B*hw
    C = p["w2d"].shape[0]
    fcw_tiled = jnp.tile(fc["w2d"], (1, B))        # (C, B*hw), matches b-major columns
    gsum = jnp.asarray(np.kron(np.eye(B, dtype=np.float32),
                               np.ones((hw, 1), dtype=np.float32)))   # (B*hw, B) constant
    out = pl.pallas_call(
        _conv_fc_kernel,
        out_shape=jax.ShapeDtypeStruct((1, B), jnp.float32),
        grid=(1,),
        in_specs=[_full_spec((K, M)), _full_spec((C, K)),
                  _full_spec((C, 1)), _full_spec((C, 1)), _full_spec((C, 1)),
                  _full_spec((C, M)), _full_spec((1, 1)), _full_spec((M, B))],
        out_specs=_full_spec((1, B)),
        compiler_params=pltpu.CompilerParams(dimension_semantics=("arbitrary",)),
    )(pT, p["w2d"], p["b"], p["bn_g"], p["bn_b"], fcw_tiled, fc["b"], gsum)
    return out.reshape(B, 1)


# ----------------------------------------------------------------------------
# Parameters (deterministic synthetic init, pre-packed into kernel-ready layout)
# ----------------------------------------------------------------------------
def init_params(key, ndf):
    keys = jax.random.split(key, 6)

    def conv_p(k, cout, cin):
        k1, k2 = jax.random.split(k)
        # PyTorch layout (Cout, Cin, 4, 4) -> pre-packed tap-major / channel-minor (Cout, 16*Cin)
        w = jax.random.normal(k1, (cout, cin, 4, 4), jnp.float32) * 0.05
        b = jax.random.normal(k2, (cout,), jnp.float32) * 0.05
        return {
            "w2d": jnp.transpose(w, (0, 2, 3, 1)).reshape(cout, 16 * cin),
            "b": b.reshape(cout, 1),
            "bn_g": jnp.ones((cout, 1), jnp.float32),
            "bn_b": jnp.zeros((cout, 1), jnp.float32),
        }

    c_attn = ndf * 4
    c8 = c_attn // 8
    ka, kb, kc = jax.random.split(keys[4], 3)
    attn = {
        "wq": jax.random.normal(ka, (c8, c_attn), jnp.float32) * 0.05,   # 1x1 conv weight
        "bq": jnp.zeros((c8, 1), jnp.float32),
        "wk": jax.random.normal(kb, (c8, c_attn), jnp.float32) * 0.05,
        "bk": jnp.zeros((c8, 1), jnp.float32),
        "wv": jax.random.normal(kc, (c_attn, c_attn), jnp.float32) * 0.05,
        "bv": jnp.zeros((c_attn, 1), jnp.float32),
        "gamma": jnp.zeros((1, 1), jnp.float32),                         # PyTorch init
    }
    kf1, kf2 = jax.random.split(keys[5])
    c4 = ndf * 8
    # PyTorch Linear weight over flatten order f = c*16 + hw, pre-packed to (C4, 16)
    fc_w = jax.random.normal(kf1, (c4 * 16,), jnp.float32) * 0.02
    fc = {
        "w2d": fc_w.reshape(c4, 16),
        "b": jax.random.normal(kf2, (1, 1), jnp.float32) * 0.02,
    }
    return {
        "b1": conv_p(keys[0], ndf, 3),
        "b2": conv_p(keys[1], ndf * 2, ndf),
        "b3": conv_p(keys[2], ndf * 4, ndf * 2),
        "b4": conv_p(keys[3], ndf * 8, ndf * 4),
        "attn": attn,
        "fc": fc,
    }


# ----------------------------------------------------------------------------
# Forward pass (== Discriminator.forward, training-mode BatchNorm)
# ----------------------------------------------------------------------------
def discriminator_forward(params, img_nchw):
    # Activations carried channels-first flattened (C, B, H, W): every conv GEMM
    # writes a lane-dense (Cout, B*OH*OW) block; inter-block HBM traffic is bf16.
    x = jnp.transpose(img_nchw, (1, 0, 2, 3)).astype(jnp.float32)       # (3, B, 64, 64)
    x = conv_block(x, params["b1"])                                     # (ndf,  B, 32, 32)
    x = conv_block(x, params["b2"])                                     # (2ndf, B, 16, 16)
    x = conv_attn_block(x, params["b3"], params["attn"])                # (4ndf, B,  8,  8)
    return conv_fc_block(x, params["b4"], params["fc"])                 # (B, 1)


# ----------------------------------------------------------------------------
if __name__ == "__main__":
    ndf = 8                      # attention channels = 32, q/k dim = 4
    B, H, W = 2, 64, 64          # 64x64 input so fc sees ndf*8*4*4 features
    key = jax.random.PRNGKey(0)
    kp, kx = jax.random.split(key)
    params = init_params(kp, ndf)
    img = jax.random.normal(kx, (B, 3, H, W), jnp.float32)

    fwd = jax.jit(functools.partial(discriminator_forward, params))
    out = jax.block_until_ready(fwd(img))
    assert out.shape == (B, 1)
    assert bool(jnp.all((out >= 0.0) & (out <= 1.0)))
    print("KERNEL_OK")
</pallas_src>

<mosaic_0001>
module attributes {stable_mosaic.version = 11 : i64} {
  func.func @_conv_block_kernel(%arg0: i32, %arg1: memref<48x2048xf32, #tpu.memory_space<vmem>>, %arg2: memref<8x48xf32, #tpu.memory_space<vmem>>, %arg3: memref<8x1xf32, #tpu.memory_space<vmem>>, %arg4: memref<8x1xf32, #tpu.memory_space<vmem>>, %arg5: memref<8x1xf32, #tpu.memory_space<vmem>>, %arg6: memref<8x2048xbf16, #tpu.memory_space<vmem>>) attributes {dimension_semantics = [#tpu.dimension_semantics<arbitrary>], iteration_bounds = array<i64: 1>, scalar_prefetch = 0 : i64, scratch_operands = 0 : i64, tpu.core_type = #tpu.core_type<tc>, window_params = [{pipeline_mode = #tpu.pipeline_mode<synchronous>, transform_indices = @transform_0, window_bounds = array<i64: 48, 2048>}, {pipeline_mode = #tpu.pipeline_mode<synchronous>, transform_indices = @transform_1, window_bounds = array<i64: 8, 48>}, {pipeline_mode = #tpu.pipeline_mode<synchronous>, transform_indices = @transform_2, window_bounds = array<i64: 8, 1>}, {pipeline_mode = #tpu.pipeline_mode<synchronous>, transform_indices = @transform_3, window_bounds = array<i64: 8, 1>}, {pipeline_mode = #tpu.pipeline_mode<synchronous>, transform_indices = @transform_4, window_bounds = array<i64: 8, 1>}, {pipeline_mode = #tpu.pipeline_mode<synchronous>, transform_indices = @transform_5, window_bounds = array<i64: 8, 2048>}]} {
    %c0 = arith.constant 0 : index
    %c0_0 = arith.constant 0 : index
    %0 = vector.load %arg1[%c0, %c0_0] : memref<48x2048xf32, #tpu.memory_space<vmem>>, vector<48x2048xf32>
    %c0_1 = arith.constant 0 : index
    %c0_2 = arith.constant 0 : index
    %1 = vector.load %arg2[%c0_1, %c0_2] : memref<8x48xf32, #tpu.memory_space<vmem>>, vector<8x48xf32>
    %c0_3 = arith.constant 0 : index
    %c0_4 = arith.constant 0 : index
    %2 = vector.load %arg3[%c0_3, %c0_4] : memref<8x1xf32, #tpu.memory_space<vmem>>, vector<8x1xf32>
    %c0_5 = arith.constant 0 : index
    %c0_6 = arith.constant 0 : index
    %3 = vector.load %arg4[%c0_5, %c0_6] : memref<8x1xf32, #tpu.memory_space<vmem>>, vector<8x1xf32>
    %c0_7 = arith.constant 0 : index
    %c0_8 = arith.constant 0 : index
    %4 = vector.load %arg5[%c0_7, %c0_8] : memref<8x1xf32, #tpu.memory_space<vmem>>, vector<8x1xf32>
    %cst = arith.constant dense<0.000000e+00> : vector<8x2048xf32>
    %5 = tpu.matmul %1, %0, %cst {dimension_numbers = #tpu.dot_dimension_numbers<[1], [0], [0], [1], [0, 0, 1, 1], [], []>} : vector<8x48xf32>, vector<48x2048xf32>, vector<8x2048xf32> -> vector<8x2048xf32>
    %6 = vector.broadcast %2 : vector<8x1xf32> to vector<8x2048xf32>
    %7 = arith.addf %5, %6 : vector<8x2048xf32>
    %cst_9 = arith.constant 0.000000e+00 : f32
    %8 = vector.broadcast %cst_9 : f32 to vector<8x2048xf32>
    %9 = arith.cmpf oge, %7, %8 : vector<8x2048xf32>
    %cst_10 = arith.constant 2.000000e-01 : f32
    %10 = vector.broadcast %cst_10 : f32 to vector<8x2048xf32>
    %11 = arith.mulf %10, %7 : vector<8x2048xf32>
    %12 = arith.select %9, %7, %11 : vector<8x2048xi1>, vector<8x2048xf32>
    %cst_11 = arith.constant dense<0.000000e+00> : vector<8xf32>
    %13 = vector.multi_reduction <add>, %12, %cst_11 [1] : vector<8x2048xf32> to vector<8xf32>
    %14 = vector.shape_cast %13 : vector<8xf32> to vector<8x1xf32>
    %cst_12 = arith.constant 4.8828125E-4 : f32
    %15 = vector.broadcast %cst_12 : f32 to vector<8x1xf32>
    %16 = arith.mulf %14, %15 : vector<8x1xf32>
    %17 = arith.mulf %12, %12 : vector<8x2048xf32>
    %cst_13 = arith.constant dense<0.000000e+00> : vector<8xf32>
    %18 = vector.multi_reduction <add>, %17, %cst_13 [1] : vector<8x2048xf32> to vector<8xf32>
    %19 = vector.shape_cast %18 : vector<8xf32> to vector<8x1xf32>
    %cst_14 = arith.constant 4.8828125E-4 : f32
    %20 = vector.broadcast %cst_14 : f32 to vector<8x1xf32>
    %21 = arith.mulf %19, %20 : vector<8x1xf32>
    %22 = arith.mulf %16, %16 : vector<8x1xf32>
    %23 = arith.subf %21, %22 : vector<8x1xf32>
    %cst_15 = arith.constant 9.99999974E-6 : f32
    %24 = vector.broadcast %cst_15 : f32 to vector<8x1xf32>
    %25 = arith.addf %23, %24 : vector<8x1xf32>
    %26 = math.rsqrt %25 : vector<8x1xf32>
    %27 = vector.broadcast %16 : vector<8x1xf32> to vector<8x2048xf32>
    %28 = arith.subf %12, %27 : vector<8x2048xf32>
    %29 = arith.mulf %26, %3 : vector<8x1xf32>
    %30 = vector.broadcast %29 : vector<8x1xf32> to vector<8x2048xf32>
    %31 = arith.mulf %28, %30 : vector<8x2048xf32>
    %32 = vector.broadcast %4 : vector<8x1xf32> to vector<8x2048xf32>
    %33 = arith.addf %31, %32 : vector<8x2048xf32>
    %34 = arith.truncf %33 : vector<8x2048xf32> to vector<8x2048xbf16>
    %c0_16 = arith.constant 0 : index
    %c0_17 = arith.constant 0 : index
    %35 = vector.load %arg6[%c0_16, %c0_17] : memref<8x2048xbf16, #tpu.memory_space<vmem>>, vector<8x2048xbf16>
    tpu.vector_store %arg6[%c0_16, %c0_17], %34 {strides = array<i32>} : memref<8x2048xbf16, #tpu.memory_space<vmem>>, vector<8x2048xbf16>,
    return
  }
  func.func @transform_0(%arg0: i32) -> (i32, i32) {
    %c0_i32 = arith.constant 0 : i32
    %c0_i32_0 = arith.constant 0 : i32
    %c0_i32_1 = arith.constant 0 : i32
    return %c0_i32, %c0_i32_0 : i32, i32
  }
  func.func @transform_1(%arg0: i32) -> (i32, i32) {
    %c0_i32 = arith.constant 0 : i32
    %c0_i32_0 = arith.constant 0 : i32
    %c0_i32_1 = arith.constant 0 : i32
    return %c0_i32, %c0_i32_0 : i32, i32
  }
  func.func @transform_2(%arg0: i32) -> (i32, i32) {
    %c0_i32 = arith.constant 0 : i32
    %c0_i32_0 = arith.constant 0 : i32
    %c0_i32_1 = arith.constant 0 : i32
    return %c0_i32, %c0_i32_0 : i32, i32
  }
  func.func @transform_3(%arg0: i32) -> (i32, i32) {
    %c0_i32 = arith.constant 0 : i32
    %c0_i32_0 = arith.constant 0 : i32
    %c0_i32_1 = arith.constant 0 : i32
    return %c0_i32, %c0_i32_0 : i32, i32
  }
  func.func @transform_4(%arg0: i32) -> (i32, i32) {
    %c0_i32 = arith.constant 0 : i32
    %c0_i32_0 = arith.constant 0 : i32
    %c0_i32_1 = arith.constant 0 : i32
    return %c0_i32, %c0_i32_0 : i32, i32
  }
  func.func @transform_5(%arg0: i32) -> (i32, i32) {
    %c0_i32 = arith.constant 0 : i32
    %c0_i32_0 = arith.constant 0 : i32
    %c0_i32_1 = arith.constant 0 : i32
    return %c0_i32, %c0_i32_0 : i32, i32
  }
}

module attributes {stable_mosaic.version = 11 : i64} {
  func.func @_conv_block_kernel(%arg0: i32, %arg1: memref<128x512xbf16, #tpu.memory_space<vmem>>, %arg2: memref<16x128xf32, #tpu.memory_space<vmem>>, %arg3: memref<16x1xf32, #tpu.memory_space<vmem>>, %arg4: memref<16x1xf32, #tpu.memory_space<vmem>>, %arg5: memref<16x1xf32, #tpu.memory_space<vmem>>, %arg6: memref<16x512xbf16, #tpu.memory_space<vmem>>) attributes {dimension_semantics = [#tpu.dimension_semantics<arbitrary>], iteration_bounds = array<i64: 1>, scalar_prefetch = 0 : i64, scratch_operands = 0 : i64, tpu.core_type = #tpu.core_type<tc>, window_params = [{pipeline_mode = #tpu.pipeline_mode<synchronous>, transform_indices = @transform_0, window_bounds = array<i64: 128, 512>}, {pipeline_mode = #tpu.pipeline_mode<synchronous>, transform_indices = @transform_1, window_bounds = array<i64: 16, 128>}, {pipeline_mode = #tpu.pipeline_mode<synchronous>, transform_indices = @transform_2, window_bounds = array<i64: 16, 1>}, {pipeline_mode = #tpu.pipeline_mode<synchronous>, transform_indices = @transform_3, window_bounds = array<i64: 16, 1>}, {pipeline_mode = #tpu.pipeline_mode<synchronous>, transform_indices = @transform_4, window_bounds = array<i64: 16, 1>}, {pipeline_mode = #tpu.pipeline_mode<synchronous>, transform_indices = @transform_5, window_bounds = array<i64: 16, 512>}]} {
    %c0 = arith.constant 0 : index
    %c0_0 = arith.constant 0 : index
    %0 = vector.load %arg1[%c0, %c0_0] : memref<128x512xbf16, #tpu.memory_space<vmem>>, vector<128x512xbf16>
    %c0_1 = arith.constant 0 : index
    %c0_2 = arith.constant 0 : index
    %1 = vector.load %arg2[%c0_1, %c0_2] : memref<16x128xf32, #tpu.memory_space<vmem>>, vector<16x128xf32>
    %c0_3 = arith.constant 0 : index
    %c0_4 = arith.constant 0 : index
    %2 = vector.load %arg3[%c0_3, %c0_4] : memref<16x1xf32, #tpu.memory_space<vmem>>, vector<16x1xf32>
    %c0_5 = arith.constant 0 : index
    %c0_6 = arith.constant 0 : index
    %3 = vector.load %arg4[%c0_5, %c0_6] : memref<16x1xf32, #tpu.memory_space<vmem>>, vector<16x1xf32>
    %c0_7 = arith.constant 0 : index
    %c0_8 = arith.constant 0 : index
    %4 = vector.load %arg5[%c0_7, %c0_8] : memref<16x1xf32, #tpu.memory_space<vmem>>, vector<16x1xf32>
    %5 = arith.extf %0 : vector<128x512xbf16> to vector<128x512xf32>
    %cst = arith.constant dense<0.000000e+00> : vector<16x512xf32>
    %6 = tpu.matmul %1, %5, %cst {dimension_numbers = #tpu.dot_dimension_numbers<[1], [0], [0], [1], [0, 0, 1, 1], [], []>} : vector<16x128xf32>, vector<128x512xf32>, vector<16x512xf32> -> vector<16x512xf32>
    %7 = vector.broadcast %2 : vector<16x1xf32> to vector<16x512xf32>
    %8 = arith.addf %6, %7 : vector<16x512xf32>
    %cst_9 = arith.constant 0.000000e+00 : f32
    %9 = vector.broadcast %cst_9 : f32 to vector<16x512xf32>
    %10 = arith.cmpf oge, %8, %9 : vector<16x512xf32>
    %cst_10 = arith.constant 2.000000e-01 : f32
    %11 = vector.broadcast %cst_10 : f32 to vector<16x512xf32>
    %12 = arith.mulf %11, %8 : vector<16x512xf32>
    %13 = arith.select %10, %8, %12 : vector<16x512xi1>, vector<16x512xf32>
    %cst_11 = arith.constant dense<0.000000e+00> : vector<16xf32>
    %14 = vector.multi_reduction <add>, %13, %cst_11 [1] : vector<16x512xf32> to vector<16xf32>
    %15 = vector.shape_cast %14 : vector<16xf32> to vector<16x1xf32>
    %cst_12 = arith.constant 0.001953125 : f32
    %16 = vector.broadcast %cst_12 : f32 to vector<16x1xf32>
    %17 = arith.mulf %15, %16 : vector<16x1xf32>
    %18 = arith.mulf %13, %13 : vector<16x512xf32>
    %cst_13 = arith.constant dense<0.000000e+00> : vector<16xf32>
    %19 = vector.multi_reduction <add>, %18, %cst_13 [1] : vector<16x512xf32> to vector<16xf32>
    %20 = vector.shape_cast %19 : vector<16xf32> to vector<16x1xf32>
    %cst_14 = arith.constant 0.001953125 : f32
    %21 = vector.broadcast %cst_14 : f32 to vector<16x1xf32>
    %22 = arith.mulf %20, %21 : vector<16x1xf32>
    %23 = arith.mulf %17, %17 : vector<16x1xf32>
    %24 = arith.subf %22, %23 : vector<16x1xf32>
    %cst_15 = arith.constant 9.99999974E-6 : f32
    %25 = vector.broadcast %cst_15 : f32 to vector<16x1xf32>
    %26 = arith.addf %24, %25 : vector<16x1xf32>
    %27 = math.rsqrt %26 : vector<16x1xf32>
    %28 = vector.broadcast %17 : vector<16x1xf32> to vector<16x512xf32>
    %29 = arith.subf %13, %28 : vector<16x512xf32>
    %30 = arith.mulf %27, %3 : vector<16x1xf32>
    %31 = vector.broadcast %30 : vector<16x1xf32> to vector<16x512xf32>
    %32 = arith.mulf %29, %31 : vector<16x512xf32>
    %33 = vector.broadcast %4 : vector<16x1xf32> to vector<16x512xf32>
    %34 = arith.addf %32, %33 : vector<16x512xf32>
    %35 = arith.truncf %34 : vector<16x512xf32> to vector<16x512xbf16>
    %c0_16 = arith.constant 0 : index
    %c0_17 = arith.constant 0 : index
    %36 = vector.load %arg6[%c0_16, %c0_17] : memref<16x512xbf16, #tpu.memory_space<vmem>>, vector<16x512xbf16>
    tpu.vector_store %arg6[%c0_16, %c0_17], %35 {strides = array<i32>} : memref<16x512xbf16, #tpu.memory_space<vmem>>, vector<16x512xbf16>,
    return
  }
  func.func @transform_0(%arg0: i32) -> (i32, i32) {
    %c0_i32 = arith.constant 0 : i32
    %c0_i32_0 = arith.constant 0 : i32
    %c0_i32_1 = arith.constant 0 : i32
    return %c0_i32, %c0_i32_0 : i32, i32
  }
  func.func @transform_1(%arg0: i32) -> (i32, i32) {
    %c0_i32 = arith.constant 0 : i32
    %c0_i32_0 = arith.constant 0 : i32
    %c0_i32_1 = arith.constant 0 : i32
    return %c0_i32, %c0_i32_0 : i32, i32
  }
  func.func @transform_2(%arg0: i32) -> (i32, i32) {
    %c0_i32 = arith.constant 0 : i32
    %c0_i32_0 = arith.constant 0 : i32
    %c0_i32_1 = arith.constant 0 : i32
    return %c0_i32, %c0_i32_0 : i32, i32
  }
  func.func @transform_3(%arg0: i32) -> (i32, i32) {
    %c0_i32 = arith.constant 0 : i32
    %c0_i32_0 = arith.constant 0 : i32
    %c0_i32_1 = arith.constant 0 : i32
    return %c0_i32, %c0_i32_0 : i32, i32
  }
  func.func @transform_4(%arg0: i32) -> (i32, i32) {
    %c0_i32 = arith.constant 0 : i32
    %c0_i32_0 = arith.constant 0 : i32
    %c0_i32_1 = arith.constant 0 : i32
    return %c0_i32, %c0_i32_0 : i32, i32
  }
  func.func @transform_5(%arg0: i32) -> (i32, i32) {
    %c0_i32 = arith.constant 0 : i32
    %c0_i32_0 = arith.constant 0 : i32
    %c0_i32_1 = arith.constant 0 : i32
    return %c0_i32, %c0_i32_0 : i32, i32
  }
}

module attributes {stable_mosaic.version = 11 : i64} {
  func.func @_conv_attn_kernel(%arg0: i32, %arg1: memref<256x128xbf16, #tpu.memory_space<vmem>>, %arg2: memref<32x256xf32, #tpu.memory_space<vmem>>, %arg3: memref<32x1xf32, #tpu.memory_space<vmem>>, %arg4: memref<32x1xf32, #tpu.memory_space<vmem>>, %arg5: memref<32x1xf32, #tpu.memory_space<vmem>>, %arg6: memref<4x32xf32, #tpu.memory_space<vmem>>, %arg7: memref<4x1xf32, #tpu.memory_space<vmem>>, %arg8: memref<4x32xf32, #tpu.memory_space<vmem>>, %arg9: memref<4x1xf32, #tpu.memory_space<vmem>>, %arg10: memref<32x32xf32, #tpu.memory_space<vmem>>, %arg11: memref<32x1xf32, #tpu.memory_space<vmem>>, %arg12: memref<1x1xf32, #tpu.memory_space<vmem>>, %arg13: memref<32x128xbf16, #tpu.memory_space<vmem>>) attributes {dimension_semantics = [#tpu.dimension_semantics<arbitrary>], iteration_bounds = array<i64: 1>, scalar_prefetch = 0 : i64, scratch_operands = 0 : i64, tpu.core_type = #tpu.core_type<tc>, window_params = [{pipeline_mode = #tpu.pipeline_mode<synchronous>, transform_indices = @transform_0, window_bounds = array<i64: 256, 128>}, {pipeline_mode = #tpu.pipeline_mode<synchronous>, transform_indices = @transform_1, window_bounds = array<i64: 32, 256>}, {pipeline_mode = #tpu.pipeline_mode<synchronous>, transform_indices = @transform_2, window_bounds = array<i64: 32, 1>}, {pipeline_mode = #tpu.pipeline_mode<synchronous>, transform_indices = @transform_3, window_bounds = array<i64: 32, 1>}, {pipeline_mode = #tpu.pipeline_mode<synchronous>, transform_indices = @transform_4, window_bounds = array<i64: 32, 1>}, {pipeline_mode = #tpu.pipeline_mode<synchronous>, transform_indices = @transform_5, window_bounds = array<i64: 4, 32>}, {pipeline_mode = #tpu.pipeline_mode<synchronous>, transform_indices = @transform_6, window_bounds = array<i64: 4, 1>}, {pipeline_mode = #tpu.pipeline_mode<synchronous>, transform_indices = @transform_7, window_bounds = array<i64: 4, 32>}, {pipeline_mode = #tpu.pipeline_mode<synchronous>, transform_indices = @transform_8, window_bounds = array<i64: 4, 1>}, {pipeline_mode = #tpu.pipeline_mode<synchronous>, transform_indices = @transform_9, window_bounds = array<i64: 32, 32>}, {pipeline_mode = #tpu.pipeline_mode<synchronous>, transform_indices = @transform_10, window_bounds = array<i64: 32, 1>}, {pipeline_mode = #tpu.pipeline_mode<synchronous>, transform_indices = @transform_11, window_bounds = array<i64: 1, 1>}, {pipeline_mode = #tpu.pipeline_mode<synchronous>, transform_indices = @transform_12, window_bounds = array<i64: 32, 128>}]} {
    %c0 = arith.constant 0 : index
    %c0_0 = arith.constant 0 : index
    %0 = vector.load %arg1[%c0, %c0_0] : memref<256x128xbf16, #tpu.memory_space<vmem>>, vector<256x128xbf16>
    %c0_1 = arith.constant 0 : index
    %c0_2 = arith.constant 0 : index
    %1 = vector.load %arg2[%c0_1, %c0_2] : memref<32x256xf32, #tpu.memory_space<vmem>>, vector<32x256xf32>
    %c0_3 = arith.constant 0 : index
    %c0_4 = arith.constant 0 : index
    %2 = vector.load %arg3[%c0_3, %c0_4] : memref<32x1xf32, #tpu.memory_space<vmem>>, vector<32x1xf32>
    %c0_5 = arith.constant 0 : index
    %c0_6 = arith.constant 0 : index
    %3 = vector.load %arg4[%c0_5, %c0_6] : memref<32x1xf32, #tpu.memory_space<vmem>>, vector<32x1xf32>
    %c0_7 = arith.constant 0 : index
    %c0_8 = arith.constant 0 : index
    %4 = vector.load %arg5[%c0_7, %c0_8] : memref<32x1xf32, #tpu.memory_space<vmem>>, vector<32x1xf32>
    %5 = arith.extf %0 : vector<256x128xbf16> to vector<256x128xf32>
    %cst = arith.constant dense<0.000000e+00> : vector<32x128xf32>
    %6 = tpu.matmul %1, %5, %cst {dimension_numbers = #tpu.dot_dimension_numbers<[1], [0], [0], [1], [0, 0, 1, 1], [], []>} : vector<32x256xf32>, vector<256x128xf32>, vector<32x128xf32> -> vector<32x128xf32>
    %7 = vector.broadcast %2 : vector<32x1xf32> to vector<32x128xf32>
    %8 = arith.addf %6, %7 : vector<32x128xf32>
    %cst_9 = arith.constant 0.000000e+00 : f32
    %9 = vector.broadcast %cst_9 : f32 to vector<32x128xf32>
    %10 = arith.cmpf oge, %8, %9 : vector<32x128xf32>
    %cst_10 = arith.constant 2.000000e-01 : f32
    %11 = vector.broadcast %cst_10 : f32 to vector<32x128xf32>
    %12 = arith.mulf %11, %8 : vector<32x128xf32>
    %13 = arith.select %10, %8, %12 : vector<32x128xi1>, vector<32x128xf32>
    %cst_11 = arith.constant dense<0.000000e+00> : vector<32xf32>
    %14 = vector.multi_reduction <add>, %13, %cst_11 [1] : vector<32x128xf32> to vector<32xf32>
    %15 = vector.shape_cast %14 : vector<32xf32> to vector<32x1xf32>
    %cst_12 = arith.constant 7.812500e-03 : f32
    %16 = vector.broadcast %cst_12 : f32 to vector<32x1xf32>
    %17 = arith.mulf %15, %16 : vector<32x1xf32>
    %18 = arith.mulf %13, %13 : vector<32x128xf32>
    %cst_13 = arith.constant dense<0.000000e+00> : vector<32xf32>
    %19 = vector.multi_reduction <add>, %18, %cst_13 [1] : vector<32x128xf32> to vector<32xf32>
    %20 = vector.shape_cast %19 : vector<32xf32> to vector<32x1xf32>
    %cst_14 = arith.constant 7.812500e-03 : f32
    %21 = vector.broadcast %cst_14 : f32 to vector<32x1xf32>
    %22 = arith.mulf %20, %21 : vector<32x1xf32>
    %23 = arith.mulf %17, %17 : vector<32x1xf32>
    %24 = arith.subf %22, %23 : vector<32x1xf32>
    %cst_15 = arith.constant 9.99999974E-6 : f32
    %25 = vector.broadcast %cst_15 : f32 to vector<32x1xf32>
    %26 = arith.addf %24, %25 : vector<32x1xf32>
    %27 = math.rsqrt %26 : vector<32x1xf32>
    %28 = vector.broadcast %17 : vector<32x1xf32> to vector<32x128xf32>
    %29 = arith.subf %13, %28 : vector<32x128xf32>
    %30 = arith.mulf %27, %3 : vector<32x1xf32>
    %31 = vector.broadcast %30 : vector<32x1xf32> to vector<32x128xf32>
    %32 = arith.mulf %29, %31 : vector<32x128xf32>
    %33 = vector.broadcast %4 : vector<32x1xf32> to vector<32x128xf32>
    %34 = arith.addf %32, %33 : vector<32x128xf32>
    %c0_16 = arith.constant 0 : index
    %c0_17 = arith.constant 0 : index
    %35 = vector.load %arg6[%c0_16, %c0_17] : memref<4x32xf32, #tpu.memory_space<vmem>>, vector<4x32xf32>
    %cst_18 = arith.constant dense<0.000000e+00> : vector<4x128xf32>
    %36 = tpu.matmul %35, %34, %cst_18 {dimension_numbers = #tpu.dot_dimension_numbers<[1], [0], [0], [1], [0, 0, 1, 1], [], []>} : vector<4x32xf32>, vector<32x128xf32>, vector<4x128xf32> -> vector<4x128xf32>
    %c0_19 = arith.constant 0 : index
    %c0_20 = arith.constant 0 : index
    %37 = vector.load %arg7[%c0_19, %c0_20] : memref<4x1xf32, #tpu.memory_space<vmem>>, vector<4x1xf32>
    %38 = vector.broadcast %37 : vector<4x1xf32> to vector<4x128xf32>
    %39 = arith.addf %36, %38 : vector<4x128xf32>
    %c0_21 = arith.constant 0 : index
    %c0_22 = arith.constant 0 : index
    %40 = vector.load %arg8[%c0_21, %c0_22] : memref<4x32xf32, #tpu.memory_space<vmem>>, vector<4x32xf32>
    %cst_23 = arith.constant dense<0.000000e+00> : vector<4x128xf32>
    %41 = tpu.matmul %40, %34, %cst_23 {dimension_numbers = #tpu.dot_dimension_numbers<[1], [0], [0], [1], [0, 0, 1, 1], [], []>} : vector<4x32xf32>, vector<32x128xf32>, vector<4x128xf32> -> vector<4x128xf32>
    %c0_24 = arith.constant 0 : index
    %c0_25 = arith.constant 0 : index
    %42 = vector.load %arg9[%c0_24, %c0_25] : memref<4x1xf32, #tpu.memory_space<vmem>>, vector<4x1xf32>
    %43 = vector.broadcast %42 : vector<4x1xf32> to vector<4x128xf32>
    %44 = arith.addf %41, %43 : vector<4x128xf32>
    %c0_26 = arith.constant 0 : index
    %c0_27 = arith.constant 0 : index
    %45 = vector.load %arg10[%c0_26, %c0_27] : memref<32x32xf32, #tpu.memory_space<vmem>>, vector<32x32xf32>
    %cst_28 = arith.constant dense<0.000000e+00> : vector<32x128xf32>
    %46 = tpu.matmul %45, %34, %cst_28 {dimension_numbers = #tpu.dot_dimension_numbers<[1], [0], [0], [1], [0, 0, 1, 1], [], []>} : vector<32x32xf32>, vector<32x128xf32>, vector<32x128xf32> -> vector<32x128xf32>
    %c0_29 = arith.constant 0 : index
    %c0_30 = arith.constant 0 : index
    %47 = vector.load %arg11[%c0_29, %c0_30] : memref<32x1xf32, #tpu.memory_space<vmem>>, vector<32x1xf32>
    %48 = vector.broadcast %47 : vector<32x1xf32> to vector<32x128xf32>
    %49 = arith.addf %46, %48 : vector<32x128xf32>
    %50 = vector.extract_strided_slice %39 {offsets = [0, 0], sizes = [4, 64], strides = [1, 1]} : vector<4x128xf32> to vector<4x64xf32>
    %51 = vector.extract_strided_slice %44 {offsets = [0, 0], sizes = [4, 64], strides = [1, 1]} : vector<4x128xf32> to vector<4x64xf32>
    %52 = vector.extract_strided_slice %49 {offsets = [0, 0], sizes = [32, 64], strides = [1, 1]} : vector<32x128xf32> to vector<32x64xf32>
    %cst_31 = arith.constant dense<0.000000e+00> : vector<64x64xf32>
    %53 = tpu.matmul %50, %51, %cst_31 {dimension_numbers = #tpu.dot_dimension_numbers<[0], [0], [1], [1], [0, 1, 1, 1], [], []>} : vector<4x64xf32>, vector<4x64xf32>, vector<64x64xf32> -> vector<64x64xf32>
    %cst_32 = arith.constant dense<0xFF800000> : vector<64xf32>
    %54 = vector.multi_reduction <maximumf>, %53, %cst_32 [1] : vector<64x64xf32> to vector<64xf32>
    %55 = vector.shape_cast %54 : vector<64xf32> to vector<64x1xf32>
    %56 = vector.broadcast %55 : vector<64x1xf32> to vector<64x64xf32>
    %57 = arith.subf %53, %56 : vector<64x64xf32>
    %58 = math.exp %57 : vector<64x64xf32>
    %cst_33 = arith.constant dense<0.000000e+00> : vector<64xf32>
    %59 = vector.multi_reduction <add>, %58, %cst_33 [1] : vector<64x64xf32> to vector<64xf32>
    %60 = vector.shape_cast %59 : vector<64xf32> to vector<64x1xf32>
    %61 = vector.broadcast %60 : vector<64x1xf32> to vector<64x64xf32>
    %62 = arith.divf %58, %61 : vector<64x64xf32>
    %cst_34 = arith.constant dense<0.000000e+00> : vector<32x64xf32>
    %63 = tpu.matmul %52, %62, %cst_34 {dimension_numbers = #tpu.dot_dimension_numbers<[1], [1], [0], [0], [0, 0, 1, 0], [], []>} : vector<32x64xf32>, vector<64x64xf32>, vector<32x64xf32> -> vector<32x64xf32>
    %64 = vector.extract_strided_slice %39 {offsets = [0, 64], sizes = [4, 64], strides = [1, 1]} : vector<4x128xf32> to vector<4x64xf32>
    %65 = vector.extract_strided_slice %44 {offsets = [0, 64], sizes = [4, 64], strides = [1, 1]} : vector<4x128xf32> to vector<4x64xf32>
    %66 = vector.extract_strided_slice %49 {offsets = [0, 64], sizes = [32, 64], strides = [1, 1]} : vector<32x128xf32> to vector<32x64xf32>
    %cst_35 = arith.constant dense<0.000000e+00> : vector<64x64xf32>
    %67 = tpu.matmul %64, %65, %cst_35 {dimension_numbers = #tpu.dot_dimension_numbers<[0], [0], [1], [1], [0, 1, 1, 1], [], []>} : vector<4x64xf32>, vector<4x64xf32>, vector<64x64xf32> -> vector<64x64xf32>
    %cst_36 = arith.constant dense<0xFF800000> : vector<64xf32>
    %68 = vector.multi_reduction <maximumf>, %67, %cst_36 [1] : vector<64x64xf32> to vector<64xf32>
    %69 = vector.shape_cast %68 : vector<64xf32> to vector<64x1xf32>
    %70 = vector.broadcast %69 : vector<64x1xf32> to vector<64x64xf32>
    %71 = arith.subf %67, %70 : vector<64x64xf32>
    %72 = math.exp %71 : vector<64x64xf32>
    %cst_37 = arith.constant dense<0.000000e+00> : vector<64xf32>
    %73 = vector.multi_reduction <add>, %72, %cst_37 [1] : vector<64x64xf32> to vector<64xf32>
    %74 = vector.shape_cast %73 : vector<64xf32> to vector<64x1xf32>
    %75 = vector.broadcast %74 : vector<64x1xf32> to vector<64x64xf32>
    %76 = arith.divf %72, %75 : vector<64x64xf32>
    %cst_38 = arith.constant dense<0.000000e+00> : vector<32x64xf32>
    %77 = tpu.matmul %66, %76, %cst_38 {dimension_numbers = #tpu.dot_dimension_numbers<[1], [1], [0], [0], [0, 0, 1, 0], [], []>} : vector<32x64xf32>, vector<64x64xf32>, vector<32x64xf32> -> vector<32x64xf32>
    %78 = tpu.concatenate %63, %77 in 1 : vector<32x64xf32>, vector<32x64xf32> -> vector<32x128xf32>
    %c0_39 = arith.constant 0 : index
    %c0_40 = arith.constant 0 : index
    %79 = vector.load %arg12[%c0_39, %c0_40] : memref<1x1xf32, #tpu.memory_space<vmem>>, vector<1x1xf32>
    %80 = vector.broadcast %79 : vector<1x1xf32> to vector<32x128xf32>
    %81 = arith.mulf %80, %78 : vector<32x128xf32>
    %82 = arith.addf %81, %34 : vector<32x128xf32>
    %83 = arith.truncf %82 : vector<32x128xf32> to vector<32x128xbf16>
    %c0_41 = arith.constant 0 : index
    %c0_42 = arith.constant 0 : index
    %84 = vector.load %arg13[%c0_41, %c0_42] : memref<32x128xbf16, #tpu.memory_space<vmem>>, vector<32x128xbf16>
    tpu.vector_store %arg13[%c0_41, %c0_42], %83 {strides = array<i32>} : memref<32x128xbf16, #tpu.memory_space<vmem>>, vector<32x128xbf16>,
    return
  }
  func.func @transform_0(%arg0: i32) -> (i32, i32) {
    %c0_i32 = arith.constant 0 : i32
    %c0_i32_0 = arith.constant 0 : i32
    %c0_i32_1 = arith.constant 0 : i32
    return %c0_i32, %c0_i32_0 : i32, i32
  }
  func.func @transform_1(%arg0: i32) -> (i32, i32) {
    %c0_i32 = arith.constant 0 : i32
    %c0_i32_0 = arith.constant 0 : i32
    %c0_i32_1 = arith.constant 0 : i32
    return %c0_i32, %c0_i32_0 : i32, i32
  }
  func.func @transform_2(%arg0: i32) -> (i32, i32) {
    %c0_i32 = arith.constant 0 : i32
    %c0_i32_0 = arith.constant 0 : i32
    %c0_i32_1 = arith.constant 0 : i32
    return %c0_i32, %c0_i32_0 : i32, i32
  }
  func.func @transform_3(%arg0: i32) -> (i32, i32) {
    %c0_i32 = arith.constant 0 : i32
    %c0_i32_0 = arith.constant 0 : i32
    %c0_i32_1 = arith.constant 0 : i32
    return %c0_i32, %c0_i32_0 : i32, i32
  }
  func.func @transform_4(%arg0: i32) -> (i32, i32) {
    %c0_i32 = arith.constant 0 : i32
    %c0_i32_0 = arith.constant 0 : i32
    %c0_i32_1 = arith.constant 0 : i32
    return %c0_i32, %c0_i32_0 : i32, i32
  }
  func.func @transform_5(%arg0: i32) -> (i32, i32) {
    %c0_i32 = arith.constant 0 : i32
    %c0_i32_0 = arith.constant 0 : i32
    %c0_i32_1 = arith.constant 0 : i32
    return %c0_i32, %c0_i32_0 : i32, i32
  }
  func.func @transform_6(%arg0: i32) -> (i32, i32) {
    %c0_i32 = arith.constant 0 : i32
    %c0_i32_0 = arith.constant 0 : i32
    %c0_i32_1 = arith.constant 0 : i32
    return %c0_i32, %c0_i32_0 : i32, i32
  }
  func.func @transform_7(%arg0: i32) -> (i32, i32) {
    %c0_i32 = arith.constant 0 : i32
    %c0_i32_0 = arith.constant 0 : i32
    %c0_i32_1 = arith.constant 0 : i32
    return %c0_i32, %c0_i32_0 : i32, i32
  }
  func.func @transform_8(%arg0: i32) -> (i32, i32) {
    %c0_i32 = arith.constant 0 : i32
    %c0_i32_0 = arith.constant 0 : i32
    %c0_i32_1 = arith.constant 0 : i32
    return %c0_i32, %c0_i32_0 : i32, i32
  }
  func.func @transform_9(%arg0: i32) -> (i32, i32) {
    %c0_i32 = arith.constant 0 : i32
    %c0_i32_0 = arith.constant 0 : i32
    %c0_i32_1 = arith.constant 0 : i32
    return %c0_i32, %c0_i32_0 : i32, i32
  }
  func.func @transform_10(%arg0: i32) -> (i32, i32) {
    %c0_i32 = arith.constant 0 : i32
    %c0_i32_0 = arith.constant 0 : i32
    %c0_i32_1 = arith.constant 0 : i32
    return %c0_i32, %c0_i32_0 : i32, i32
  }
  func.func @transform_11(%arg0: i32) -> (i32, i32) {
    %c0_i32 = arith.constant 0 : i32
    %c0_i32_0 = arith.constant 0 : i32
    %c0_i32_1 = arith.constant 0 : i32
    return %c0_i32, %c0_i32_0 : i32, i32
  }
  func.func @transform_12(%arg0: i32) -> (i32, i32) {
    %c0_i32 = arith.constant 0 : i32
    %c0_i32_0 = arith.constant 0 : i32
    %c0_i32_1 = arith.constant 0 : i32
    return %c0_i32, %c0_i32_0 : i32, i32
  }
}

module attributes {stable_mosaic.version = 11 : i64} {
  func.func @_conv_fc_kernel(%arg0: i32, %arg1: memref<512x32xbf16, #tpu.memory_space<vmem>>, %arg2: memref<64x512xf32, #tpu.memory_space<vmem>>, %arg3: memref<64x1xf32, #tpu.memory_space<vmem>>, %arg4: memref<64x1xf32, #tpu.memory_space<vmem>>, %arg5: memref<64x1xf32, #tpu.memory_space<vmem>>, %arg6: memref<64x32xf32, #tpu.memory_space<vmem>>, %arg7: memref<1x1xf32, #tpu.memory_space<vmem>>, %arg8: memref<32x2xf32, #tpu.memory_space<vmem>>, %arg9: memref<1x2xf32, #tpu.memory_space<vmem>>) attributes {dimension_semantics = [#tpu.dimension_semantics<arbitrary>], iteration_bounds = array<i64: 1>, scalar_prefetch = 0 : i64, scratch_operands = 0 : i64, tpu.core_type = #tpu.core_type<tc>, window_params = [{pipeline_mode = #tpu.pipeline_mode<synchronous>, transform_indices = @transform_0, window_bounds = array<i64: 512, 32>}, {pipeline_mode = #tpu.pipeline_mode<synchronous>, transform_indices = @transform_1, window_bounds = array<i64: 64, 512>}, {pipeline_mode = #tpu.pipeline_mode<synchronous>, transform_indices = @transform_2, window_bounds = array<i64: 64, 1>}, {pipeline_mode = #tpu.pipeline_mode<synchronous>, transform_indices = @transform_3, window_bounds = array<i64: 64, 1>}, {pipeline_mode = #tpu.pipeline_mode<synchronous>, transform_indices = @transform_4, window_bounds = array<i64: 64, 1>}, {pipeline_mode = #tpu.pipeline_mode<synchronous>, transform_indices = @transform_5, window_bounds = array<i64: 64, 32>}, {pipeline_mode = #tpu.pipeline_mode<synchronous>, transform_indices = @transform_6, window_bounds = array<i64: 1, 1>}, {pipeline_mode = #tpu.pipeline_mode<synchronous>, transform_indices = @transform_7, window_bounds = array<i64: 32, 2>}, {pipeline_mode = #tpu.pipeline_mode<synchronous>, transform_indices = @transform_8, window_bounds = array<i64: 1, 2>}]} {
    %c0 = arith.constant 0 : index
    %c0_0 = arith.constant 0 : index
    %0 = vector.load %arg1[%c0, %c0_0] : memref<512x32xbf16, #tpu.memory_space<vmem>>, vector<512x32xbf16>
    %c0_1 = arith.constant 0 : index
    %c0_2 = arith.constant 0 : index
    %1 = vector.load %arg2[%c0_1, %c0_2] : memref<64x512xf32, #tpu.memory_space<vmem>>, vector<64x512xf32>
    %c0_3 = arith.constant 0 : index
    %c0_4 = arith.constant 0 : index
    %2 = vector.load %arg3[%c0_3, %c0_4] : memref<64x1xf32, #tpu.memory_space<vmem>>, vector<64x1xf32>
    %c0_5 = arith.constant 0 : index
    %c0_6 = arith.constant 0 : index
    %3 = vector.load %arg4[%c0_5, %c0_6] : memref<64x1xf32, #tpu.memory_space<vmem>>, vector<64x1xf32>
    %c0_7 = arith.constant 0 : index
    %c0_8 = arith.constant 0 : index
    %4 = vector.load %arg5[%c0_7, %c0_8] : memref<64x1xf32, #tpu.memory_space<vmem>>, vector<64x1xf32>
    %5 = arith.extf %0 : vector<512x32xbf16> to vector<512x32xf32>
    %cst = arith.constant dense<0.000000e+00> : vector<64x32xf32>
    %6 = tpu.matmul %1, %5, %cst {dimension_numbers = #tpu.dot_dimension_numbers<[1], [0], [0], [1], [0, 0, 1, 1], [], []>} : vector<64x512xf32>, vector<512x32xf32>, vector<64x32xf32> -> vector<64x32xf32>
    %7 = vector.broadcast %2 : vector<64x1xf32> to vector<64x32xf32>
    %8 = arith.addf %6, %7 : vector<64x32xf32>
    %cst_9 = arith.constant 0.000000e+00 : f32
    %9 = vector.broadcast %cst_9 : f32 to vector<64x32xf32>
    %10 = arith.cmpf oge, %8, %9 : vector<64x32xf32>
    %cst_10 = arith.constant 2.000000e-01 : f32
    %11 = vector.broadcast %cst_10 : f32 to vector<64x32xf32>
    %12 = arith.mulf %11, %8 : vector<64x32xf32>
    %13 = arith.select %10, %8, %12 : vector<64x32xi1>, vector<64x32xf32>
    %cst_11 = arith.constant dense<0.000000e+00> : vector<64xf32>
    %14 = vector.multi_reduction <add>, %13, %cst_11 [1] : vector<64x32xf32> to vector<64xf32>
    %15 = vector.shape_cast %14 : vector<64xf32> to vector<64x1xf32>
    %cst_12 = arith.constant 3.125000e-02 : f32
    %16 = vector.broadcast %cst_12 : f32 to vector<64x1xf32>
    %17 = arith.mulf %15, %16 : vector<64x1xf32>
    %18 = arith.mulf %13, %13 : vector<64x32xf32>
    %cst_13 = arith.constant dense<0.000000e+00> : vector<64xf32>
    %19 = vector.multi_reduction <add>, %18, %cst_13 [1] : vector<64x32xf32> to vector<64xf32>
    %20 = vector.shape_cast %19 : vector<64xf32> to vector<64x1xf32>
    %cst_14 = arith.constant 3.125000e-02 : f32
    %21 = vector.broadcast %cst_14 : f32 to vector<64x1xf32>
    %22 = arith.mulf %20, %21 : vector<64x1xf32>
    %23 = arith.mulf %17, %17 : vector<64x1xf32>
    %24 = arith.subf %22, %23 : vector<64x1xf32>
    %cst_15 = arith.constant 9.99999974E-6 : f32
    %25 = vector.broadcast %cst_15 : f32 to vector<64x1xf32>
    %26 = arith.addf %24, %25 : vector<64x1xf32>
    %27 = math.rsqrt %26 : vector<64x1xf32>
    %28 = vector.broadcast %17 : vector<64x1xf32> to vector<64x32xf32>
    %29 = arith.subf %13, %28 : vector<64x32xf32>
    %30 = arith.mulf %27, %3 : vector<64x1xf32>
    %31 = vector.broadcast %30 : vector<64x1xf32> to vector<64x32xf32>
    %32 = arith.mulf %29, %31 : vector<64x32xf32>
    %33 = vector.broadcast %4 : vector<64x1xf32> to vector<64x32xf32>
    %34 = arith.addf %32, %33 : vector<64x32xf32>
    %c0_16 = arith.constant 0 : index
    %c0_17 = arith.constant 0 : index
    %35 = vector.load %arg6[%c0_16, %c0_17] : memref<64x32xf32, #tpu.memory_space<vmem>>, vector<64x32xf32>
    %36 = arith.mulf %34, %35 : vector<64x32xf32>
    %cst_18 = arith.constant dense<0.000000e+00> : vector<32xf32>
    %37 = vector.multi_reduction <add>, %36, %cst_18 [0] : vector<64x32xf32> to vector<32xf32>
    %38 = vector.shape_cast %37 : vector<32xf32> to vector<1x32xf32>
    %c0_19 = arith.constant 0 : index
    %c0_20 = arith.constant 0 : index
    %39 = vector.load %arg8[%c0_19, %c0_20] : memref<32x2xf32, #tpu.memory_space<vmem>>, vector<32x2xf32>
    %cst_21 = arith.constant dense<0.000000e+00> : vector<1x2xf32>
    %40 = tpu.matmul %38, %39, %cst_21 {dimension_numbers = #tpu.dot_dimension_numbers<[1], [0], [0], [1], [0, 0, 1, 1], [], []>} : vector<1x32xf32>, vector<32x2xf32>, vector<1x2xf32> -> vector<1x2xf32>
    %c0_22 = arith.constant 0 : index
    %c0_23 = arith.constant 0 : index
    %41 = vector.load %arg7[%c0_22, %c0_23] : memref<1x1xf32, #tpu.memory_space<vmem>>, vector<1x1xf32>
    %42 = vector.broadcast %41 : vector<1x1xf32> to vector<1x2xf32>
    %43 = arith.addf %40, %42 : vector<1x2xf32>
    %cst_24 = arith.constant 5.000000e-01 : f32
    %44 = vector.broadcast %cst_24 : f32 to vector<1x2xf32>
    %45 = arith.mulf %44, %43 : vector<1x2xf32>
    %46 = math.tanh %45 : vector<1x2xf32>
    %cst_25 = arith.constant 1.000000e+00 : f32
    %47 = vector.broadcast %cst_25 : f32 to vector<1x2xf32>
    %48 = arith.addf %46, %47 : vector<1x2xf32>
    %cst_26 = arith.constant 5.000000e-01 : f32
    %49 = vector.broadcast %cst_26 : f32 to vector<1x2xf32>
    %50 = arith.mulf %49, %48 : vector<1x2xf32>
    %c0_27 = arith.constant 0 : index
    %c0_28 = arith.constant 0 : index
    %51 = vector.load %arg9[%c0_27, %c0_28] : memref<1x2xf32, #tpu.memory_space<vmem>>, vector<1x2xf32>
    tpu.vector_store %arg9[%c0_27, %c0_28], %50 {strides = array<i32>} : memref<1x2xf32, #tpu.memory_space<vmem>>, vector<1x2xf32>,
    return
  }
  func.func @transform_0(%arg0: i32) -> (i32, i32) {
    %c0_i32 = arith.constant 0 : i32
    %c0_i32_0 = arith.constant 0 : i32
    %c0_i32_1 = arith.constant 0 : i32
    return %c0_i32, %c0_i32_0 : i32, i32
  }
  func.func @transform_1(%arg0: i32) -> (i32, i32) {
    %c0_i32 = arith.constant 0 : i32
    %c0_i32_0 = arith.constant 0 : i32
    %c0_i32_1 = arith.constant 0 : i32
    return %c0_i32, %c0_i32_0 : i32, i32
  }
  func.func @transform_2(%arg0: i32) -> (i32, i32) {
    %c0_i32 = arith.constant 0 : i32
    %c0_i32_0 = arith.constant 0 : i32
    %c0_i32_1 = arith.constant 0 : i32
    return %c0_i32, %c0_i32_0 : i32, i32
  }
  func.func @transform_3(%arg0: i32) -> (i32, i32) {
    %c0_i32 = arith.constant 0 : i32
    %c0_i32_0 = arith.constant 0 : i32
    %c0_i32_1 = arith.constant 0 : i32
    return %c0_i32, %c0_i32_0 : i32, i32
  }
  func.func @transform_4(%arg0: i32) -> (i32, i32) {
    %c0_i32 = arith.constant 0 : i32
    %c0_i32_0 = arith.constant 0 : i32
    %c0_i32_1 = arith.constant 0 : i32
    return %c0_i32, %c0_i32_0 : i32, i32
  }
  func.func @transform_5(%arg0: i32) -> (i32, i32) {
    %c0_i32 = arith.constant 0 : i32
    %c0_i32_0 = arith.constant 0 : i32
    %c0_i32_1 = arith.constant 0 : i32
    return %c0_i32, %c0_i32_0 : i32, i32
  }
  func.func @transform_6(%arg0: i32) -> (i32, i32) {
    %c0_i32 = arith.constant 0 : i32
    %c0_i32_0 = arith.constant 0 : i32
    %c0_i32_1 = arith.constant 0 : i32
    return %c0_i32, %c0_i32_0 : i32, i32
  }
  func.func @transform_7(%arg0: i32) -> (i32, i32) {
    %c0_i32 = arith.constant 0 : i32
    %c0_i32_0 = arith.constant 0 : i32
    %c0_i32_1 = arith.constant 0 : i32
    return %c0_i32, %c0_i32_0 : i32, i32
  }
  func.func @transform_8(%arg0: i32) -> (i32, i32) {
    %c0_i32 = arith.constant 0 : i32
    %c0_i32_0 = arith.constant 0 : i32
    %c0_i32_1 = arith.constant 0 : i32
    return %c0_i32, %c0_i32_0 : i32, i32
  }
}

</mosaic_0001>

<bundles_post_ra>
// kernel: discriminator_forward.4
= control target key start
LH: loop header
LB: loop body
LE: loop exit
PB: predicated region body
PF: predicated region fallthrough
CT: control target
= control target key end

     0   :  { %v1062_v3 = vmov 0.0   ;;  %v1063_v8 = vmov 0   ;;  %vm125_vm0 = vcmask 392192   ;;  %s1546_s0 = inlined_call_operand.vmem [shape: f32[48,2048], index: 0, kind: input, shape index: {}]   ;;  %s1547_s1 = inlined_call_operand.vmem [shape: f32[8,48], index: 1, kind: input, shape index: {}]   ;;  %s1548_s2 = inlined_call_operand.vmem [shape: f32[8,1], index: 2, kind: input, shape index: {}]   ;;  %s1549_s3 = inlined_call_operand.vmem [shape: f32[8,1], index: 3, kind: input, shape index: {}]   ;;  %s1550_s4 = inlined_call_operand.vmem [shape: f32[8,1], index: 4, kind: input, shape index: {}]   ;;  %s1551_s5 = inlined_call_operand.vmem [shape: bf16[8,2048], index: 5, kind: output, shape index: {}]  }
   0x1   :  { %v21_v0 = vld [vmem:[%s1546_s0 + $0x8] sm:$0xff]  ;;  %v23_v2 = vld [vmem:[%s1546_s0 + $0x18] sm:$0xff]  ;;  %193 = vmatprep.mubr.f32.mxu0 %v1062_v3  ;;  %264 = vmatprep.mubr.f32.mxu1 %v1062_v3  ;;  %v20_v6 = vld [vmem:[%s1546_s0] sm:$0xff] }
   0x2   :  { %v37_v1 = vld [vmem:[%s1546_s0 + $0x88] sm:$0xff]  ;;  %v39_v5 = vld [vmem:[%s1546_s0 + $0x98] sm:$0xff]  ;;  %v36_v7 = vld [vmem:[%s1546_s0 + $0x80] sm:$0xff]  ;;  %1058 = vset.pattern.permute.xlu0 %v1063_v8  ;;  %1059 = vset.pattern.permute.xlu1 %v1063_v8 }
   0x3   :  { %v960_v4 = vpack.c.bf16 %v37_v1, %v21_v0  ;;  %v972_v9 = vpack.c.bf16 %v39_v5, %v23_v2  ;;  %v962_v10 = vpack.c.bf16 %v36_v7, %v20_v6  ;;  %v22_v11 = vld [vmem:[%s1546_s0 + $0x10] sm:$0xff]  ;;  %v53_v13 = vld [vmem:[%s1546_s0 + $0x108] sm:$0xff]  ;;  %v55_v16 = vld [vmem:[%s1546_s0 + $0x118] sm:$0xff] }
   0x4   :  { %v38_v12 = vld [vmem:[%s1546_s0 + $0x90] sm:$0xff]  ;;  %v69_v15 = vld [vmem:[%s1546_s0 + $0x188] sm:$0xff]  ;;  %v71_v17 = vld [vmem:[%s1546_s0 + $0x198] sm:$0xff] }
   0x5   :  { %961 = vmatprep.subr.bf16.mxu0 %v960_v4  ;;  %v974_v14 = vpack.c.bf16 %v38_v12, %v22_v11  ;;  %973 = vmatprep.subr.bf16.mxu1 %v972_v9  ;;  %v964_v18 = vpack.c.bf16 %v69_v15, %v53_v13  ;;  %v976_v19 = vpack.c.bf16 %v71_v17, %v55_v16  ;;  %v52_v20 = vld [vmem:[%s1546_s0 + $0x100] sm:$0xff]  ;;  %v54_v22 = vld [vmem:[%s1546_s0 + $0x110] sm:$0xff]  ;;  %v85_v25 = vld [vmem:[%s1546_s0 + $0x208] sm:$0xff] }
   0x6   :  { %963 = vmatpush1.bf16.msra.mxu0 %v962_v10  ;;  %v68_v21 = vld [vmem:[%s1546_s0 + $0x180] sm:$0xff]  ;;  %v70_v24 = vld [vmem:[%s1546_s0 + $0x190] sm:$0xff]  ;;  %v101_v26 = vld [vmem:[%s1546_s0 + $0x288] sm:$0xff] }
   0x7   :  { %975 = vmatpush1.bf16.msra.mxu1 %v974_v14  ;;  %v966_v23 = vpack.c.bf16 %v68_v21, %v52_v20  ;;  %965 = vmatprep.subr.bf16.mxu0 %v964_v18  ;;  %v978_v27 = vpack.c.bf16 %v70_v24, %v54_v22  ;;  %v968_v28 = vpack.c.bf16 %v101_v26, %v85_v25  ;;  %v87_v29 = vld [vmem:[%s1546_s0 + $0x218] sm:$0xff]  ;;  %v84_v31 = vld [vmem:[%s1546_s0 + $0x200] sm:$0xff]  ;;  %v86_v34 = vld [vmem:[%s1546_s0 + $0x210] sm:$0xff] }
   0x8   :  { %977 = vmatprep.subr.bf16.mxu1 %v976_v19  ;;  %v103_v30 = vld [vmem:[%s1546_s0 + $0x298] sm:$0xff]  ;;  %v100_v33 = vld [vmem:[%s1546_s0 + $0x280] sm:$0xff]  ;;  %v102_v35 = vld [vmem:[%s1546_s0 + $0x290] sm:$0xff] }
   0x9   :  { %v980_v32 = vpack.c.bf16 %v103_v30, %v87_v29  ;;  %v970_v36 = vpack.c.bf16 %v100_v33, %v84_v31  ;;  %v25_v37 = vld [vmem:[%s1546_s0 + $0x28] sm:$0xff]  ;;  %v982_v39 = vpack.c.bf16 %v102_v35, %v86_v34  ;;  %v27_v41 = vld [vmem:[%s1546_s0 + $0x38] sm:$0xff]  ;;  %v24_v43 = vld [vmem:[%s1546_s0 + $0x20] sm:$0xff] }
   0xa   :  { %967 = vmatpush1.bf16.msra.mxu0 %v966_v23  ;;  %v41_v38 = vld [vmem:[%s1546_s0 + $0xa8] sm:$0xff]  ;;  %v43_v42 = vld [vmem:[%s1546_s0 + $0xb8] sm:$0xff]  ;;  %v40_v45 = vld [vmem:[%s1546_s0 + $0xa0] sm:$0xff] }
   0xb   :  { %979 = vmatpush1.bf16.msra.mxu1 %v978_v27  ;;  %969 = vmatprep.subr.bf16.mxu0 %v968_v28  ;;  %v984_v40 = vpack.c.bf16 %v41_v38, %v25_v37  ;;  %v996_v44 = vpack.c.bf16 %v43_v42, %v27_v41  ;;  %v26_v46 = vld [vmem:[%s1546_s0 + $0x30] sm:$0xff]  ;;  %v57_v48 = vld [vmem:[%s1546_s0 + $0x128] sm:$0xff]  ;;  %v59_v50 = vld [vmem:[%s1546_s0 + $0x138] sm:$0xff]  ;;  %v986_v52 = vpack.c.bf16 %v40_v45, %v24_v43 }
   0xc   :  { %981 = vmatprep.subr.bf16.mxu1 %v980_v32  ;;  %v42_v47 = vld [vmem:[%s1546_s0 + $0xb0] sm:$0xff]  ;;  %v73_v49 = vld [vmem:[%s1546_s0 + $0x1a8] sm:$0xff]  ;;  %v1204_v51 = vld [vmem:[%s1547_s1] sm:$0xff] }
   0xd   :  { %v75_v53 = vld [vmem:[%s1546_s0 + $0x1b8] sm:$0xff]  ;;  %v998_v54 = vpack.c.bf16 %v42_v47, %v26_v46  ;;  %v988_v55 = vpack.c.bf16 %v73_v49, %v57_v48  ;;  %v56_v56 = vld [vmem:[%s1546_s0 + $0x120] sm:$0xff]  ;;  %v58_v58 = vld [vmem:[%s1546_s0 + $0x130] sm:$0xff] }
   0xe   :  { %971 = vmatpush1.bf16.msra.mxu0 %v970_v36  ;;  %v72_v57 = vld [vmem:[%s1546_s0 + $0x1a0] sm:$0xff]  ;;  %v1000_v59 = vpack.c.bf16 %v75_v53, %v59_v50  ;;  %v74_v60 = vld [vmem:[%s1546_s0 + $0x1b0] sm:$0xff]  ;;  %v89_v61 = vld [vmem:[%s1546_s0 + $0x228] sm:$0xff] }
   0xf   :  { %983 = vmatpush1.bf16.msra.mxu1 %v982_v39  ;;  %985 = vmatprep.subr.bf16.mxu0 %v984_v40  ;;  %v105_v62 = vld [vmem:[%s1546_s0 + $0x2a8] sm:$0xff]  ;;  %v91_v63 = vld [vmem:[%s1546_s0 + $0x238] sm:$0xff]  ;;  %v990_v1 = vpack.c.bf16 %v72_v57, %v56_v56  ;;  %v1002_v2 = vpack.c.bf16 %v74_v60, %v58_v58  ;;  %v88_v5 = vld [vmem:[%s1546_s0 + $0x220] sm:$0xff] }
  0x10   :  { %997 = vmatprep.subr.bf16.mxu1 %v996_v44  ;;  %v107_v0 = vld [vmem:[%s1546_s0 + $0x2b8] sm:$0xff]  ;;  %v992_v4 = vpack.c.bf16 %v105_v62, %v89_v61  ;;  %v104_v6 = vld [vmem:[%s1546_s0 + $0x2a0] sm:$0xff]  ;;  %v90_v7 = vld [vmem:[%s1546_s0 + $0x230] sm:$0xff] }
  0x11   :  { %936 = vmatmul.mubr.msk.f32.vlgmr.msra.gmra.mrb[0].mxu0 %vm125_vm0, %v1204_v51  ;;  %v1004_v8 = vpack.c.bf16 %v107_v0, %v91_v63  ;;  %v106_v9 = vld [vmem:[%s1546_s0 + $0x2b0] sm:$0xff]  ;;  %v29_v10 = vld [vmem:[%s1546_s0 + $0x48] sm:$0xff]  ;;  %v31_v12 = vld [vmem:[%s1546_s0 + $0x58] sm:$0xff]  ;;  %v994_v14 = vpack.c.bf16 %v104_v6, %v88_v5 }
  0x12   :  { %937 = vmatmul.mubr.msk.f32.vlgmr.msra.gmra.mrb[0].mxu1 %vm125_vm0, %v1204_v51  ;;  %987 = vmatpush1.bf16.msra.mxu0 %v986_v52  ;;  %v45_v11 = vld [vmem:[%s1546_s0 + $0xc8] sm:$0xff]  ;;  %v47_v13 = vld [vmem:[%s1546_s0 + $0xd8] sm:$0xff]  ;;  %v1006_v15 = vpack.c.bf16 %v106_v9, %v90_v7  ;;  %v28_v17 = vld [vmem:[%s1546_s0 + $0x40] sm:$0xff] }
  0x13   :  { %999 = vmatpush1.bf16.msra.mxu1 %v998_v54  ;;  %989 = vmatprep.subr.bf16.mxu0 %v988_v55  ;;  %v1008_v16 = vpack.c.bf16 %v45_v11, %v29_v10  ;;  %v44_v18 = vld [vmem:[%s1546_s0 + $0xc0] sm:$0xff]  ;;  %v30_v19 = vld [vmem:[%s1546_s0 + $0x50] sm:$0xff]  ;;  %v1020_v20 = vpack.c.bf16 %v47_v13, %v31_v12  ;;  %v61_v22 = vld [vmem:[%s1546_s0 + $0x148] sm:$0xff] }
  0x14   :  { %1001 = vmatprep.subr.bf16.mxu1 %v1000_v59  ;;  %335 = vmatprep.mubr.f32.mxu0 %v1062_v3  ;;  %v46_v21 = vld [vmem:[%s1546_s0 + $0xd0] sm:$0xff]  ;;  %v77_v23 = vld [vmem:[%s1546_s0 + $0x1c8] sm:$0xff]  ;;  %v63_v24 = vld [vmem:[%s1546_s0 + $0x158] sm:$0xff]  ;;  %v1010_v26 = vpack.c.bf16 %v44_v18, %v28_v17 }
  0x15   :  { %406 = vmatprep.mubr.f32.mxu1 %v1062_v3  ;;  %v79_v25 = vld [vmem:[%s1546_s0 + $0x1d8] sm:$0xff]  ;;  %v1022_v27 = vpack.c.bf16 %v46_v21, %v30_v19  ;;  %v1012_v28 = vpack.c.bf16 %v77_v23, %v61_v22  ;;  %v60_v29 = vld [vmem:[%s1546_s0 + $0x140] sm:$0xff]  ;;  %v62_v31 = vld [vmem:[%s1546_s0 + $0x150] sm:$0xff] }
  0x16   :  { %991 = vmatpush1.bf16.msra.mxu0 %v990_v1  ;;  %v76_v30 = vld [vmem:[%s1546_s0 + $0x1c0] sm:$0xff]  ;;  %v1024_v32 = vpack.c.bf16 %v79_v25, %v63_v24  ;;  %v78_v33 = vld [vmem:[%s1546_s0 + $0x1d0] sm:$0xff]  ;;  %v93_v34 = vld [vmem:[%s1546_s0 + $0x248] sm:$0xff] }
  0x17   :  { %1003 = vmatpush1.bf16.msra.mxu1 %v1002_v2  ;;  %993 = vmatprep.subr.bf16.mxu0 %v992_v4  ;;  %v109_v35 = vld [vmem:[%s1546_s0 + $0x2c8] sm:$0xff]  ;;  %v95_v36 = vld [vmem:[%s1546_s0 + $0x258] sm:$0xff]  ;;  %v1014_v38 = vpack.c.bf16 %v76_v30, %v60_v29  ;;  %v1026_v39 = vpack.c.bf16 %v78_v33, %v62_v31  ;;  %v92_v41 = vld [vmem:[%s1546_s0 + $0x240] sm:$0xff] }
  0x18   :  { %1005 = vmatprep.subr.bf16.mxu1 %v1004_v8  ;;  %v111_v37 = vld [vmem:[%s1546_s0 + $0x2d8] sm:$0xff]  ;;  %v1016_v40 = vpack.c.bf16 %v109_v35, %v93_v34  ;;  %v108_v42 = vld [vmem:[%s1546_s0 + $0x2c0] sm:$0xff]  ;;  %v94_v43 = vld [vmem:[%s1546_s0 + $0x250] sm:$0xff] }
  0x19   :  { %v1028_v44 = vpack.c.bf16 %v111_v37, %v95_v36  ;;  %v110_v45 = vld [vmem:[%s1546_s0 + $0x2d0] sm:$0xff]  ;;  %v33_v46 = vld [vmem:[%s1546_s0 + $0x68] sm:$0xff]  ;;  %v35_v48 = vld [vmem:[%s1546_s0 + $0x78] sm:$0xff]  ;;  %v1018_v50 = vpack.c.bf16 %v108_v42, %v92_v41 }
  0x1a   :  { %995 = vmatpush1.bf16.msra.mxu0 %v994_v14  ;;  %v49_v47 = vld [vmem:[%s1546_s0 + $0xe8] sm:$0xff]  ;;  %v51_v49 = vld [vmem:[%s1546_s0 + $0xf8] sm:$0xff]  ;;  %v117_v52 = vld [vmem:[%s1548_s2] sm:$0xff]  ;;  %v1030_v53 = vpack.c.bf16 %v110_v45, %v94_v43 }
  0x1b   :  { %1007 = vmatpush1.bf16.msra.mxu1 %v1006_v15  ;;  %1009 = vmatprep.subr.bf16.mxu0 %v1008_v16  ;;  %v1032_v54 = vpack.c.bf16 %v49_v47, %v33_v46  ;;  %v32_v55 = vld [vmem:[%s1546_s0 + $0x60] sm:$0xff]  ;;  %v34_v57 = vld [vmem:[%s1546_s0 + $0x70] sm:$0xff]  ;;  %v1044_v58 = vpack.c.bf16 %v51_v49, %v35_v48  ;;  %v65_v60 = vld [vmem:[%s1546_s0 + $0x168] sm:$0xff] }
  0x1c   :  { %1021 = vmatprep.subr.bf16.mxu1 %v1020_v20  ;;  %v48_v56 = vld [vmem:[%s1546_s0 + $0xe0] sm:$0xff]  ;;  %v50_v59 = vld [vmem:[%s1546_s0 + $0xf0] sm:$0xff]  ;;  %v81_v61 = vld [vmem:[%s1546_s0 + $0x1e8] sm:$0xff]  ;;  %122 = vperm.xlu0 %1058, %v117_v52  }
  0x1d   :  { %938 = vmatmul.mubr.msk.f32.vlgmr.msra.gmra.mrb[2].mxu0 %vm125_vm0, %v1204_v51  ;;  %v67_v62 = vld [vmem:[%s1546_s0 + $0x178] sm:$0xff]  ;;  %v1034_v0 = vpack.c.bf16 %v48_v56, %v32_v55  ;;  %v1046_v1 = vpack.c.bf16 %v50_v59, %v34_v57  ;;  %v1036_v2 = vpack.c.bf16 %v81_v61, %v65_v60  ;;  %v64_v4 = vld [vmem:[%s1546_s0 + $0x160] sm:$0xff]  ;;  %v66_v6 = vld [vmem:[%s1546_s0 + $0x170] sm:$0xff] }
  0x1e   :  { %939 = vmatmul.mubr.msk.f32.vlgmr.msra.gmra.mrb[2].mxu1 %vm125_vm0, %v1204_v51  ;;  %1011 = vmatpush1.bf16.msra.mxu0 %v1010_v26  ;;  %v83_v63 = vld [vmem:[%s1546_s0 + $0x1f8] sm:$0xff]  ;;  %v80_v5 = vld [vmem:[%s1546_s0 + $0x1e0] sm:$0xff]  ;;  %v82_v8 = vld [vmem:[%s1546_s0 + $0x1f0] sm:$0xff] }
  0x1f   :  { %1023 = vmatpush1.bf16.msra.mxu1 %v1022_v27  ;;  %1013 = vmatprep.subr.bf16.mxu0 %v1012_v28  ;;  %v1048_v7 = vpack.c.bf16 %v83_v63, %v67_v62  ;;  %v97_v9 = vld [vmem:[%s1546_s0 + $0x268] sm:$0xff]  ;;  %v99_v11 = vld [vmem:[%s1546_s0 + $0x278] sm:$0xff]  ;;  %v1038_v13 = vpack.c.bf16 %v80_v5, %v64_v4  ;;  %v1050_v14 = vpack.c.bf16 %v82_v8, %v66_v6  ;;  %v96_v16 = vld [vmem:[%s1546_s0 + $0x260] sm:$0xff] }
  0x20   :  { %1025 = vmatprep.subr.bf16.mxu1 %v1024_v32  ;;  %477 = vmatprep.mubr.f32.mxu0 %v1062_v3  ;;  %v113_v10 = vld [vmem:[%s1546_s0 + $0x2e8] sm:$0xff]  ;;  %v115_v12 = vld [vmem:[%s1546_s0 + $0x2f8] sm:$0xff]  ;;  %v112_v17 = vld [vmem:[%s1546_s0 + $0x2e0] sm:$0xff] }
  0x21   :  { %548 = vmatprep.mubr.f32.mxu1 %v1062_v3  ;;  %v1040_v15 = vpack.c.bf16 %v113_v10, %v97_v9  ;;  %v1052_v18 = vpack.c.bf16 %v115_v12, %v99_v11  ;;  %v98_v19 = vld [vmem:[%s1546_s0 + $0x270] sm:$0xff]  ;;  %v1042_v21 = vpack.c.bf16 %v112_v17, %v96_v16 }
  0x22   :  { %1015 = vmatpush1.bf16.msra.mxu0 %v1014_v38  ;;  %v114_v20 = vld [vmem:[%s1546_s0 + $0x2f0] sm:$0xff] }
  0x23   :  { %1027 = vmatpush1.bf16.msra.mxu1 %v1026_v39  ;;  %1017 = vmatprep.subr.bf16.mxu0 %v1016_v40  ;;  %v1054_v22 = vpack.c.bf16 %v114_v20, %v98_v19 }
  0x24   :  { %1029 = vmatprep.subr.bf16.mxu1 %v1028_v44 }
  0x26   :  { %1019 = vmatpush1.bf16.msra.mxu0 %v1018_v50 }
  0x27   :  { %1031 = vmatpush1.bf16.msra.mxu1 %v1030_v53  ;;  %1033 = vmatprep.subr.bf16.mxu0 %v1032_v54 }
  0x28   :  { %1045 = vmatprep.subr.bf16.mxu1 %v1044_v58 }
  0x29   :  { %940 = vmatmul.mubr.msk.f32.vlgmr.msra.gmra.mrb[4].mxu0 %vm125_vm0, %v1204_v51 }
  0x2a   :  { %941 = vmatmul.mubr.msk.f32.vlgmr.msra.gmra.mrb[4].mxu1 %vm125_vm0, %v1204_v51  ;;  %1035 = vmatpush1.bf16.msra.mxu0 %v1034_v0 }
  0x2b   :  { %1047 = vmatpush1.bf16.msra.mxu1 %v1046_v1  ;;  %1037 = vmatprep.subr.bf16.mxu0 %v1036_v2 }
  0x2c   :  { %1049 = vmatprep.subr.bf16.mxu1 %v1048_v7  ;;  %619 = vmatprep.mubr.f32.mxu0 %v1062_v3 }
  0x2d   :  { %690 = vmatprep.mubr.f32.mxu1 %v1062_v3 }
  0x2e   :  { %1039 = vmatpush1.bf16.msra.mxu0 %v1038_v13 }
  0x2f   :  { %1051 = vmatpush1.bf16.msra.mxu1 %v1050_v14  ;;  %1041 = vmatprep.subr.bf16.mxu0 %v1040_v15 }
  0x30   :  { %1053 = vmatprep.subr.bf16.mxu1 %v1052_v18 }
  0x32   :  { %1043 = vmatpush1.bf16.msra.mxu0 %v1042_v21 }
  0x33   :  { %1055 = vmatpush1.bf16.msra.mxu1 %v1054_v22 }
  0x35   :  { %942 = vmatmul.mubr.msk.f32.vlgmr.msra.gmra.mrb[6].mxu0 %vm125_vm0, %v1204_v51 }
  0x36   :  { %943 = vmatmul.mubr.msk.f32.vlgmr.msra.gmra.mrb[6].mxu1 %vm125_vm0, %v1204_v51 }
  0x9b   :  { %v1414_v23 = vpop.permute.xlu0 %122 }
  0xe4   :  { %v195_v24 = vpop.f32.mrb[0].mxu0 }
  0xe5   :  { %v196_v25 = vadd.f32 %v195_v24, %v1414_v23  ;;  %v197_v3 = vpop.f32.mrb[1].mxu0  ;;  %v266_v26 = vpop.f32.mrb[0].mxu1 }
  0xe6   :  { %v198_v27 = vadd.f32 %v197_v3, %v1414_v23  ;;  %v267_v28 = vadd.f32 %v266_v26, %v1414_v23  ;;  %v268_v29 = vpop.f32.mrb[1].mxu1 }
  0xe7   :  { %vm697_vm1 = vcmp.ge.f32.partialorder %v196_v25, 0.0  ;;  %v713_v30 = vmul.f32 0.2, %v196_v25  ;;  %v269_v31 = vadd.f32 %v268_v29, %v1414_v23 }
  0xe8   :  { %vm698_vm2 = vcmp.ge.f32.partialorder %v198_v27, 0.0  ;;  %v714_v32 = vmul.f32 0.2, %v198_v27  ;;  %vm699_vm3 = vcmp.ge.f32.partialorder %v267_v28, 0.0  ;;  %v715_v51 = vmul.f32 0.2, %v267_v28 }
  0xe9   :  { %v1420_v33 = vsel %vm697_vm1, %v196_v25, %v713_v30  ;;  %v716_v39 = vmul.f32 0.2, %v269_v31  ;;  %vm700_vm4 = vcmp.ge.f32.partialorder %v269_v31, 0.0 }
  0xea   :  { %v763_v34 = vmul.f32 %v1420_v33, %v1420_v33  ;;  %v1424_v35 = vsel %vm698_vm2, %v198_v27, %v714_v32  ;;  %v1426_v36 = vsel %vm699_vm3, %v267_v28, %v715_v51 }
  0xeb   :  { %v764_v37 = vmul.f32 %v1424_v35, %v1424_v35  ;;  %v745_v38 = vadd.f32 %v1424_v35, %v1420_v33  ;;  %v765_v41 = vmul.f32 %v1426_v36, %v1426_v36  ;;  %v1435_v43 = vsel %vm700_vm4, %v269_v31, %v716_v39 }
  0xec   :  { %v766_v53 = vmul.f32 %v1435_v43, %v1435_v43 }
  0xed   :  { %v779_v40 = vadd.f32 %v764_v37, %v763_v34  ;;  %v746_v42 = vadd.f32 %v745_v38, %v1426_v36 }
  0xef   :  { %v780_v45 = vadd.f32 %v779_v40, %v765_v41  ;;  %v747_v55 = vadd.f32 %v746_v42, %v1435_v43 }
  0xf0   :  { %v337_v44 = vpop.f32.mrb[2].mxu0 }
  0xf1   :  { %v338_v46 = vadd.f32 %v337_v44, %v1414_v23  ;;  %v408_v47 = vpop.f32.mrb[2].mxu1  ;;  %v339_v48 = vpop.f32.mrb[3].mxu0  ;;  %v781_v58 = vadd.f32 %v780_v45, %v766_v53 }
  0xf2   :  { %v409_v49 = vadd.f32 %v408_v47, %v1414_v23  ;;  %v340_v50 = vadd.f32 %v339_v48, %v1414_v23  ;;  %v410_v52 = vpop.f32.mrb[3].mxu1 }
  0xf3   :  { %vm701_vm5 = vcmp.ge.f32.partialorder %v338_v46, 0.0  ;;  %v717_v54 = vmul.f32 0.2, %v338_v46  ;;  %v411_v57 = vadd.f32 %v410_v52, %v1414_v23 }
  0xf4   :  { %vm702_vm6 = vcmp.ge.f32.partialorder %v340_v50, 0.0  ;;  %v718_v56 = vmul.f32 0.2, %v340_v50  ;;  %v719_v60 = vmul.f32 0.2, %v409_v49  ;;  %vm703_vm7 = vcmp.ge.f32.partialorder %v409_v49, 0.0 }
  0xf5   :  { %v1444_v59 = vsel %vm701_vm5, %v338_v46, %v717_v54  ;;  %v720_v4 = vmul.f32 0.2, %v411_v57  ;;  %vm704_vm8 = vcmp.ge.f32.partialorder %v411_v57, 0.0 }
  0xf6   :  { %v748_v61 = vadd.f32 %v747_v55, %v1444_v59  ;;  %v767_v62 = vmul.f32 %v1444_v59, %v1444_v59  ;;  %v1449_v63 = vsel %vm702_vm6, %v340_v50, %v718_v56  ;;  %v1454_v5 = vsel %vm703_vm7, %v409_v49, %v719_v60 }
  0xf7   :  { %v768_v0 = vmul.f32 %v1449_v63, %v1449_v63  ;;  %v769_v7 = vmul.f32 %v1454_v5, %v1454_v5  ;;  %v1458_v8 = vsel %vm704_vm8, %v411_v57, %v720_v4 }
  0xf8   :  { %v782_v1 = vadd.f32 %v781_v58, %v767_v62  ;;  %v749_v2 = vadd.f32 %v748_v61, %v1449_v63  ;;  %v770_v18 = vmul.f32 %v1458_v8, %v1458_v8 }
  0xfa   :  { %v783_v6 = vadd.f32 %v782_v1, %v768_v0  ;;  %v750_v9 = vadd.f32 %v749_v2, %v1454_v5 }
  0xfc   :  { %v479_v10 = vpop.f32.mrb[4].mxu0  ;;  %v784_v14 = vadd.f32 %v783_v6, %v769_v7  ;;  %v751_v21 = vadd.f32 %v750_v9, %v1458_v8 }
  0xfd   :  { %v480_v11 = vadd.f32 %v479_v10, %v1414_v23  ;;  %v550_v12 = vpop.f32.mrb[4].mxu1  ;;  %v481_v13 = vpop.f32.mrb[5].mxu0 }
  0xfe   :  { %v551_v15 = vadd.f32 %v550_v12, %v1414_v23  ;;  %v482_v16 = vadd.f32 %v481_v13, %v1414_v23  ;;  %v552_v17 = vpop.f32.mrb[5].mxu1  ;;  %v785_v3 = vadd.f32 %v784_v14, %v770_v18 }
  0xff   :  { %vm705_vm9 = vcmp.ge.f32.partialorder %v480_v11, 0.0  ;;  %v721_v19 = vmul.f32 0.2, %v480_v11  ;;  %v553_v20 = vadd.f32 %v552_v17, %v1414_v23 }
 0x100   :  { %v723_v22 = vmul.f32 0.2, %v551_v15  ;;  %vm706_vm10 = vcmp.ge.f32.partialorder %v482_v16, 0.0  ;;  %v722_v24 = vmul.f32 0.2, %v482_v16  ;;  %vm707_vm11 = vcmp.ge.f32.partialorder %v551_v15, 0.0 }
 0x101   :  { %v1468_v25 = vsel %vm705_vm9, %v480_v11, %v721_v19  ;;  %v724_v30 = vmul.f32 0.2, %v553_v20  ;;  %vm708_vm12 = vcmp.ge.f32.partialorder %v553_v20, 0.0 }
 0x102   :  { %v752_v26 = vadd.f32 %v751_v21, %v1468_v25  ;;  %v771_v27 = vmul.f32 %v1468_v25, %v1468_v25  ;;  %v1473_v28 = vsel %vm706_vm10, %v482_v16, %v722_v24  ;;  %v1477_v32 = vsel %vm707_vm11, %v551_v15, %v723_v22  ;;  %v118_v21 = vld [vmem:[%s1549_s3] sm:$0xff] }
 0x103   :  { %v772_v29 = vmul.f32 %v1473_v28, %v1473_v28  ;;  %v773_v37 = vmul.f32 %v1477_v32, %v1477_v32  ;;  %v1482_v38 = vsel %vm708_vm12, %v553_v20, %v724_v30 }
 0x104   :  { %v786_v31 = vadd.f32 %v785_v3, %v771_v27  ;;  %v753_v51 = vadd.f32 %v752_v26, %v1473_v28  ;;  %v774_v46 = vmul.f32 %v1482_v38, %v1482_v38  ;;  %v119_v3 = vld [vmem:[%s1550_s4] sm:$0xff] }
 0x106   :  { %v787_v34 = vadd.f32 %v786_v31, %v772_v29  ;;  %v754_v39 = vadd.f32 %v753_v51, %v1477_v32 }
 0x108   :  { %v621_v40 = vpop.f32.mrb[6].mxu0  ;;  %v788_v45 = vadd.f32 %v787_v34, %v773_v37  ;;  %v755_v50 = vadd.f32 %v754_v39, %v1482_v38 }
 0x109   :  { %v622_v41 = vadd.f32 %v621_v40, %v1414_v23  ;;  %v692_v42 = vpop.f32.mrb[6].mxu1  ;;  %v623_v44 = vpop.f32.mrb[7].mxu0 }
 0x10a   :  { %v693_v47 = vadd.f32 %v692_v42, %v1414_v23  ;;  %v624_v48 = vadd.f32 %v623_v44, %v1414_v23  ;;  %v694_v49 = vpop.f32.mrb[7].mxu1  ;;  %v789_v58 = vadd.f32 %v788_v45, %v774_v46 }
 0x10b   :  { %vm709_vm13 = vcmp.ge.f32.partialorder %v622_v41, 0.0  ;;  %v725_v52 = vmul.f32 0.2, %v622_v41  ;;  %v695_v53 = vadd.f32 %v694_v49, %v1414_v23 }
 0x10c   :  { %vm711_vm14 = vcmp.ge.f32.partialorder %v693_v47, 0.0  ;;  %v727_v54 = vmul.f32 0.2, %v693_v47  ;;  %vm710_vm15 = vcmp.ge.f32.partialorder %v624_v48, 0.0  ;;  %v726_v55 = vmul.f32 0.2, %v624_v48 }
 0x10d   :  { %v1492_v56 = vsel %vm709_vm13, %v622_v41, %v725_v52  ;;  %v728_v57 = vmul.f32 0.2, %v695_v53  ;;  %vm712_vm0 = vcmp.ge.f32.partialorder %v695_v53, 0.0 }
 0x10e   :  { %v756_v60 = vadd.f32 %v755_v50, %v1492_v56  ;;  %v775_v61 = vmul.f32 %v1492_v56, %v1492_v56  ;;  %v1497_v62 = vsel %vm710_vm15, %v624_v48, %v726_v55  ;;  %v743_v0 = vsel %vm711_vm14, %v693_v47, %v727_v54 }
 0x10f   :  { %v776_v23 = vmul.f32 %v1497_v62, %v1497_v62  ;;  %v744_v4 = vsel %vm712_vm0, %v695_v53, %v728_v57  ;;  %v777_v7 = vmul.f32 %v743_v0, %v743_v0 }
 0x110   :  { %v757_v1 = vadd.f32 %v756_v60, %v1497_v62  ;;  %v790_v2 = vadd.f32 %v789_v58, %v775_v61  ;;  %v778_v11 = vmul.f32 %v744_v4, %v744_v4 }
 0x112   :  { %v758_v6 = vadd.f32 %v757_v1, %v743_v0  ;;  %v791_v9 = vadd.f32 %v790_v2, %v776_v23 }
 0x114   :  { %v759_v10 = vadd.f32 %v758_v6, %v744_v4  ;;  %v792_v12 = vadd.f32 %v791_v9, %v777_v7 }
 0x116   :  { %760 = vadd.xlane.f32.xlu0 %v759_v10  ;;  %v793_v13 = vadd.f32 %v792_v12, %v778_v11 }
 0x118   :  { %794 = vadd.xlane.f32.xlu1 %v793_v13 }
 0x1a3   :  { %v761_v14 = vpop.xlane.xlu0 %760 }
 0x1a4   :  { %v762_v15 = vmul.f32 0.00048828125, %v761_v14 }
 0x1a5   :  { %v795_v16 = vpop.xlane.xlu1 %794 }
 0x1a6   :  { %v796_v17 = vmul.f32 0.00048828125, %v795_v16  ;;  %v797_v18 = vmul.f32 %v762_v15, %v762_v15  ;;  %v801_v26 = vsub.f32 %v1420_v33, %v762_v15  ;;  %v802_v27 = vsub.f32 %v1424_v35, %v762_v15 }
 0x1a7   :  { %v803_v29 = vsub.f32 %v1426_v36, %v762_v15  ;;  %v804_v30 = vsub.f32 %v1435_v43, %v762_v15  ;;  %v805_v31 = vsub.f32 %v1444_v59, %v762_v15  ;;  %v806_v51 = vsub.f32 %v1449_v63, %v762_v15 }
 0x1a8   :  { %v798_v19 = vsub.f32 %v796_v17, %v797_v18  ;;  %v807_v34 = vsub.f32 %v1454_v5, %v762_v15  ;;  %v808_v37 = vsub.f32 %v1458_v8, %v762_v15  ;;  %v809_v39 = vsub.f32 %v1468_v25, %v762_v15 }
 0x1a9   :  { %v810_v40 = vsub.f32 %v1473_v28, %v762_v15  ;;  %v811_v33 = vsub.f32 %v1477_v32, %v762_v15  ;;  %v812_v35 = vsub.f32 %v1482_v38, %v762_v15  ;;  %v813_v36 = vsub.f32 %v1492_v56, %v762_v15 }
 0x1aa   :  { %v799_v20 = vadd.f32 1e-05, %v798_v19  ;;  %v814_v43 = vsub.f32 %v1497_v62, %v762_v15  ;;  %v815_v59 = vsub.f32 %v743_v0, %v762_v15  ;;  %v816_v42 = vsub.f32 %v744_v4, %v762_v15 }
 0x1ac   :  { %1060 = vrsqrt.f32 %v799_v20 }
 0x1b6   :  { %v1061_v22 = vpop.eup %1060 }
 0x1b7   :  { %v817_v24 = vmul.f32 %v1061_v22, %v118_v21 }
 0x1b9   :  { %820 = vperm.xlu1 %1059, %v817_v24  }
 0x1bd   :  { %841 = vperm.xlu1 %1059, %v119_v3  }
 0x238   :  { %v821_v41 = vpop.permute.xlu1 %820 }
 0x239   :  { %v823_v63 = vmul.f32 %v821_v41, %v801_v26  ;;  %v824_v44 = vmul.f32 %v821_v41, %v802_v27  ;;  %v825_v5 = vmul.f32 %v821_v41, %v803_v29  ;;  %v826_v45 = vmul.f32 %v821_v41, %v804_v30 }
 0x23a   :  { %v827_v8 = vmul.f32 %v821_v41, %v805_v31  ;;  %v828_v46 = vmul.f32 %v821_v41, %v806_v51  ;;  %v829_v25 = vmul.f32 %v821_v41, %v807_v34  ;;  %v830_v47 = vmul.f32 %v821_v41, %v808_v37 }
 0x23b   :  { %v831_v28 = vmul.f32 %v821_v41, %v809_v39  ;;  %v832_v48 = vmul.f32 %v821_v41, %v810_v40  ;;  %v833_v32 = vmul.f32 %v821_v41, %v811_v33  ;;  %v834_v49 = vmul.f32 %v821_v41, %v812_v35 }
 0x23c   :  { %v835_v38 = vmul.f32 %v821_v41, %v813_v36  ;;  %v836_v50 = vmul.f32 %v821_v41, %v814_v43  ;;  %v837_v52 = vmul.f32 %v821_v41, %v815_v59  ;;  %v838_v53 = vmul.f32 %v821_v41, %v816_v42  ;;  %v842_v54 = vpop.permute.xlu1 %841 }
 0x23d   :  { %v844_v55 = vadd.f32 %v842_v54, %v823_v63  ;;  %v845_v56 = vadd.f32 %v842_v54, %v824_v44  ;;  %v846_v57 = vadd.f32 %v842_v54, %v825_v5  ;;  %v847_v58 = vadd.f32 %v842_v54, %v826_v45 }
 0x23e   :  { %v848_v60 = vadd.f32 %v842_v54, %v827_v8  ;;  %v849_v61 = vadd.f32 %v842_v54, %v828_v46  ;;  %v850_v62 = vadd.f32 %v842_v54, %v829_v25  ;;  %v851_v0 = vadd.f32 %v842_v54, %v830_v47 }
 0x23f   :  { %v852_v23 = vadd.f32 %v842_v54, %v831_v28  ;;  %v853_v1 = vadd.f32 %v842_v54, %v832_v48  ;;  %v854_v2 = vadd.f32 %v842_v54, %v833_v32  ;;  %v855_v4 = vadd.f32 %v842_v54, %v834_v49 }
 0x240   :  { %v856_v6 = vadd.f32 %v842_v54, %v835_v38  ;;  %v857_v7 = vadd.f32 %v842_v54, %v836_v50  ;;  %v858_v9 = vadd.f32 %v842_v54, %v837_v52  ;;  %v859_v10 = vadd.f32 %v842_v54, %v838_v53 }
 0x241   :  { %v952_v11 = vpack.c.bf16 %v845_v56, %v844_v55  ;;  %v953_v12 = vpack.c.bf16 %v847_v58, %v846_v57  ;;  %v954_v13 = vpack.c.bf16 %v849_v61, %v848_v60  ;;  %v955_v14 = vpack.c.bf16 %v851_v0, %v850_v62 }
 0x242   :  { %v956_v15 = vpack.c.bf16 %v853_v1, %v852_v23  ;;  %v957_v16 = vpack.c.bf16 %v855_v4, %v854_v2  ;;  %v958_v17 = vpack.c.bf16 %v857_v7, %v856_v6  ;;  %v959_v18 = vpack.c.bf16 %v859_v10, %v858_v9 }
 0x243   :  { %924 = vst [vmem:[%s1551_s5] sm:$0xff] %v952_v11  ;;  %925 = vst [vmem:[%s1551_s5 + $0x8] sm:$0xff] %v953_v12 }
 0x244   :  { %926 = vst [vmem:[%s1551_s5 + $0x10] sm:$0xff] %v954_v13  ;;  %927 = vst [vmem:[%s1551_s5 + $0x18] sm:$0xff] %v955_v14 }
 0x245   :  { %928 = vst [vmem:[%s1551_s5 + $0x20] sm:$0xff] %v956_v15  ;;  %929 = vst [vmem:[%s1551_s5 + $0x28] sm:$0xff] %v957_v16 }
 0x246   :  { %930 = vst [vmem:[%s1551_s5 + $0x30] sm:$0xff] %v958_v17  ;;  %931 = vst [vmem:[%s1551_s5 + $0x38] sm:$0xff] %v959_v18 }

// kernel: discriminator_forward.5
= control target key start
LH: loop header
LB: loop body
LE: loop exit
PB: predicated region body
PF: predicated region fallthrough
CT: control target
= control target key end

     0   :  { %v590_v1 = vmov 0.0   ;;  %v591_v3 = vmov 0   ;;  %s808_s0 = inlined_call_operand.vmem [shape: bf16[128,512], index: 0, kind: input, shape index: {}]   ;;  %s809_s2 = inlined_call_operand.vmem [shape: f32[16,1], index: 2, kind: input, shape index: {}]   ;;  %s810_s1 = inlined_call_operand.vmem [shape: f32[16,128], index: 1, kind: input, shape index: {}]   ;;  %s811_s4 = inlined_call_operand.vmem [shape: f32[16,1], index: 4, kind: input, shape index: {}]   ;;  %s812_s3 = inlined_call_operand.vmem [shape: f32[16,1], index: 3, kind: input, shape index: {}]   ;;  %s813_s5 = inlined_call_operand.vmem [shape: bf16[16,512], index: 5, kind: output, shape index: {}]  }
   0x1   :  { %v538_v0 = vld [vmem:[%s808_s0 + $0x4] ss:$16 sps:$4 sm:$0xff]   ;;  %198 = vmatprep.mubr.f32.mxu0 %v590_v1  ;;  %275 = vmatprep.mubr.f32.mxu1 %v590_v1  ;;  %v540_v2 = vld [vmem:[%s808_s0 + $0xc] ss:$16 sps:$4 sm:$0xff]   ;;  %v542_v4 = vld [vmem:[%s808_s0] ss:$16 sps:$4 sm:$0xff]  }
   0x2   :  { %536 = vset.pattern.permute.xlu0 %v591_v3  ;;  %537 = vset.pattern.permute.xlu1 %v591_v3  ;;  %v543_v5 = vld [vmem:[%s808_s0 + $0x8] ss:$16 sps:$4 sm:$0xff]   ;;  %v544_v6 = vld [vmem:[%s808_s0 + $0x24] ss:$16 sps:$4 sm:$0xff]   ;;  %v546_v7 = vld [vmem:[%s808_s0 + $0x2c] ss:$16 sps:$4 sm:$0xff]  }
   0x3   :  { %439 = vmatprep.subr.bf16.mxu0 %v538_v0  ;;  %471 = vmatprep.subr.bf16.mxu1 %v540_v2  ;;  %v548_v8 = vld [vmem:[%s808_s0 + $0x20] ss:$16 sps:$4 sm:$0xff]   ;;  %v549_v9 = vld [vmem:[%s808_s0 + $0x28] ss:$16 sps:$4 sm:$0xff]   ;;  %v550_v10 = vld [vmem:[%s808_s0 + $0x44] ss:$16 sps:$4 sm:$0xff]  }
   0x4   :  { %441 = vmatpush1.bf16.msra.mxu0 %v542_v4  ;;  %473 = vmatpush1.bf16.msra.mxu1 %v543_v5  ;;  %v552_v11 = vld [vmem:[%s808_s0 + $0x4c] ss:$16 sps:$4 sm:$0xff]   ;;  %v554_v12 = vld [vmem:[%s808_s0 + $0x40] ss:$16 sps:$4 sm:$0xff]   ;;  %v555_v13 = vld [vmem:[%s808_s0 + $0x48] ss:$16 sps:$4 sm:$0xff]  }
   0x5   :  { %443 = vmatprep.subr.bf16.mxu0 %v544_v6  ;;  %475 = vmatprep.subr.bf16.mxu1 %v546_v7  ;;  %v556_v14 = vld [vmem:[%s808_s0 + $0x64] ss:$16 sps:$4 sm:$0xff]   ;;  %v558_v15 = vld [vmem:[%s808_s0 + $0x6c] ss:$16 sps:$4 sm:$0xff]   ;;  %v560_v16 = vld [vmem:[%s808_s0 + $0x60] ss:$16 sps:$4 sm:$0xff]  }
   0x6   :  { %v561_v17 = vld [vmem:[%s808_s0 + $0x68] ss:$16 sps:$4 sm:$0xff]   ;;  %v562_v18 = vld [vmem:[%s808_s0 + $0x84] ss:$16 sps:$4 sm:$0xff]   ;;  %v564_v19 = vld [vmem:[%s808_s0 + $0x8c] ss:$16 sps:$4 sm:$0xff]  }
   0x7   :  { %v566_v20 = vld [vmem:[%s808_s0 + $0x80] ss:$16 sps:$4 sm:$0xff]   ;;  %v567_v21 = vld [vmem:[%s808_s0 + $0x88] ss:$16 sps:$4 sm:$0xff]   ;;  %v568_v22 = vld [vmem:[%s808_s0 + $0xa4] ss:$16 sps:$4 sm:$0xff]  }
   0x8   :  { %445 = vmatpush1.bf16.msra.mxu0 %v548_v8  ;;  %477 = vmatpush1.bf16.msra.mxu1 %v549_v9  ;;  %v570_v23 = vld [vmem:[%s808_s0 + $0xac] ss:$16 sps:$4 sm:$0xff]   ;;  %v572_v24 = vld [vmem:[%s808_s0 + $0xa0] ss:$16 sps:$4 sm:$0xff]   ;;  %v573_v25 = vld [vmem:[%s808_s0 + $0xa8] ss:$16 sps:$4 sm:$0xff]  }
   0x9   :  { %447 = vmatprep.subr.bf16.mxu0 %v550_v10  ;;  %479 = vmatprep.subr.bf16.mxu1 %v552_v11  ;;  %v574_v26 = vld [vmem:[%s808_s0 + $0xc4] ss:$16 sps:$4 sm:$0xff]   ;;  %v576_v27 = vld [vmem:[%s808_s0 + $0xcc] ss:$16 sps:$4 sm:$0xff]   ;;  %v578_v29 = vld [vmem:[%s808_s0 + $0xc0] ss:$16 sps:$4 sm:$0xff]  }
   0xa   :  { %v54_v28 = vld [vmem:[%s809_s2] sm:$0xff]  ;;  %v579_v30 = vld [vmem:[%s808_s0 + $0xc8] ss:$16 sps:$4 sm:$0xff]   ;;  %v582_v33 = vld [vmem:[%s808_s0 + $0xec] ss:$16 sps:$4 sm:$0xff]  }
   0xb   :  { %126 = vperm.xlu0 %536, %v54_v28   ;;  %v55_v31 = vld [vmem:[%s809_s2 + $0x8] sm:$0xff]  ;;  %v580_v32 = vld [vmem:[%s808_s0 + $0xe4] ss:$16 sps:$4 sm:$0xff]   ;;  %v584_v34 = vld [vmem:[%s808_s0 + $0xe0] ss:$16 sps:$4 sm:$0xff]  }
   0xc   :  { %449 = vmatpush1.bf16.msra.mxu0 %v554_v12  ;;  %481 = vmatpush1.bf16.msra.mxu1 %v555_v13  ;;  %v585_v35 = vld [vmem:[%s808_s0 + $0xe8] ss:$16 sps:$4 sm:$0xff]   ;;  %v52_v36 = vld [vmem:[%s810_s1] sm:$0xff] }
   0xd   :  { %451 = vmatprep.subr.bf16.mxu0 %v556_v14  ;;  %483 = vmatprep.subr.bf16.mxu1 %v558_v15  ;;  %v53_v37 = vld [vmem:[%s810_s1 + $0x8] sm:$0xff]  ;;  %v58_v28 = vld [vmem:[%s811_s4] sm:$0xff] }
   0xf   :  { %131 = vperm.xlu0 %536, %v55_v31  }
  0x10   :  { %453 = vmatpush1.bf16.msra.mxu0 %v560_v16  ;;  %485 = vmatpush1.bf16.msra.mxu1 %v561_v17 }
  0x11   :  { %455 = vmatprep.subr.bf16.mxu0 %v562_v18  ;;  %487 = vmatprep.subr.bf16.mxu1 %v564_v19 }
  0x14   :  { %457 = vmatpush1.bf16.msra.mxu0 %v566_v20  ;;  %489 = vmatpush1.bf16.msra.mxu1 %v567_v21 }
  0x15   :  { %459 = vmatprep.subr.bf16.mxu0 %v568_v22  ;;  %491 = vmatprep.subr.bf16.mxu1 %v570_v23 }
  0x18   :  { %461 = vmatpush1.bf16.msra.mxu0 %v572_v24  ;;  %493 = vmatpush1.bf16.msra.mxu1 %v573_v25 }
  0x19   :  { %463 = vmatprep.subr.bf16.mxu0 %v574_v26  ;;  %495 = vmatprep.subr.bf16.mxu1 %v576_v27 }
  0x1c   :  { %465 = vmatpush1.bf16.msra.mxu0 %v578_v29  ;;  %497 = vmatpush1.bf16.msra.mxu1 %v579_v30 }
  0x1d   :  { %467 = vmatprep.subr.bf16.mxu0 %v580_v32  ;;  %499 = vmatprep.subr.bf16.mxu1 %v582_v33 }
  0x20   :  { %469 = vmatpush1.bf16.msra.mxu0 %v584_v34  ;;  %501 = vmatpush1.bf16.msra.mxu1 %v585_v35 }
  0x23   :  { %199 = vmatmul.mubr.f32.vlgmr.msra.gmra.mrb[0].mxu0 %v52_v36  ;;  %276 = vmatmul.mubr.f32.vlgmr.msra.gmra.mrb[0].mxu1 %v52_v36 }
  0x24   :  { %204 = vmatprep.mubr.f32.mxu0 %v590_v1  ;;  %281 = vmatprep.mubr.f32.mxu1 %v590_v1 }
  0x27   :  { %205 = vmatmul.mubr.f32.gmra.mrb[2].mxu0 %v53_v37  ;;  %282 = vmatmul.mubr.f32.gmra.mrb[2].mxu1 %v53_v37 }
  0x8a   :  { %v127_v38 = vpop.permute.xlu0 %126 }
  0x8e   :  { %v132_v49 = vpop.permute.xlu0 %131 }
  0xf6   :  { %v200_v39 = vpop.f32.mrb[0].mxu0  ;;  %v277_v40 = vpop.f32.mrb[0].mxu1 }
  0xf7   :  { %v201_v41 = vadd.f32 %v200_v39, %v127_v38  ;;  %v278_v42 = vadd.f32 %v277_v40, %v127_v38  ;;  %v202_v43 = vpop.f32.mrb[1].mxu0  ;;  %v279_v44 = vpop.f32.mrb[1].mxu1 }
  0xf8   :  { %v203_v45 = vadd.f32 %v202_v43, %v127_v38  ;;  %v280_v46 = vadd.f32 %v279_v44, %v127_v38  ;;  %v56_v43 = vld [vmem:[%s812_s3] sm:$0xff] }
  0xf9   :  { %vm288_vm0 = vcmp.ge.f32.partialorder %v201_v41, 0.0  ;;  %v296_v47 = vmul.f32 0.2, %v201_v41  ;;  %vm290_vm1 = vcmp.ge.f32.partialorder %v278_v42, 0.0  ;;  %v298_v48 = vmul.f32 0.2, %v278_v42 }
  0xfa   :  { %vm289_vm2 = vcmp.ge.f32.partialorder %v203_v45, 0.0  ;;  %v297_v50 = vmul.f32 0.2, %v203_v45  ;;  %v206_v51 = vpop.f32.mrb[2].mxu0  ;;  %v299_v53 = vmul.f32 0.2, %v280_v46 }
  0xfb   :  { %v734_v52 = vsel %vm288_vm0, %v201_v41, %v296_v47  ;;  %v207_v54 = vadd.f32 %v206_v51, %v132_v49  ;;  %v283_v55 = vpop.f32.mrb[2].mxu1  ;;  %v208_v56 = vpop.f32.mrb[3].mxu0  ;;  %vm291_vm3 = vcmp.ge.f32.partialorder %v280_v46, 0.0  ;;  %v743_v2 = vsel %vm290_vm1, %v278_v42, %v298_v48 }
  0xfc   :  { %v324_v57 = vmul.f32 %v734_v52, %v734_v52  ;;  %v738_v58 = vsel %vm289_vm2, %v203_v45, %v297_v50  ;;  %v284_v59 = vadd.f32 %v283_v55, %v132_v49  ;;  %v209_v60 = vadd.f32 %v208_v56, %v132_v49  ;;  %v285_v61 = vpop.f32.mrb[3].mxu1 }
  0xfd   :  { %v325_v62 = vmul.f32 %v738_v58, %v738_v58  ;;  %vm292_vm4 = vcmp.ge.f32.partialorder %v207_v54, 0.0  ;;  %v300_v63 = vmul.f32 0.2, %v207_v54  ;;  %v286_v0 = vadd.f32 %v285_v61, %v132_v49  ;;  %v59_v49 = vld [vmem:[%s811_s4 + $0x8] sm:$0xff] }
  0xfe   :  { %vm293_vm5 = vcmp.ge.f32.partialorder %v209_v60, 0.0  ;;  %v301_v1 = vmul.f32 0.2, %v209_v60  ;;  %vm294_vm6 = vcmp.ge.f32.partialorder %v284_v59, 0.0  ;;  %v302_v4 = vmul.f32 0.2, %v284_v59 }
  0xff   :  { %v745_v3 = vsel %vm292_vm4, %v207_v54, %v300_v63  ;;  %v752_v7 = vsel %vm291_vm3, %v280_v46, %v299_v53  ;;  %v312_v8 = vadd.f32 %v738_v58, %v734_v52  ;;  %v303_v10 = vmul.f32 0.2, %v286_v0  ;;  %v57_v46 = vld [vmem:[%s812_s3 + $0x8] sm:$0xff] }
 0x100   :  { %v328_v5 = vmul.f32 %v745_v3, %v745_v3  ;;  %v749_v6 = vsel %vm293_vm5, %v209_v60, %v301_v1  ;;  %v326_v11 = vmul.f32 %v743_v2, %v743_v2  ;;  %v332_v12 = vadd.f32 %v325_v62, %v324_v57 }
 0x101   :  { %v329_v9 = vmul.f32 %v749_v6, %v749_v6  ;;  %vm295_vm7 = vcmp.ge.f32.partialorder %v286_v0, 0.0  ;;  %v313_v13 = vadd.f32 %v312_v8, %v743_v2  ;;  %v317_v14 = vadd.f32 %v749_v6, %v745_v3 }
 0x102   :  { %v763_v15 = vsel %vm294_vm6, %v284_v59, %v302_v4  ;;  %v327_v16 = vmul.f32 %v752_v7, %v752_v7  ;;  %v333_v17 = vadd.f32 %v332_v12, %v326_v11  ;;  %v769_v22 = vsel %vm295_vm7, %v286_v0, %v303_v10 }
 0x103   :  { %v314_v18 = vadd.f32 %v313_v13, %v752_v7  ;;  %v318_v19 = vadd.f32 %v317_v14, %v763_v15  ;;  %v337_v20 = vadd.f32 %v329_v9, %v328_v5  ;;  %v330_v24 = vmul.f32 %v763_v15, %v763_v15 }
 0x104   :  { %v334_v21 = vadd.f32 %v333_v17, %v327_v16  ;;  %v331_v26 = vmul.f32 %v769_v22, %v769_v22 }
 0x105   :  { %315 = vadd.xlane.f32.xlu1 %v314_v18  ;;  %v319_v23 = vadd.f32 %v318_v19, %v769_v22  ;;  %v338_v25 = vadd.f32 %v337_v20, %v330_v24 }
 0x106   :  { %335 = vadd.xlane.f32.xlu0 %v334_v21 }
 0x107   :  { %v339_v27 = vadd.f32 %v338_v25, %v331_v26 }
 0x109   :  { %320 = vadd.xlane.f32.xlu1 %v319_v23 }
 0x10d   :  { %340 = vadd.xlane.f32.xlu1 %v339_v27 }
 0x11e   :  { %382 = vperm.xlu1 %537, %v58_v28  }
 0x192   :  { %v316_v29 = vpop.xlane.xlu1 %315 }
 0x193   :  { %v322_v30 = vmul.f32 0.001953125, %v316_v29  ;;  %v336_v31 = vpop.xlane.xlu0 %335 }
 0x194   :  { %v342_v32 = vmul.f32 0.001953125, %v336_v31 }
 0x195   :  { %v344_v33 = vmul.f32 %v322_v30, %v322_v30  ;;  %v352_v51 = vsub.f32 %v734_v52, %v322_v30  ;;  %v353_v53 = vsub.f32 %v738_v58, %v322_v30  ;;  %v354_v54 = vsub.f32 %v743_v2, %v322_v30 }
 0x196   :  { %v321_v34 = vpop.xlane.xlu1 %320  ;;  %v355_v55 = vsub.f32 %v752_v7, %v322_v30 }
 0x197   :  { %v346_v35 = vsub.f32 %v342_v32, %v344_v33  ;;  %v323_v36 = vmul.f32 0.001953125, %v321_v34 }
 0x199   :  { %v348_v37 = vadd.f32 1e-05, %v346_v35  ;;  %v345_v39 = vmul.f32 %v323_v36, %v323_v36  ;;  %v356_v52 = vsub.f32 %v745_v3, %v323_v36  ;;  %v357_v58 = vsub.f32 %v749_v6, %v323_v36 }
 0x19a   :  { %v341_v38 = vpop.xlane.xlu1 %340  ;;  %v358_v2 = vsub.f32 %v763_v15, %v323_v36  ;;  %v359_v7 = vsub.f32 %v769_v22, %v323_v36 }
 0x19b   :  { %586 = vrsqrt.f32 %v348_v37  ;;  %v343_v40 = vmul.f32 0.001953125, %v341_v38 }
 0x19d   :  { %v347_v41 = vsub.f32 %v343_v40, %v345_v39 }
 0x19e   :  { %v383_v50 = vpop.permute.xlu1 %382 }
 0x19f   :  { %v349_v42 = vadd.f32 1e-05, %v347_v41 }
 0x1a1   :  { %588 = vrsqrt.f32 %v349_v42 }
 0x1a5   :  { %v587_v44 = vpop.eup %586 }
 0x1a6   :  { %v360_v45 = vmul.f32 %v587_v44, %v56_v43 }
 0x1a8   :  { %364 = vperm.xlu1 %537, %v360_v45  }
 0x1ab   :  { %v589_v47 = vpop.eup %588 }
 0x1ac   :  { %v361_v48 = vmul.f32 %v589_v47, %v57_v46 }
 0x1ae   :  { %369 = vperm.xlu1 %537, %v361_v48  }
 0x1b2   :  { %387 = vperm.xlu1 %537, %v59_v49  }
 0x227   :  { %v365_v56 = vpop.permute.xlu1 %364 }
 0x228   :  { %v372_v57 = vmul.f32 %v365_v56, %v352_v51  ;;  %v373_v59 = vmul.f32 %v365_v56, %v353_v53  ;;  %v374_v60 = vmul.f32 %v365_v56, %v354_v54  ;;  %v375_v61 = vmul.f32 %v365_v56, %v355_v55 }
 0x22a   :  { %v390_v62 = vadd.f32 %v383_v50, %v372_v57  ;;  %v391_v63 = vadd.f32 %v383_v50, %v373_v59  ;;  %v392_v0 = vadd.f32 %v383_v50, %v374_v60  ;;  %v393_v1 = vadd.f32 %v383_v50, %v375_v61 }
 0x22c   :  { %v434_v4 = vpack.c.bf16 %v391_v63, %v390_v62  ;;  %v435_v5 = vpack.c.bf16 %v393_v1, %v392_v0 }
 0x22d   :  { %v370_v8 = vpop.permute.xlu1 %369 }
 0x22e   :  { %422 = vst [vmem:[%s813_s5] sm:$0xff] %v434_v4  ;;  %423 = vst [vmem:[%s813_s5 + $0x8] sm:$0xff] %v435_v5  ;;  %v376_v9 = vmul.f32 %v370_v8, %v356_v52  ;;  %v377_v10 = vmul.f32 %v370_v8, %v357_v58  ;;  %v378_v11 = vmul.f32 %v370_v8, %v358_v2 }
 0x22f   :  { %v379_v12 = vmul.f32 %v370_v8, %v359_v7 }
 0x231   :  { %v388_v13 = vpop.permute.xlu1 %387 }
 0x232   :  { %v394_v3 = vadd.f32 %v388_v13, %v376_v9  ;;  %v395_v14 = vadd.f32 %v388_v13, %v377_v10  ;;  %v396_v6 = vadd.f32 %v388_v13, %v378_v11  ;;  %v397_v16 = vadd.f32 %v388_v13, %v379_v12 }
 0x234   :  { %v436_v15 = vpack.c.bf16 %v395_v14, %v394_v3  ;;  %v437_v17 = vpack.c.bf16 %v397_v16, %v396_v6 }
 0x236   :  { %424 = vst [vmem:[%s813_s5 + $0x10] sm:$0xff] %v436_v15  ;;  %425 = vst [vmem:[%s813_s5 + $0x18] sm:$0xff] %v437_v17 }

// kernel: discriminator_forward.6
= control target key start
LH: loop header
LB: loop body
LE: loop exit
PB: predicated region body
PF: predicated region fallthrough
CT: control target
= control target key end

     0   :  { %v1988_v3 = vmov 0   ;;  %vm1990_vm4 = vmmov 0   ;;  %vm351_vm5 = vcmask 261120   ;;  %s1992_s24 = smov 64   ;;  %vm687_vm6 = vcmask 1043456   ;;  %s2566_s0 = inlined_call_operand.vmem [shape: bf16[256,128], index: 0, kind: input, shape index: {}]   ;;  %s2567_s1 = inlined_call_operand.vmem [shape: f32[32,256], index: 1, kind: input, shape index: {}]   ;;  %s2568_s2 = inlined_call_operand.vmem [shape: f32[32,1], index: 2, kind: input, shape index: {}]   ;;  %s2569_s4 = inlined_call_operand.vmem [shape: f32[32,1], index: 4, kind: input, shape index: {}, may-alias: {4,10}]   ;;  %s2570_s3 = inlined_call_operand.vmem [shape: f32[32,1], index: 3, kind: input, shape index: {}]   ;;  %s2571_s6 = inlined_call_operand.vmem [shape: f32[4,1], index: 6, kind: input, shape index: {}, may-alias: {6,8}]   ;;  %s2572_s8 = inlined_call_operand.vmem [shape: f32[4,1], index: 8, kind: input, shape index: {}, may-alias: {6,8}]   ;;  %s2573_s5 = inlined_call_operand.vmem [shape: f32[4,32], index: 5, kind: input, shape index: {}]   ;;  %s2574_s7 = inlined_call_operand.vmem [shape: f32[4,32], index: 7, kind: input, shape index: {}]   ;;  %s2575_s9 = inlined_call_operand.vmem [shape: f32[32,32], index: 9, kind: input, shape index: {}]   ;;  %s2576_s10 = inlined_call_operand.vmem [shape: f32[32,1], index: 10, kind: input, shape index: {}, may-alias: {4,10}]   ;;  %s2577_s11 = inlined_call_operand.<no memory space> [shape: f32[1,1], index: 11, kind: input, shape index: {}]   ;;  %s2578_s12 = inlined_call_operand.vmem [shape: bf16[32,128], index: 12, kind: output, shape index: {}]  }
   0x1   :  { %v1588_v0 = vld [vmem:[%s2566_s0 + $0x40] sm:$0xff]   ;;  %v1589_v2 = vld [vmem:[%s2566_s0 + $0x48] sm:$0xff]   ;;  %1914 = vset.pattern.permute.xlu0 %v1988_v3  ;;  %1915 = vset.pattern.permute.xlu1 %v1988_v3  ;;  %v1590_v5 = vld [vmem:[%s2566_s0 + $0x50] sm:$0xff]   ;;  %vm662_vm7 = vcmask 31744   ;;  %vm796_vm8 = vcmask 523264  }
   0x2   :  { %v1508_v1 = vld [vmem:[%s2566_s0] sm:$0xff]   ;;  %1810 = vmatprep.subr.bf16.mxu0 %v1588_v0  ;;  %v1581_v4 = vld [vmem:[%s2566_s0 + $0x8] sm:$0xff]   ;;  %v1582_v7 = vld [vmem:[%s2566_s0 + $0x10] sm:$0xff]  }
   0x3   :  { %1812 = vmatpush3.bf16.msra.mxu0 %v1508_v1  ;;  %v76_v6 = vld [vmem:[%s2567_s1 + $0x8] sm:$0xff]  ;;  %v1591_v8 = vld [vmem:[%s2566_s0 + $0x58] sm:$0xff]   ;;  %v83_v9 = vld [vmem:[%s2568_s2] sm:$0xff] }
   0x4   :  { %1814 = vmatprep.subr.bf16.mxu0 %v1589_v2  ;;  %211 = vmatprep.mubr.f32.mxu0 %v76_v6  ;;  %v85_v10 = vld [vmem:[%s2568_s2 + $0x10] sm:$0xff]  ;;  %v84_v11 = vld [vmem:[%s2568_s2 + $0x8] sm:$0xff]  ;;  %v86_v12 = vld [vmem:[%s2568_s2 + $0x18] sm:$0xff] }
   0x5   :  { %129 = vperm.xlu0 %1914, %v83_v9   ;;  %139 = vperm.xlu1 %1915, %v85_v10   ;;  %v1583_v13 = vld [vmem:[%s2566_s0 + $0x18] sm:$0xff]   ;;  %v1592_v14 = vld [vmem:[%s2566_s0 + $0x60] sm:$0xff]   ;;  %v1593_v16 = vld [vmem:[%s2566_s0 + $0x68] sm:$0xff]  }
   0x6   :  { %v1584_v15 = vld [vmem:[%s2566_s0 + $0x20] sm:$0xff]   ;;  %v1585_v17 = vld [vmem:[%s2566_s0 + $0x28] sm:$0xff]   ;;  %v1594_v18 = vld [vmem:[%s2566_s0 + $0x70] sm:$0xff]  }
   0x7   :  { %1816 = vmatpush3.bf16.msra.mxu0 %v1581_v4  ;;  %v1586_v19 = vld [vmem:[%s2566_s0 + $0x30] sm:$0xff]   ;;  %v1595_v20 = vld [vmem:[%s2566_s0 + $0x78] sm:$0xff]   ;;  %v75_v22 = vld [vmem:[%s2567_s1] sm:$0xff] }
   0x8   :  { %1818 = vmatprep.subr.bf16.mxu0 %v1590_v5  ;;  %v1587_v21 = vld [vmem:[%s2566_s0 + $0x38] sm:$0xff]   ;;  %v77_v24 = vld [vmem:[%s2567_s1 + $0x10] sm:$0xff]  ;;  %v80_v25 = vld [vmem:[%s2567_s1 + $0x28] sm:$0xff] }
   0x9   :  { %134 = vperm.xlu0 %1914, %v84_v11   ;;  %144 = vperm.xlu1 %1915, %v86_v12   ;;  %v78_v23 = vld [vmem:[%s2567_s1 + $0x18] sm:$0xff]  ;;  %v79_v26 = vld [vmem:[%s2567_s1 + $0x20] sm:$0xff]  ;;  %v81_v28 = vld [vmem:[%s2567_s1 + $0x30] sm:$0xff] }
   0xa   :  { %v82_v27 = vld [vmem:[%s2567_s1 + $0x38] sm:$0xff]  ;;  %v91_v61 = vld [vmem:[%s2569_s4] sm:$0xff]  ;;  %v92_v62 = vld [vmem:[%s2569_s4 + $0x8] sm:$0xff] }
   0xb   :  { %1820 = vmatpush3.bf16.msra.mxu0 %v1582_v7  ;;  %vm2489_vm9 = vmpackc.low %vm796_vm8, %vm796_vm8 }
   0xc   :  { %1822 = vmatprep.subr.bf16.mxu0 %v1591_v8 }
   0xf   :  { %1824 = vmatpush3.bf16.msra.mxu0 %v1583_v13 }
  0x10   :  { %1826 = vmatprep.subr.bf16.mxu0 %v1592_v14 }
  0x13   :  { %1828 = vmatpush3.bf16.msra.mxu0 %v1584_v15 }
  0x14   :  { %1830 = vmatprep.subr.bf16.mxu0 %v1593_v16 }
  0x17   :  { %1832 = vmatpush3.bf16.msra.mxu0 %v1585_v17 }
  0x18   :  { %1834 = vmatprep.subr.bf16.mxu0 %v1594_v18 }
  0x1b   :  { %1836 = vmatpush3.bf16.msra.mxu0 %v1586_v19 }
  0x1c   :  { %1838 = vmatprep.subr.bf16.mxu0 %v1595_v20 }
  0x1f   :  { %1840 = vmatpush3.bf16.msra.mxu0 %v1587_v21 }
  0x22   :  { %212 = vmatmul.mubr.f32.vlgmr.msra.gmra.mrb[0].mxu0 %v75_v22 }
  0x23   :  { %216 = vmatprep.mubr.f32.mxu0 %v78_v23 }
  0x26   :  { %217 = vmatmul.mubr.f32.gmra.mrb[2].mxu0 %v77_v24 }
  0x27   :  { %221 = vmatprep.mubr.f32.mxu0 %v80_v25 }
  0x2a   :  { %222 = vmatmul.mubr.f32.gmra.mrb[4].mxu0 %v79_v26  ;;  %v87_v26 = vld [vmem:[%s2570_s3] sm:$0xff] }
  0x2b   :  { %226 = vmatprep.mubr.f32.mxu0 %v82_v27 }
  0x2e   :  { %227 = vmatmul.mubr.f32.gmra.mrb[6].mxu0 %v81_v28 }
  0x84   :  { %v130_v30 = vpop.permute.xlu0 %129  ;;  %v140_v42 = vpop.permute.xlu1 %139 }
  0x88   :  { %v135_v38 = vpop.permute.xlu0 %134  ;;  %v145_v53 = vpop.permute.xlu1 %144 }
  0xf5   :  { %v1629_v29 = vpop.f32.mrb[0].mxu0 }
  0xf6   :  { %v1630_v31 = vpop.f32.mrb[1].mxu0 }
  0xf7   :  { %v1631_v32 = vadd.f32 %v1630_v31, %v1629_v29 }
  0xf9   :  { %v214_v33 = vadd.f32 %v1631_v32, %v130_v30  ;;  %v1632_v34 = vpop.f32.mrb[2].mxu0  ;;  %v88_v30 = vld [vmem:[%s2570_s3 + $0x8] sm:$0xff] }
  0xfa   :  { %v1633_v35 = vpop.f32.mrb[3].mxu0 }
  0xfb   :  { %v1634_v36 = vadd.f32 %v1633_v35, %v1632_v34  ;;  %vm232_vm0 = vcmp.ge.f32.partialorder %v214_v33, 0.0  ;;  %v236_v37 = vmul.f32 0.2, %v214_v33 }
  0xfd   :  { %v219_v39 = vadd.f32 %v1634_v36, %v135_v38  ;;  %v1635_v40 = vpop.f32.mrb[4].mxu0  ;;  %v2142_v41 = vsel %vm232_vm0, %v214_v33, %v236_v37  ;;  %v89_v33 = vld [vmem:[%s2570_s3 + $0x10] sm:$0xff]  ;;  %v90_v36 = vld [vmem:[%s2570_s3 + $0x18] sm:$0xff] }
  0xfe   :  { %v1636_v43 = vpop.f32.mrb[5].mxu0  ;;  %244 = vadd.xlane.f32.xlu0 %v2142_v41  ;;  %v256_v46 = vmul.f32 %v2142_v41, %v2142_v41  ;;  %v93_v38 = vld [vmem:[%s2569_s4 + $0x10] sm:$0xff] }
  0xff   :  { %v1637_v44 = vadd.f32 %v1636_v43, %v1635_v40  ;;  %vm233_vm1 = vcmp.ge.f32.partialorder %v219_v39, 0.0  ;;  %v237_v45 = vmul.f32 0.2, %v219_v39  ;;  %v94_v43 = vld [vmem:[%s2569_s4 + $0x18] sm:$0xff] }
 0x101   :  { %v224_v47 = vadd.f32 %v1637_v44, %v140_v42  ;;  %v1638_v48 = vpop.f32.mrb[6].mxu0  ;;  %v2147_v49 = vsel %vm233_vm1, %v219_v39, %v237_v45  ;;  %v1989_v39 = vmov 0.0|0.0   ;;  %v345_v42 = vld [vmem:[%s2571_s6] sm:$0xf]  ;;  %v1991_v45 = vmov 0.0  }
 0x102   :  { %v1639_v50 = vpop.f32.mrb[7].mxu0  ;;  %246 = vadd.xlane.f32.xlu1 %v2147_v49  ;;  %260 = vadd.xlane.f32.xlu0 %v256_v46  ;;  %v257_v54 = vmul.f32 %v2147_v49, %v2147_v49  ;;  %v426_v44 = vld [vmem:[%s2572_s8] sm:$0xf] }
 0x103   :  { %v1640_v51 = vadd.f32 %v1639_v50, %v1638_v48  ;;  %vm234_vm2 = vcmp.ge.f32.partialorder %v224_v47, 0.0  ;;  %v238_v52 = vmul.f32 0.2, %v224_v47  ;;  %1841 = vmatprep.subr.bf16.mxu1 %v1989_v39  ;;  %1709 = vmatprep.mubr.msk.f32.mxu1 %vm1990_vm4, %v1991_v45 }
 0x105   :  { %v229_v55 = vadd.f32 %v1640_v51, %v145_v53  ;;  %v2152_v56 = vsel %vm234_vm2, %v224_v47, %v238_v52 }
 0x106   :  { %248 = vadd.xlane.f32.xlu1 %v2152_v56  ;;  %262 = vadd.xlane.f32.xlu0 %v257_v54  ;;  %v258_v58 = vmul.f32 %v2152_v56, %v2152_v56 }
 0x107   :  { %vm235_vm3 = vcmp.ge.f32.partialorder %v229_v55, 0.0  ;;  %v239_v57 = vmul.f32 0.2, %v229_v55 }
 0x109   :  { %v2157_v59 = vsel %vm235_vm3, %v229_v55, %v239_v57 }
 0x10a   :  { %264 = vadd.xlane.f32.xlu1 %v258_v58  ;;  %250 = vadd.xlane.f32.xlu0 %v2157_v59  ;;  %v259_v60 = vmul.f32 %v2157_v59, %v2157_v59 }
 0x10e   :  { %266 = vadd.xlane.f32.xlu0 %v259_v60 }
 0x11b   :  { %322 = vperm.xlu1 %1915, %v91_v61  }
 0x11f   :  { %327 = vperm.xlu1 %1915, %v92_v62  }
 0x18b   :  { %v245_v63 = vpop.xlane.xlu0 %244 }
 0x18c   :  { %v2168_v0 = vmul.f32 0.0078125, %v245_v63 }
 0x18e   :  { %v272_v3 = vmul.f32 %v2168_v0, %v2168_v0  ;;  %v288_v50 = vsub.f32 %v2142_v41, %v2168_v0 }
 0x18f   :  { %v247_v1 = vpop.xlane.xlu1 %246  ;;  %v261_v2 = vpop.xlane.xlu0 %260 }
 0x190   :  { %v2172_v4 = vmul.f32 0.0078125, %v247_v1  ;;  %v268_v5 = vmul.f32 0.0078125, %v261_v2 }
 0x192   :  { %v276_v6 = vsub.f32 %v268_v5, %v272_v3  ;;  %v273_v9 = vmul.f32 %v2172_v4, %v2172_v4  ;;  %v289_v52 = vsub.f32 %v2147_v49, %v2172_v4  ;;  %v344_v5 = vld [vmem:[%s2573_s5] sm:$0xf] }
 0x193   :  { %v249_v7 = vpop.xlane.xlu1 %248  ;;  %v263_v8 = vpop.xlane.xlu0 %262 }
 0x194   :  { %v280_v10 = vadd.f32 1e-05, %v276_v6  ;;  %v2176_v11 = vmul.f32 0.0078125, %v249_v7  ;;  %v269_v12 = vmul.f32 0.0078125, %v263_v8  ;;  %v506_v6 = vld [vmem:[%s2575_s9 + $0x8] sm:$0xff]  ;;  %v507_v7 = vld [vmem:[%s2575_s9 + $0x10] sm:$0xff] }
 0x195   :  { %v508_v8 = vld [vmem:[%s2575_s9 + $0x18] sm:$0xff] }
 0x196   :  { %1916 = vrsqrt.f32 %v280_v10  ;;  %v277_v13 = vsub.f32 %v269_v12, %v273_v9  ;;  %v274_v16 = vmul.f32 %v2176_v11, %v2176_v11  ;;  %v290_v41 = vsub.f32 %v2152_v56, %v2176_v11  ;;  %v425_v56 = vld [vmem:[%s2574_s7] sm:$0xf] }
 0x197   :  { %v265_v14 = vpop.xlane.xlu1 %264  ;;  %v251_v15 = vpop.xlane.xlu0 %250 }
 0x198   :  { %v281_v17 = vadd.f32 1e-05, %v277_v13  ;;  %v270_v18 = vmul.f32 0.0078125, %v265_v14  ;;  %v2180_v19 = vmul.f32 0.0078125, %v251_v15 }
 0x19a   :  { %1918 = vrsqrt.f32 %v281_v17  ;;  %v278_v20 = vsub.f32 %v270_v18, %v274_v16  ;;  %v275_v23 = vmul.f32 %v2180_v19, %v2180_v19  ;;  %v291_v62 = vsub.f32 %v2157_v59, %v2180_v19  ;;  %v505_v59 = vld [vmem:[%s2575_s9] sm:$0xff]  ;;  %v510_v18 = vld [vmem:[%s2576_s10 + $0x8] sm:$0xff] }
 0x19b   :  { %v267_v21 = vpop.xlane.xlu0 %266  ;;  %v323_v46 = vpop.permute.xlu1 %322 }
 0x19c   :  { %v282_v22 = vadd.f32 1e-05, %v278_v20  ;;  %v271_v24 = vmul.f32 0.0078125, %v267_v21 }
 0x19e   :  { %1920 = vrsqrt.f32 %v282_v22  ;;  %v279_v25 = vsub.f32 %v271_v24, %v275_v23 }
 0x19f   :  { %v328_v47 = vpop.permute.xlu1 %327 }
 0x1a0   :  { %v1917_v27 = vpop.eup %1916  ;;  %v283_v28 = vadd.f32 1e-05, %v279_v25 }
 0x1a1   :  { %v292_v29 = vmul.f32 %v1917_v27, %v87_v26  ;;  %v509_v26 = vld [vmem:[%s2576_s10] sm:$0xff] }
 0x1a2   :  { %1922 = vrsqrt.f32 %v283_v28 }
 0x1a3   :  { %298 = vperm.xlu1 %1915, %v292_v29   ;;  %v511_v29 = vld [vmem:[%s2576_s10 + $0x10] sm:$0xff] }
 0x1a4   :  { %v1919_v31 = vpop.eup %1918 }
 0x1a5   :  { %v293_v32 = vmul.f32 %v1919_v31, %v88_v30 }
 0x1a7   :  { %303 = vperm.xlu0 %1914, %v293_v32  }
 0x1a8   :  { %v1921_v34 = vpop.eup %1920 }
 0x1a9   :  { %v294_v35 = vmul.f32 %v1921_v34, %v89_v33 }
 0x1ab   :  { %308 = vperm.xlu0 %1914, %v294_v35  }
 0x1ac   :  { %v1923_v37 = vpop.eup %1922 }
 0x1ad   :  { %v295_v40 = vmul.f32 %v1923_v37, %v90_v36 }
 0x1af   :  { %332 = vperm.xlu0 %1914, %v93_v38   ;;  %313 = vperm.xlu1 %1915, %v295_v40  }
 0x1b3   :  { %348 = vperm.xlu0 %1914, %v345_v42   ;;  %337 = vperm.xlu1 %1915, %v94_v43  }
 0x1b7   :  { %429 = vperm.xlu1 %1915, %v426_v44  }
 0x222   :  { %v299_v48 = vpop.permute.xlu1 %298 }
 0x223   :  { %v316_v51 = vmul.f32 %v299_v48, %v288_v50 }
 0x225   :  { %v2213_v55 = vadd.f32 %v323_v46, %v316_v51 }
 0x226   :  { %v304_v53 = vpop.permute.xlu0 %303 }
 0x227   :  { %v317_v54 = vmul.f32 %v304_v53, %v289_v52 }
 0x229   :  { %v2215_v57 = vadd.f32 %v328_v47, %v317_v54 }
 0x22a   :  { %v309_v58 = vpop.permute.xlu0 %308 }
 0x22b   :  { %v1842_v60 = vpack.c.bf16 %v2215_v57, %v2213_v55  ;;  %v318_v63 = vmul.f32 %v309_v58, %v290_v41 }
 0x22d   :  { %1843 = vmatpush3.bf16.msra.mxu1 %v1842_v60 }
 0x22e   :  { %v314_v61 = vpop.permute.xlu1 %313  ;;  %1844 = vmatprep.subr.bf16.mxu1 %v1989_v39  ;;  %v333_v49 = vpop.permute.xlu0 %332 }
 0x22f   :  { %v319_v0 = vmul.f32 %v314_v61, %v291_v62  ;;  %v2223_v2 = vadd.f32 %v333_v49, %v318_v63 }
 0x232   :  { %v338_v1 = vpop.permute.xlu1 %337  ;;  %v349_v9 = vpop.permute.xlu0 %348 }
 0x233   :  { %v2225_v3 = vadd.f32 %v338_v1, %v319_v0 }
 0x235   :  { %v1845_v4 = vpack.c.bf16 %v2225_v3, %v2223_v2 }
 0x236   :  { %v430_v13 = vpop.permute.xlu1 %429 }
 0x237   :  { %1846 = vmatpush3.bf16.msra.mxu1 %v1845_v4 }
 0x238   :  { %1847 = vmatprep.subr.bf16.mxu1 %v1989_v39 }
 0x23a   :  { %1710 = vmatmul.mubr.msk.f32.vlgmr.msra.gmra.mrb[0].mxu1 %vm351_vm5, %v344_v5 }
 0x23b   :  { %1849 = vmatpush3.bf16.msra.mxu1 %v1842_v60  ;;  %1720 = vmatprep.mubr.msk.f32.mxu1 %vm1990_vm4, %v1991_v45 }
 0x23c   :  { %1850 = vmatprep.subr.bf16.mxu1 %v1989_v39 }
 0x23f   :  { %1852 = vmatpush3.bf16.msra.mxu1 %v1845_v4 }
 0x240   :  { %1854 = vmatprep.subr.bf16.mxu1 %v1842_v60 }
 0x242   :  { %1721 = vmatmul.mubr.msk.f32.vlgmr.msra.gmra.mrb[2].mxu1 %vm351_vm5, %v425_v56 }
 0x243   :  { %1856 = vmatpush3.bf16.msra.mxu1 %v1842_v60  ;;  %1731 = vmatprep.mubr.msk.f32.mxu1 %vm351_vm5, %v505_v59 }
 0x244   :  { %1858 = vmatprep.subr.bf16.mxu1 %v1845_v4 }
 0x247   :  { %1860 = vmatpush3.bf16.msra.mxu1 %v1845_v4 }
 0x24a   :  { %1732 = vmatmul.mubr.msk.f32.vlgmr.msra.gmra.mrb[4].mxu1 %vm351_vm5, %v506_v6 }
 0x24b   :  { %1734 = vmatprep.mubr.msk.f32.mxu1 %vm351_vm5, %v507_v7 }
 0x24e   :  { %1735 = vmatmul.mubr.msk.f32.gmra.mrb[6].mxu1 %vm351_vm5, %v508_v8 }
 0x30d   :  { %v421_v10 = vpop.f32.mrb[0].mxu1 }
 0x30e   :  { %v422_v11 = vadd.f32 %v421_v10, %v349_v9  ;;  %v1711_v12 = vpop.f32.mrb[1].mxu1 }
 0x310   :  { %1007 = vrot.lane.b32.xlu0 %v422_v11, %s1992_s24 }
 0x315   :  { %v501_v14 = vpop.f32.mrb[2].mxu1 }
 0x316   :  { %v502_v15 = vadd.f32 %v501_v14, %v430_v13  ;;  %v1722_v16 = vpop.f32.mrb[3].mxu1 }
 0x317   :  { %v512_v16 = vld [vmem:[%s2576_s10 + $0x18] sm:$0xff] }
 0x318   :  { %1042 = vrot.lane.b32.xlu1 %v502_v15, %s1992_s24  ;;  %1737 = vmatprep.subr.msk.mxu1 %vm687_vm6, %v502_v15 }
 0x319   :  { %1738 = vmatpush3.msk.msra.mxu1 %vm687_vm6, %v502_v15 }
 0x31d   :  { %v2258_v17 = vpop.f32.mrb[4].mxu1 }
 0x31e   :  { %v611_v21 = vpop.f32.mrb[5].mxu1 }
 0x321   :  { %v2272_v27 = vpop.f32.mrb[6].mxu1 }
 0x322   :  { %v2278_v30 = vpop.f32.mrb[7].mxu1 }
 0x32e   :  { %630 = vxpose.xlu0.b32.start.end [1/1] (short) (narrow) %v422_v11, 64 }
 0x373   :  { %520 = vperm.xlu0 %1914, %v510_v18  }
 0x382   :  { %v1008_v19 = vpop.permute.xlu0 %1007 }
 0x383   :  { %1010 = vxpose.xlu1.b32.start.end [1/1] (short) (narrow) %v1008_v19, 64 }
 0x38a   :  { %v1043_v20 = vpop.permute.xlu1 %1042 }
 0x38b   :  { %1773 = vmatprep.subr.msk.mxu1 %vm687_vm6, %v1043_v20 }
 0x3ae   :  { %v646_v22 = vpop.trf.xlu0 }
 0x3af   :  { %1739 = vmatprep.mubr.msk.f32.mxu1 %vm662_vm7, %v646_v22 }
 0x3b2   :  { %v647_v23 = vpop.trf.xlu0 }
 0x3b3   :  { %1740 = vmatmul.mubr.msk.f32.vlgmr.msra.gmra.mrb[8].mxu1 %vm662_vm7, %v647_v23 }
 0x3b4   :  { %1774 = vmatpush3.msk.msra.mxu1 %vm687_vm6, %v1043_v20 }
 0x3b6   :  { %v648_v24 = vpop.trf.xlu0 }
 0x3b7   :  { %1742 = vmatprep.mubr.msk.f32.mxu1 %vm662_vm7, %v648_v24 }
 0x3ba   :  { %v649_v25 = vpop.trf.xlu0 }
 0x3bb   :  { %1743 = vmatmul.mubr.msk.f32.gmra.mrb[10].mxu1 %vm662_vm7, %v649_v25 }
 0x3bd   :  { %515 = vperm.xlu1 %1915, %v509_v26  }
 0x3be   :  { %v650_v28 = vpop.trf.xlu0 }
 0x3bf   :  { %1745 = vmatprep.mubr.msk.f32.mxu1 %vm662_vm7, %v650_v28 }
 0x3c1   :  { %525 = vperm.xlu1 %1915, %v511_v29  }
 0x3c2   :  { %v651_v31 = vpop.trf.xlu0 }
 0x3c3   :  { %1746 = vmatmul.mubr.msk.f32.gmra.mrb[12].mxu1 %vm662_vm7, %v651_v31 }
 0x3c6   :  { %v652_v32 = vpop.trf.xlu0 }
 0x3c7   :  { %1748 = vmatprep.mubr.msk.f32.mxu1 %vm662_vm7, %v652_v32 }
 0x3ca   :  { %v653_v33 = vpop.trf.xlu0 }
 0x3cb   :  { %1749 = vmatmul.mubr.msk.f32.gmra.mrb[14].mxu1 %vm662_vm7, %v653_v33 }
 0x3f2   :  { %v2349_v19 = vpop.permute.xlu0 %520 }
 0x403   :  { %v1026_v34 = vpop.trf.xlu1 }
 0x404   :  { %1775 = vmatprep.mubr.msk.f32.mxu1 %vm662_vm7, %v1026_v34 }
 0x407   :  { %v1027_v35 = vpop.trf.xlu1 }
 0x408   :  { %1776 = vmatmul.mubr.msk.f32.vlgmr.msra.gmra.mrb[16].mxu1 %vm662_vm7, %v1027_v35 }
 0x40b   :  { %v1028_v36 = vpop.trf.xlu1 }
 0x40c   :  { %1778 = vmatprep.mubr.msk.f32.mxu1 %vm662_vm7, %v1028_v36 }
 0x40f   :  { %v1029_v37 = vpop.trf.xlu1 }
 0x410   :  { %1779 = vmatmul.mubr.msk.f32.gmra.mrb[18].mxu1 %vm662_vm7, %v1029_v37 }
 0x413   :  { %v1030_v38 = vpop.trf.xlu1 }
 0x414   :  { %1781 = vmatprep.mubr.msk.f32.mxu1 %vm662_vm7, %v1030_v38 }
 0x417   :  { %v1031_v39 = vpop.trf.xlu1 }
 0x418   :  { %1782 = vmatmul.mubr.msk.f32.gmra.mrb[20].mxu1 %vm662_vm7, %v1031_v39 }
 0x41b   :  { %v1032_v40 = vpop.trf.xlu1 }
 0x41c   :  { %1784 = vmatprep.mubr.msk.f32.mxu1 %vm662_vm7, %v1032_v40 }
 0x41f   :  { %v1033_v42 = vpop.trf.xlu1 }
 0x420   :  { %1785 = vmatmul.mubr.msk.f32.gmra.mrb[22].mxu1 %vm662_vm7, %v1033_v42 }
 0x43c   :  { %v516_v43 = vpop.permute.xlu1 %515 }
 0x43d   :  { %v2291_v44 = vadd.f32 %v611_v21, %v516_v43 }
 0x43f   :  { %1767 = vmatprep.mubr.msk.f32.mxu0 %vm796_vm8, %v2291_v44 }
 0x440   :  { %v2347_v18 = vpop.permute.xlu1 %525 }
 0x486   :  { %v2295_v45 = vpop.f32.mrb[8].mxu1 }
 0x487   :  { %v757_v46 = vpop.f32.mrb[9].mxu1  ;;  %v800_v47 = vsel %vm796_vm8, %v2295_v45, -inf }
 0x488   :  { %801 = vmax.xlane.f32.xlu0 %v800_v47  ;;  %v797_v48 = vsel %vm796_vm8, %v757_v46, -inf }
 0x489   :  { %798 = vmax.xlane.f32.xlu1 %v797_v48 }
 0x48e   :  { %v2300_v50 = vpop.f32.mrb[10].mxu1 }
 0x48f   :  { %v2302_v51 = vpop.f32.mrb[11].mxu1  ;;  %v806_v52 = vsel %vm796_vm8, %v2300_v50, -inf }
 0x490   :  { %807 = vmax.xlane.f32.xlu0 %v806_v52  ;;  %v803_v53 = vsel %vm796_vm8, %v2302_v51, -inf }
 0x491   :  { %804 = vmax.xlane.f32.xlu1 %v803_v53 }
 0x496   :  { %v2308_v54 = vpop.f32.mrb[12].mxu1 }
 0x497   :  { %v2310_v58 = vpop.f32.mrb[13].mxu1  ;;  %v812_v60 = vsel %vm796_vm8, %v2308_v54, -inf }
 0x498   :  { %813 = vmax.xlane.f32.xlu0 %v812_v60  ;;  %v809_v61 = vsel %vm796_vm8, %v2310_v58, -inf }
 0x499   :  { %810 = vmax.xlane.f32.xlu1 %v809_v61 }
 0x49e   :  { %v2316_v41 = vpop.f32.mrb[14].mxu1 }
 0x49f   :  { %v2318_v62 = vpop.f32.mrb[15].mxu1  ;;  %v818_v49 = vsel %vm796_vm8, %v2316_v41, -inf }
 0x4a0   :  { %819 = vmax.xlane.f32.xlu0 %v818_v49  ;;  %v815_v63 = vsel %vm796_vm8, %v2318_v62, -inf }
 0x4a1   :  { %816 = vmax.xlane.f32.xlu1 %v815_v63 }
 0x4db   :  { %v1777_v0 = vpop.f32.mrb[16].mxu1 }
 0x4dc   :  { %v1136_v1 = vpop.f32.mrb[17].mxu1  ;;  %v1178_v4 = vsel %vm796_vm8, %v1777_v0, -inf }
 0x4dd   :  { %1179 = vmax.xlane.f32.xlu1 %v1178_v4  ;;  %v1175_v5 = vsel %vm796_vm8, %v1136_v1, -inf }
 0x4de   :  { %1176 = vmax.xlane.f32.xlu0 %v1175_v5 }
 0x4e3   :  { %v1780_v56 = vpop.f32.mrb[18].mxu1 }
 0x4e4   :  { %v1146_v59 = vpop.f32.mrb[19].mxu1  ;;  %v1184_v6 = vsel %vm796_vm8, %v1780_v56, -inf }
 0x4e5   :  { %1185 = vmax.xlane.f32.xlu0 %v1184_v6  ;;  %v1181_v7 = vsel %vm796_vm8, %v1146_v59, -inf }
 0x4e9   :  { %1182 = vmax.xlane.f32.xlu0 %v1181_v7 }
 0x4eb   :  { %v2328_v8 = vpop.f32.mrb[20].mxu1 }
 0x4ec   :  { %v2330_v9 = vpop.f32.mrb[21].mxu1  ;;  %v1190_v10 = vsel %vm796_vm8, %v2328_v8, -inf }
 0x4ed   :  { %1191 = vmax.xlane.f32.xlu0 %v1190_v10  ;;  %v1187_v11 = vsel %vm796_vm8, %v2330_v9, -inf }
 0x4ee   :  { %1188 = vmax.xlane.f32.xlu1 %v1187_v11 }
 0x4f3   :  { %v2336_v12 = vpop.f32.mrb[22].mxu1 }
 0x4f4   :  { %v2338_v13 = vpop.f32.mrb[23].mxu1  ;;  %v1196_v14 = vsel %vm796_vm8, %v2336_v12, -inf }
 0x4f5   :  { %1197 = vmax.xlane.f32.xlu0 %v1196_v14  ;;  %v1193_v15 = vsel %vm796_vm8, %v2338_v13, -inf }
 0x4f6   :  { %1194 = vmax.xlane.f32.xlu1 %v1193_v15 }
 0x50b   :  { %530 = vperm.xlu0 %1914, %v512_v16  }
 0x515   :  { %v802_v22 = vpop.xlane.xlu0 %801 }
 0x516   :  { %v799_v20 = vpop.xlane.xlu1 %798  ;;  %v822_v40 = vsub.f32 %v2295_v45, %v802_v22 }
 0x517   :  { %v821_v21 = vsub.f32 %v757_v46, %v799_v20 }
 0x518   :  { %v831_v48 = vmul.f32 1.442695, %v822_v40 }
 0x519   :  { %v829_v23 = vmul.f32 1.442695, %v821_v21 }
 0x51b   :  { %1924 = vpow2.f32 %v829_v23 }
 0x51d   :  { %v2351_v24 = vpop.xlane.xlu0 %807 }
 0x51e   :  { %v824_v25 = vsub.f32 %v2300_v50, %v2351_v24  ;;  %v2355_v26 = vpop.xlane.xlu1 %804 }
 0x51f   :  { %v823_v28 = vsub.f32 %v2302_v51, %v2355_v26 }
 0x525   :  { %v2359_v29 = vpop.eup %1924  ;;  %v2361_v31 = vpop.xlane.xlu0 %813 }
 0x526   :  { %v826_v32 = vsub.f32 %v2308_v54, %v2361_v31  ;;  %v2365_v33 = vpop.xlane.xlu1 %810  ;;  %v845_v34 = vsel %vm796_vm8, %v2359_v29, 0.0 }
 0x527   :  { %v825_v35 = vsub.f32 %v2310_v58, %v2365_v33  ;;  %846 = vadd.xlane.f32.xlu1 %v845_v34 }
 0x52d   :  { %v2371_v36 = vpop.xlane.xlu0 %819 }
 0x52e   :  { %v828_v37 = vsub.f32 %v2316_v41, %v2371_v36  ;;  %v2375_v38 = vpop.xlane.xlu1 %816 }
 0x52f   :  { %v827_v39 = vsub.f32 %v2318_v62, %v2375_v38 }
 0x530   :  { %v843_v51 = vmul.f32 1.442695, %v828_v37  ;;  %v835_v37 = vmul.f32 1.442695, %v824_v25 }
 0x538   :  { %1263 = vrot.lane.b32.xlu1 %v2291_v44, %s1992_s24 }
 0x56a   :  { %v1180_v42 = vpop.xlane.xlu1 %1179 }
 0x56b   :  { %v1200_v43 = vsub.f32 %v1777_v0, %v1180_v42  ;;  %v1177_v46 = vpop.xlane.xlu0 %1176 }
 0x56c   :  { %v1199_v47 = vsub.f32 %v1136_v1, %v1177_v46 }
 0x56d   :  { %v1209_v52 = vmul.f32 1.442695, %v1200_v43 }
 0x56e   :  { %v1207_v53 = vmul.f32 1.442695, %v1199_v47 }
 0x56f   :  { %1926 = vpow2.f32 %v1209_v52  ;;  %v2428_v52 = vadd.f32 %v2258_v17, %v2349_v19  ;;  %v837_v17 = vmul.f32 1.442695, %v825_v35 }
 0x570   :  { %1928 = vpow2.f32 %v1207_v53 }
 0x571   :  { %1930 = vpow2.f32 %v831_v48  ;;  %v2422_v48 = vadd.f32 %v2278_v30, %v2347_v18  ;;  %v833_v30 = vmul.f32 1.442695, %v823_v28 }
 0x572   :  { %v1186_v60 = vpop.xlane.xlu0 %1185 }
 0x573   :  { %v1202_v61 = vsub.f32 %v1780_v56, %v1186_v60 }
 0x575   :  { %v1213_v49 = vmul.f32 1.442695, %v1202_v61 }
 0x576   :  { %v1183_v63 = vpop.xlane.xlu0 %1182 }
 0x577   :  { %1932 = vpow2.f32 %v1213_v49  ;;  %v1201_v4 = vsub.f32 %v1146_v59, %v1183_v63 }
 0x579   :  { %v2382_v5 = vpop.eup %1926  ;;  %v1211_v44 = vmul.f32 1.442695, %v1201_v4  ;;  %v841_v4 = vmul.f32 1.442695, %v827_v39 }
 0x57a   :  { %v2384_v45 = vpop.eup %1928  ;;  %v1192_v0 = vpop.xlane.xlu0 %1191  ;;  %v1226_v1 = vsel %vm796_vm8, %v2382_v5, 0.0 }
 0x57b   :  { %v2388_v6 = vpop.eup %1930  ;;  %1934 = vpow2.f32 %v1211_v44  ;;  %v1204_v7 = vsub.f32 %v2328_v8, %v1192_v0  ;;  %1227 = vadd.xlane.f32.xlu0 %v1226_v1  ;;  %v1189_v56 = vpop.xlane.xlu1 %1188  ;;  %v1223_v10 = vsel %vm796_vm8, %v2384_v45, 0.0 }
 0x57c   :  { %v1203_v59 = vsub.f32 %v2330_v9, %v1189_v56  ;;  %1224 = vadd.xlane.f32.xlu1 %v1223_v10  ;;  %v848_v15 = vsel %vm796_vm8, %v2388_v6, 0.0  ;;  %v17_v9 = vstv %s2577_s11 }
 0x57d   :  { %v1217_v11 = vmul.f32 1.442695, %v1204_v7  ;;  %18 = vst [vmem:[#allocation2] sm:$0x1] %v17_v9 }
 0x57e   :  { %v1215_v14 = vmul.f32 1.442695, %v1203_v59 }
 0x57f   :  { %1936 = vpow2.f32 %v1217_v11  ;;  %849 = vadd.xlane.f32.xlu0 %v848_v15 }
 0x580   :  { %1938 = vpow2.f32 %v1215_v14 }
 0x581   :  { %v2396_v16 = vpop.eup %1932 }
 0x582   :  { %v1198_v20 = vpop.xlane.xlu0 %1197  ;;  %v1232_v8 = vsel %vm796_vm8, %v2396_v16, 0.0 }
 0x583   :  { %v1206_v21 = vsub.f32 %v2336_v12, %v1198_v20  ;;  %1233 = vadd.xlane.f32.xlu0 %v1232_v8  ;;  %v1195_v53 = vpop.xlane.xlu1 %1194 }
 0x584   :  { %v1205_v60 = vsub.f32 %v2338_v13, %v1195_v53  ;;  %v839_v13 = vmul.f32 1.442695, %v826_v32  ;;  %v1498_v24 = vld [vmem:[#allocation2] ss:$0 sm:$0xff] }
 0x585   :  { %v2404_v22 = vpop.eup %1934  ;;  %v1221_v23 = vmul.f32 1.442695, %v1206_v21 }
 0x586   :  { %v1229_v34 = vsel %vm796_vm8, %v2404_v22, 0.0  ;;  %v1219_v61 = vmul.f32 1.442695, %v1205_v60 }
 0x587   :  { %1940 = vpow2.f32 %v1221_v23  ;;  %1230 = vadd.xlane.f32.xlu1 %v1229_v34 }
 0x588   :  { %1942 = vpow2.f32 %v1219_v61 }
 0x589   :  { %v2408_v40 = vpop.eup %1936  ;;  %1944 = vpow2.f32 %v833_v30 }
 0x58a   :  { %v2410_v42 = vpop.eup %1938  ;;  %v1238_v12 = vsel %vm796_vm8, %v2408_v40, 0.0  ;;  %1946 = vpow2.f32 %v837_v17  ;;  %v531_v32 = vpop.permute.xlu0 %530 }
 0x58b   :  { %1239 = vadd.xlane.f32.xlu0 %v1238_v12  ;;  %v1235_v43 = vsel %vm796_vm8, %v2410_v42, 0.0  ;;  %1948 = vpow2.f32 %v839_v13  ;;  %v2465_v35 = vadd.f32 %v2272_v27, %v531_v32 }
 0x58c   :  { %1236 = vadd.xlane.f32.xlu1 %v1235_v43  ;;  %1950 = vpow2.f32 %v843_v51 }
 0x58d   :  { %1952 = vpow2.f32 %v835_v37 }
 0x58e   :  { %1954 = vpow2.f32 %v841_v4 }
 0x591   :  { %v2416_v46 = vpop.eup %1940 }
 0x592   :  { %v1244_v47 = vsel %vm796_vm8, %v2416_v46, 0.0  ;;  %v2440_v19 = vpop.eup %1942 }
 0x593   :  { %1245 = vadd.xlane.f32.xlu0 %v1244_v47  ;;  %v1241_v63 = vsel %vm796_vm8, %v2440_v19, 0.0  ;;  %v2450_v26 = vpop.eup %1944 }
 0x594   :  { %v851_v58 = vsel %vm796_vm8, %v2450_v26, 0.0  ;;  %v2454_v28 = vpop.eup %1946 }
 0x595   :  { %v857_v54 = vsel %vm796_vm8, %v2454_v28, 0.0  ;;  %v2458_v31 = vpop.eup %1948 }
 0x596   :  { %v860_v41 = vsel %vm796_vm8, %v2458_v31, 0.0  ;;  %v2462_v33 = vpop.eup %1950 }
 0x597   :  { %v866_v36 = vsel %vm796_vm8, %v2462_v33, 0.0  ;;  %v2477_v27 = vpop.eup %1952 }
 0x598   :  { %v854_v44 = vsel %vm796_vm8, %v2477_v27, 0.0  ;;  %v2481_v0 = vpop.eup %1954 }
 0x599   :  { %v863_v1 = vsel %vm796_vm8, %v2481_v0, 0.0 }
 0x59d   :  { %1267 = vrot.lane.b32.xlu1 %v2422_v48, %s1992_s24 }
 0x5a9   :  { %1265 = vrot.lane.b32.xlu0 %v2428_v52, %s1992_s24 }
 0x5b4   :  { %v847_v49 = vpop.xlane.xlu1 %846 }
 0x5b8   :  { %v1264_v18 = vpop.permute.xlu1 %1263 }
 0x5b9   :  { %1803 = vmatprep.mubr.msk.f32.mxu1 %vm796_vm8, %v1264_v18 }
 0x5c1   :  { %1242 = vadd.xlane.f32.xlu1 %v1241_v63 }
 0x5c8   :  { %852 = vadd.xlane.f32.xlu0 %v851_v58 }
 0x5cc   :  { %858 = vadd.xlane.f32.xlu0 %v857_v54 }
 0x5d0   :  { %861 = vadd.xlane.f32.xlu0 %v860_v41 }
 0x5d2   :  { %1269 = vrot.lane.b32.xlu1 %v2465_v35, %s1992_s24 }
 0x5d4   :  { %867 = vadd.xlane.f32.xlu0 %v866_v36 }
 0x5f6   :  { %855 = vadd.xlane.f32.xlu1 %v854_v44 }
 0x5fa   :  { %864 = vadd.xlane.f32.xlu1 %v863_v1 }
 0x608   :  { %v1228_v50 = vpop.xlane.xlu0 %1227 }
 0x609   :  { %1956 = vrcp.f32 %v1228_v50  ;;  %v1225_v25 = vpop.xlane.xlu1 %1224 }
 0x60a   :  { %1958 = vrcp.f32 %v1225_v25 }
 0x60b   :  { %1960 = vrcp.f32 %v847_v49  ;;  %1415 = vperm.xlu1 %1915, %v1498_v24  }
 0x60c   :  { %v850_v62 = vpop.xlane.xlu0 %849 }
 0x60d   :  { %1962 = vrcp.f32 %v850_v62 }
 0x610   :  { %v1234_v38 = vpop.xlane.xlu0 %1233 }
 0x611   :  { %1964 = vrcp.f32 %v1234_v38 }
 0x613   :  { %v1957_v39 = vpop.eup %1956 }
 0x614   :  { %v1959_v7 = vpop.eup %1958  ;;  %v1231_v56 = vpop.xlane.xlu1 %1230  ;;  %v1250_v10 = vmul.f32 %v1957_v39, %v2382_v5 }
 0x615   :  { %v1961_v59 = vpop.eup %1960  ;;  %1966 = vrcp.f32 %v1231_v56  ;;  %v1248_v11 = vmul.f32 %v1959_v7, %v2384_v45 }
 0x616   :  { %v870_v21 = vmul.f32 %v1961_v59, %v2359_v29 }
 0x617   :  { %v1963_v15 = vpop.eup %1962  ;;  %v1885_v20 = vpack.c.bf16 %v1250_v10, %v1248_v11 }
 0x618   :  { %v1240_v8 = vpop.xlane.xlu0 %1239  ;;  %v872_v9 = vmul.f32 %v1963_v15, %v2388_v6 }
 0x619   :  { %1968 = vrcp.f32 %v1240_v8  ;;  %v1237_v23 = vpop.xlane.xlu1 %1236  ;;  %1887 = vmatprep.subr.msk.bf16.mxu1 %vm2489_vm9, %v1885_v20 }
 0x61a   :  { %1970 = vrcp.f32 %v1237_v23  ;;  %1890 = vmatpush3.bf16.xpose.msk.msra.mxu1 %vm2489_vm9, %v1885_v20  ;;  %v1861_v5 = vpack.c.bf16 %v872_v9, %v870_v21 }
 0x61b   :  { %v1965_v45 = vpop.eup %1964 }
 0x61c   :  { %1863 = vmatprep.subr.msk.bf16.mxu0 %vm2489_vm9, %v1861_v5  ;;  %v1254_v34 = vmul.f32 %v1965_v45, %v2396_v16 }
 0x61d   :  { %1866 = vmatpush3.bf16.xpose.msk.msra.mxu0 %vm2489_vm9, %v1861_v5  ;;  %v1268_v16 = vpop.permute.xlu1 %1267 }
 0x61f   :  { %v1967_v29 = vpop.eup %1966 }
 0x620   :  { %v1252_v6 = vmul.f32 %v1967_v29, %v2404_v22  ;;  %v1246_v22 = vpop.xlane.xlu0 %1245 }
 0x621   :  { %1972 = vrcp.f32 %v1246_v22 }
 0x622   :  { %v1891_v12 = vpack.c.bf16 %v1254_v34, %v1252_v6 }
 0x623   :  { %v1969_v43 = vpop.eup %1968 }
 0x624   :  { %v1971_v47 = vpop.eup %1970  ;;  %1893 = vmatprep.subr.msk.bf16.mxu1 %vm2489_vm9, %v1891_v12  ;;  %v1258_v53 = vmul.f32 %v1969_v43, %v2408_v40 }
 0x625   :  { %1896 = vmatpush3.bf16.xpose.msk.msra.mxu1 %vm2489_vm9, %v1891_v12  ;;  %v1256_v60 = vmul.f32 %v1971_v47, %v2410_v42  ;;  %v1266_v42 = vpop.permute.xlu0 %1265 }
 0x627   :  { %v1897_v61 = vpack.c.bf16 %v1258_v53, %v1256_v60 }
 0x629   :  { %1899 = vmatprep.subr.msk.bf16.mxu1 %vm2489_vm9, %v1897_v61 }
 0x62b   :  { %v1973_v30 = vpop.eup %1972 }
 0x62c   :  { %v1262_v17 = vmul.f32 %v1973_v30, %v2416_v46 }
 0x62d   :  { %1902 = vmatpush3.bf16.xpose.msk.msra.mxu1 %vm2489_vm9, %v1897_v61 }
 0x64e   :  { %v1243_v49 = vpop.xlane.xlu1 %1242 }
 0x64f   :  { %1974 = vrcp.f32 %v1243_v49 }
 0x652   :  { %v1270_v63 = vpop.permute.xlu1 %1269 }
 0x655   :  { %v853_v51 = vpop.xlane.xlu0 %852 }
 0x656   :  { %1976 = vrcp.f32 %v853_v51 }
 0x659   :  { %v1975_v18 = vpop.eup %1974  ;;  %v859_v58 = vpop.xlane.xlu0 %858 }
 0x65a   :  { %v1260_v40 = vmul.f32 %v1975_v18, %v2440_v19 }
 0x65c   :  { %v1903_v13 = vpack.c.bf16 %v1262_v17, %v1260_v40 }
 0x65d   :  { %v862_v19 = vpop.xlane.xlu0 %861 }
 0x65e   :  { %1905 = vmatprep.subr.msk.bf16.mxu1 %vm2489_vm9, %v1903_v13  ;;  %1978 = vrcp.f32 %v862_v19 }
 0x65f   :  { %1908 = vmatpush3.bf16.xpose.msk.msra.mxu1 %vm2489_vm9, %v1903_v13  ;;  %1980 = vrcp.f32 %v859_v58 }
 0x660   :  { %v1977_v41 = vpop.eup %1976 }
 0x661   :  { %v868_v32 = vpop.xlane.xlu0 %867  ;;  %v874_v44 = vmul.f32 %v1977_v41, %v2450_v26 }
 0x666   :  { %1804 = vmatmul.mubr.msk.f32.vlgmr.msra.gmra.mrb[24].mxu1 %vm796_vm8, %v1266_v42 }
 0x667   :  { %1806 = vmatprep.mubr.msk.f32.mxu1 %vm796_vm8, %v1268_v16 }
 0x668   :  { %v1979_v36 = vpop.eup %1978 }
 0x669   :  { %v1981_v37 = vpop.eup %1980  ;;  %v880_v50 = vmul.f32 %v1979_v36, %v2458_v31 }
 0x66a   :  { %1807 = vmatmul.mubr.msk.f32.gmra.mrb[26].mxu1 %vm796_vm8, %v1270_v63  ;;  %v878_v25 = vmul.f32 %v1981_v37, %v2454_v28 }
 0x66c   :  { %v1873_v62 = vpack.c.bf16 %v880_v50, %v878_v25 }
 0x683   :  { %v856_v46 = vpop.xlane.xlu1 %855 }
 0x684   :  { %1982 = vrcp.f32 %v856_v46 }
 0x687   :  { %v865_v54 = vpop.xlane.xlu1 %864 }
 0x688   :  { %1984 = vrcp.f32 %v865_v54 }
 0x689   :  { %1986 = vrcp.f32 %v868_v32 }
 0x68e   :  { %v1983_v4 = vpop.eup %1982 }
 0x68f   :  { %v876_v1 = vmul.f32 %v1983_v4, %v2477_v27 }
 0x691   :  { %v1867_v24 = vpack.c.bf16 %v876_v1, %v874_v44 }
 0x692   :  { %v1985_v38 = vpop.eup %1984 }
 0x693   :  { %1869 = vmatprep.subr.msk.bf16.mxu0 %vm2489_vm9, %v1867_v24  ;;  %v1987_v39 = vpop.eup %1986  ;;  %v882_v26 = vmul.f32 %v1985_v38, %v2481_v0 }
 0x694   :  { %1872 = vmatpush3.bf16.xpose.msk.msra.mxu0 %vm2489_vm9, %v1867_v24  ;;  %v884_v27 = vmul.f32 %v1987_v39, %v2462_v33 }
 0x695   :  { %1875 = vmatprep.subr.msk.bf16.mxu0 %vm2489_vm9, %v1873_v62 }
 0x696   :  { %v1879_v31 = vpack.c.bf16 %v884_v27, %v882_v26 }
 0x69c   :  { %1878 = vmatpush3.bf16.xpose.msk.msra.mxu0 %vm2489_vm9, %v1873_v62 }
 0x69d   :  { %1881 = vmatprep.subr.msk.bf16.mxu0 %vm2489_vm9, %v1879_v31 }
 0x6a4   :  { %1884 = vmatpush3.bf16.xpose.msk.msra.mxu0 %vm2489_vm9, %v1879_v31 }
 0x6ab   :  { %1768 = vmatmul.mubr.msk.f32.vlgmr.msra.gmra.mrb[8].mxu0 %vm796_vm8, %v2428_v52 }
 0x6ac   :  { %1770 = vmatprep.mubr.msk.f32.mxu0 %vm796_vm8, %v2422_v48  ;;  %v1416_v48 = vpop.permute.xlu1 %1415 }
 0x6af   :  { %1771 = vmatmul.mubr.msk.f32.gmra.mrb[10].mxu0 %vm796_vm8, %v2465_v35 }
 0x739   :  { %v1805_v28 = vpop.f32.mrb[24].mxu1 }
 0x73a   :  { %1394 = vrot.lane.b32.xlu1 %v1805_v28, %s1992_s24  ;;  %v1369_v33 = vpop.f32.mrb[25].mxu1 }
 0x73b   :  { %1392 = vrot.lane.b32.xlu0 %v1369_v33, %s1992_s24 }
 0x73d   :  { %v1808_v0 = vpop.f32.mrb[26].mxu1 }
 0x73e   :  { %v1379_v7 = vpop.f32.mrb[27].mxu1 }
 0x73f   :  { %1398 = vrot.lane.b32.xlu0 %v1808_v0, %s1992_s24  ;;  %1396 = vrot.lane.b32.xlu1 %v1379_v7, %s1992_s24 }
 0x77e   :  { %v1769_v56 = vpop.f32.mrb[8].mxu0 }
 0x77f   :  { %v987_v52 = vpop.f32.mrb[9].mxu0 }
 0x782   :  { %v1772_v10 = vpop.f32.mrb[10].mxu0 }
 0x783   :  { %v997_v59 = vpop.f32.mrb[11].mxu0 }
 0x7ac   :  { %v1395_v11 = vpop.permute.xlu1 %1394 }
 0x7ad   :  { %v1405_v35 = vsel %vm796_vm8, %v1769_v56, %v1395_v11  ;;  %v1393_v14 = vpop.permute.xlu0 %1392 }
 0x7ae   :  { %v1419_v15 = vmul.f32 %v1416_v48, %v1405_v35  ;;  %v1404_v20 = vsel %vm796_vm8, %v987_v52, %v1393_v14 }
 0x7af   :  { %v1418_v8 = vmul.f32 %v1416_v48, %v1404_v20 }
 0x7b0   :  { %v1423_v21 = vadd.f32 %v1419_v15, %v2215_v57 }
 0x7b1   :  { %v1422_v9 = vadd.f32 %v1418_v8, %v2213_v55  ;;  %v1397_v23 = vpop.permute.xlu1 %1396  ;;  %v1399_v5 = vpop.permute.xlu0 %1398 }
 0x7b2   :  { %v1406_v45 = vsel %vm796_vm8, %v997_v59, %v1397_v23  ;;  %v1407_v29 = vsel %vm796_vm8, %v1772_v10, %v1399_v5 }
 0x7b3   :  { %v1574_v6 = vpack.c.bf16 %v1423_v21, %v1422_v9  ;;  %v1420_v34 = vmul.f32 %v1416_v48, %v1406_v45  ;;  %v1421_v12 = vmul.f32 %v1416_v48, %v1407_v29 }
 0x7b5   :  { %1575 = vst [vmem:[%s2578_s12] sm:$0xff] %v1574_v6   ;;  %v1424_v43 = vadd.f32 %v1420_v34, %v2223_v2  ;;  %v1425_v47 = vadd.f32 %v1421_v12, %v2225_v3 }
 0x7b7   :  { %v1579_v57 = vpack.c.bf16 %v1425_v47, %v1424_v43 }
 0x7b9   :  { %1596 = vst [vmem:[%s2578_s12 + $0x8] sm:$0xff] %v1579_v57  }

// kernel: discriminator_forward.7
= control target key start
LH: loop header
LB: loop body
LE: loop exit
PB: predicated region body
PF: predicated region fallthrough
CT: control target
= control target key end

     0   :  { %s1736_s0 = inlined_call_operand.vmem [shape: bf16[512,32], index: 0, kind: input, shape index: {}]   ;;  %s1737_s1 = inlined_call_operand.vmem [shape: f32[64,512], index: 1, kind: input, shape index: {}]   ;;  %s1738_s2 = inlined_call_operand.vmem [shape: f32[64,1], index: 2, kind: input, shape index: {}]   ;;  %s1739_s3 = inlined_call_operand.vmem [shape: f32[64,1], index: 3, kind: input, shape index: {}]   ;;  %s1740_s4 = inlined_call_operand.vmem [shape: f32[64,1], index: 4, kind: input, shape index: {}]   ;;  %s1741_s5 = inlined_call_operand.vmem [shape: f32[64,32], index: 5, kind: input, shape index: {}]   ;;  %s1742_s6 = inlined_call_operand.<no memory space> [shape: f32[1,1], index: 6, kind: input, shape index: {}]   ;;  %s1743_s7 = inlined_call_operand.vmem [shape: f32[32,2], index: 7, kind: input, shape index: {}]   ;;  %s1744_s8 = inlined_call_operand.hbm [shape: f32[1,2], index: 8, kind: output, shape index: {}]  }
   0x1   :  { %v13_v0 = vstv %s1742_s6 }
   0x2   :  { %14 = vst [vmem:[#allocation2] sm:$0x1] %v13_v0 }
   0x3   :  { %v987_v1 = vld [vmem:[%s1736_s0 + $0x40] sm:$0xff]   ;;  %v988_v5 = vld [vmem:[%s1736_s0 + $0x48] sm:$0xff]   ;;  %v989_v9 = vld [vmem:[%s1736_s0 + $0x50] sm:$0xff]   ;;  %v1258_v11 = vmov 0  }
   0x4   :  { %v853_v2 = vld [vmem:[%s1736_s0] sm:$0xff]   ;;  %1140 = vmatprep.subr.bf16.mxu0 %v987_v1  ;;  %v1004_v6 = vld [vmem:[%s1736_s0 + $0xc8] sm:$0xff]   ;;  %v1005_v10 = vld [vmem:[%s1736_s0 + $0xd0] sm:$0xff]   ;;  %1214 = vset.pattern.permute.xlu0 %v1258_v11 }
   0x5   :  { %v1003_v3 = vld [vmem:[%s1736_s0 + $0xc0] sm:$0xff]   ;;  %1142 = vmatpush3.bf16.msra.mxu0 %v853_v2  ;;  %v980_v7 = vld [vmem:[%s1736_s0 + $0x8] sm:$0xff]   ;;  %1215 = vset.pattern.permute.xlu1 %v1258_v11  ;;  %v981_v12 = vld [vmem:[%s1736_s0 + $0x10] sm:$0xff]  }
   0x6   :  { %1172 = vmatprep.subr.bf16.mxu1 %v1003_v3  ;;  %v995_v4 = vld [vmem:[%s1736_s0 + $0x80] sm:$0xff]   ;;  %1144 = vmatprep.subr.bf16.mxu0 %v988_v5  ;;  %v996_v8 = vld [vmem:[%s1736_s0 + $0x88] sm:$0xff]   ;;  %v997_v13 = vld [vmem:[%s1736_s0 + $0x90] sm:$0xff]  }
   0x7   :  { %1174 = vmatpush3.bf16.msra.mxu1 %v995_v4  ;;  %v990_v14 = vld [vmem:[%s1736_s0 + $0x58] sm:$0xff]   ;;  %v97_v16 = vld [vmem:[%s1737_s1 + $0x8] sm:$0xff]  ;;  %v991_v20 = vld [vmem:[%s1736_s0 + $0x60] sm:$0xff]  }
   0x8   :  { %1176 = vmatprep.subr.bf16.mxu1 %v1004_v6  ;;  %v1006_v15 = vld [vmem:[%s1736_s0 + $0xd8] sm:$0xff]   ;;  %v1007_v21 = vld [vmem:[%s1736_s0 + $0xe0] sm:$0xff]   ;;  %320 = vmatprep.mubr.f32.mxu0 %v97_v16  ;;  %v992_v24 = vld [vmem:[%s1736_s0 + $0x68] sm:$0xff]  }
   0x9   :  { %1146 = vmatpush3.bf16.msra.mxu0 %v980_v7  ;;  %v982_v17 = vld [vmem:[%s1736_s0 + $0x18] sm:$0xff]   ;;  %v983_v22 = vld [vmem:[%s1736_s0 + $0x20] sm:$0xff]   ;;  %v1008_v25 = vld [vmem:[%s1736_s0 + $0xe8] sm:$0xff]  }
   0xa   :  { %1148 = vmatprep.subr.bf16.mxu0 %v989_v9  ;;  %v998_v18 = vld [vmem:[%s1736_s0 + $0x98] sm:$0xff]   ;;  %v999_v23 = vld [vmem:[%s1736_s0 + $0xa0] sm:$0xff]   ;;  %v984_v26 = vld [vmem:[%s1736_s0 + $0x28] sm:$0xff]  }
   0xb   :  { %1178 = vmatpush3.bf16.msra.mxu1 %v996_v8  ;;  %v99_v19 = vld [vmem:[%s1737_s1 + $0x18] sm:$0xff]  ;;  %v1000_v27 = vld [vmem:[%s1736_s0 + $0xa8] sm:$0xff]   ;;  %v993_v28 = vld [vmem:[%s1736_s0 + $0x70] sm:$0xff]  }
   0xc   :  { %1180 = vmatprep.subr.bf16.mxu1 %v1005_v10  ;;  %425 = vmatprep.mubr.f32.mxu1 %v99_v19  ;;  %v1009_v29 = vld [vmem:[%s1736_s0 + $0xf0] sm:$0xff]   ;;  %v128_v30 = vld [vmem:[%s1738_s2] sm:$0xff]  ;;  %v994_v34 = vld [vmem:[%s1736_s0 + $0x78] sm:$0xff]  }
   0xd   :  { %1150 = vmatpush3.bf16.msra.mxu0 %v981_v12  ;;  %v130_v31 = vld [vmem:[%s1738_s2 + $0x10] sm:$0xff]  ;;  %v1010_v35 = vld [vmem:[%s1736_s0 + $0xf8] sm:$0xff]   ;;  %218 = vperm.xlu0 %1214, %v128_v30  }
   0xe   :  { %1152 = vmatprep.subr.bf16.mxu0 %v990_v14  ;;  %v985_v32 = vld [vmem:[%s1736_s0 + $0x30] sm:$0xff]   ;;  %228 = vperm.xlu1 %1215, %v130_v31  }
   0xf   :  { %1182 = vmatpush3.bf16.msra.mxu1 %v997_v13  ;;  %v1001_v33 = vld [vmem:[%s1736_s0 + $0xb0] sm:$0xff]  }
  0x10   :  { %1184 = vmatprep.subr.bf16.mxu1 %v1006_v15 }
  0x11   :  { %1154 = vmatpush3.bf16.msra.mxu0 %v982_v17 }
  0x12   :  { %1156 = vmatprep.subr.bf16.mxu0 %v991_v20 }
  0x13   :  { %1186 = vmatpush3.bf16.msra.mxu1 %v998_v18 }
  0x14   :  { %1188 = vmatprep.subr.bf16.mxu1 %v1007_v21 }
  0x15   :  { %1158 = vmatpush3.bf16.msra.mxu0 %v983_v22 }
  0x16   :  { %1160 = vmatprep.subr.bf16.mxu0 %v992_v24 }
  0x17   :  { %1190 = vmatpush3.bf16.msra.mxu1 %v999_v23 }
  0x18   :  { %1192 = vmatprep.subr.bf16.mxu1 %v1008_v25 }
  0x19   :  { %1162 = vmatpush3.bf16.msra.mxu0 %v984_v26 }
  0x1a   :  { %1164 = vmatprep.subr.bf16.mxu0 %v993_v28 }
  0x1b   :  { %1194 = vmatpush3.bf16.msra.mxu1 %v1000_v27 }
  0x1c   :  { %1196 = vmatprep.subr.bf16.mxu1 %v1009_v29 }
  0x1d   :  { %15 = vsyncpa [#allocation4], 0  ;;  %v129_v36 = vld [vmem:[%s1738_s2 + $0x8] sm:$0xff]  ;;  %v131_v37 = vld [vmem:[%s1738_s2 + $0x18] sm:$0xff]  ;;  %1166 = vmatpush3.bf16.msra.mxu0 %v985_v32  ;;  %vm490_vm1 = vcmask 261120   ;;  %vm1260_vm9 = vmmov 0  }
  0x1e   :  { %1168 = vmatprep.subr.bf16.mxu0 %v994_v34  ;;  %v986_v38 = vld [vmem:[%s1736_s0 + $0x38] sm:$0xff]   ;;  %223 = vperm.xlu0 %1214, %v129_v36   ;;  %v132_v40 = vld [vmem:[%s1738_s2 + $0x20] sm:$0xff]  ;;  %v133_v41 = vld [vmem:[%s1738_s2 + $0x28] sm:$0xff]  ;;  %vm835_vm10 = vcmask 8192  }
  0x1f   :  { %1198 = vmatpush3.bf16.msra.mxu1 %v1001_v33  ;;  %v1002_v39 = vld [vmem:[%s1736_s0 + $0xb8] sm:$0xff]   ;;  %233 = vperm.xlu1 %1215, %v131_v37   ;;  %v96_v42 = vld [vmem:[%s1737_s1] sm:$0xff]  ;;  %v98_v43 = vld [vmem:[%s1737_s1 + $0x10] sm:$0xff] }
  0x20   :  { %1200 = vmatprep.subr.bf16.mxu1 %v1010_v35  ;;  %v101_v44 = vld [vmem:[%s1737_s1 + $0x28] sm:$0xff]  ;;  %v103_v45 = vld [vmem:[%s1737_s1 + $0x38] sm:$0xff]  ;;  %v134_v46 = vld [vmem:[%s1738_s2 + $0x30] sm:$0xff] }
  0x21   :  { %1170 = vmatpush3.bf16.msra.mxu0 %v986_v38  ;;  %v135_v47 = vld [vmem:[%s1738_s2 + $0x38] sm:$0xff]  ;;  %v100_v48 = vld [vmem:[%s1737_s1 + $0x20] sm:$0xff]  ;;  %v102_v49 = vld [vmem:[%s1737_s1 + $0x30] sm:$0xff] }
  0x22   :  { %238 = vperm.xlu0 %1214, %v132_v40   ;;  %v105_v50 = vld [vmem:[%s1737_s1 + $0x48] sm:$0xff]  ;;  %v107_v51 = vld [vmem:[%s1737_s1 + $0x58] sm:$0xff]  ;;  %v104_v52 = vld [vmem:[%s1737_s1 + $0x40] sm:$0xff] }
  0x23   :  { %1202 = vmatpush3.bf16.msra.mxu1 %v1002_v39  ;;  %243 = vperm.xlu1 %1215, %v133_v41   ;;  %v106_v53 = vld [vmem:[%s1737_s1 + $0x50] sm:$0xff]  ;;  %v109_v54 = vld [vmem:[%s1737_s1 + $0x68] sm:$0xff]  ;;  %v111_v55 = vld [vmem:[%s1737_s1 + $0x78] sm:$0xff] }
  0x24   :  { %321 = vmatmul.mubr.f32.vlgmr.msra.gmra.mrb[0].mxu0 %v96_v42  ;;  %v108_v56 = vld [vmem:[%s1737_s1 + $0x60] sm:$0xff]  ;;  %v110_v57 = vld [vmem:[%s1737_s1 + $0x70] sm:$0xff]  ;;  %v113_v58 = vld [vmem:[%s1737_s1 + $0x88] sm:$0xff] }
  0x25   :  { %325 = vmatprep.mubr.f32.mxu0 %v101_v44  ;;  %v115_v59 = vld [vmem:[%s1737_s1 + $0x98] sm:$0xff]  ;;  %v112_v60 = vld [vmem:[%s1737_s1 + $0x80] sm:$0xff]  ;;  %v114_v61 = vld [vmem:[%s1737_s1 + $0x90] sm:$0xff] }
  0x26   :  { %426 = vmatmul.mubr.f32.vlgmr.msra.gmra.mrb[0].mxu1 %v98_v43  ;;  %248 = vperm.xlu0 %1214, %v134_v46   ;;  %v117_v62 = vld [vmem:[%s1737_s1 + $0xa8] sm:$0xff]  ;;  %v119_v63 = vld [vmem:[%s1737_s1 + $0xb8] sm:$0xff]  ;;  %v116_v0 = vld [vmem:[%s1737_s1 + $0xa0] sm:$0xff] }
  0x27   :  { %430 = vmatprep.mubr.f32.mxu1 %v103_v45  ;;  %253 = vperm.xlu1 %1215, %v135_v47   ;;  %v118_v1 = vld [vmem:[%s1737_s1 + $0xb0] sm:$0xff]  ;;  %v121_v2 = vld [vmem:[%s1737_s1 + $0xc8] sm:$0xff]  ;;  %v123_v3 = vld [vmem:[%s1737_s1 + $0xd8] sm:$0xff] }
  0x28   :  { %326 = vmatmul.mubr.f32.gmra.mrb[2].mxu0 %v100_v48  ;;  %v120_v4 = vld [vmem:[%s1737_s1 + $0xc0] sm:$0xff]  ;;  %v122_v5 = vld [vmem:[%s1737_s1 + $0xd0] sm:$0xff]  ;;  %v125_v6 = vld [vmem:[%s1737_s1 + $0xe8] sm:$0xff] }
  0x29   :  { %330 = vmatprep.mubr.f32.mxu0 %v105_v50  ;;  %v127_v7 = vld [vmem:[%s1737_s1 + $0xf8] sm:$0xff]  ;;  %v124_v8 = vld [vmem:[%s1737_s1 + $0xe0] sm:$0xff]  ;;  %v126_v9 = vld [vmem:[%s1737_s1 + $0xf0] sm:$0xff] }
  0x2a   :  { %431 = vmatmul.mubr.f32.gmra.mrb[2].mxu1 %v102_v49 }
  0x2b   :  { %435 = vmatprep.mubr.f32.mxu1 %v107_v51 }
  0x2c   :  { %331 = vmatmul.mubr.f32.gmra.mrb[4].mxu0 %v104_v52 }
  0x2d   :  { %335 = vmatprep.mubr.f32.mxu0 %v109_v54 }
  0x2e   :  { %436 = vmatmul.mubr.f32.gmra.mrb[4].mxu1 %v106_v53 }
  0x2f   :  { %440 = vmatprep.mubr.f32.mxu1 %v111_v55 }
  0x30   :  { %336 = vmatmul.mubr.f32.gmra.mrb[6].mxu0 %v108_v56 }
  0x31   :  { %340 = vmatprep.mubr.f32.mxu0 %v113_v58 }
  0x32   :  { %441 = vmatmul.mubr.f32.gmra.mrb[6].mxu1 %v110_v57 }
  0x33   :  { %445 = vmatprep.mubr.f32.mxu1 %v115_v59 }
  0x34   :  { %341 = vmatmul.mubr.f32.gmra.mrb[8].mxu0 %v112_v60 }
  0x35   :  { %345 = vmatprep.mubr.f32.mxu0 %v117_v62 }
  0x36   :  { %446 = vmatmul.mubr.f32.gmra.mrb[8].mxu1 %v114_v61 }
  0x37   :  { %450 = vmatprep.mubr.f32.mxu1 %v119_v63 }
  0x38   :  { %346 = vmatmul.mubr.f32.gmra.mrb[10].mxu0 %v116_v0 }
  0x39   :  { %350 = vmatprep.mubr.f32.mxu0 %v121_v2 }
  0x3a   :  { %451 = vmatmul.mubr.f32.gmra.mrb[10].mxu1 %v118_v1 }
  0x3b   :  { %455 = vmatprep.mubr.f32.mxu1 %v123_v3 }
  0x3c   :  { %351 = vmatmul.mubr.f32.gmra.mrb[12].mxu0 %v120_v4 }
  0x3d   :  { %355 = vmatprep.mubr.f32.mxu0 %v125_v6 }
  0x3e   :  { %456 = vmatmul.mubr.f32.gmra.mrb[12].mxu1 %v122_v5 }
  0x3f   :  { %460 = vmatprep.mubr.f32.mxu1 %v127_v7 }
  0x40   :  { %356 = vmatmul.mubr.f32.gmra.mrb[14].mxu0 %v124_v8 }
  0x42   :  { %461 = vmatmul.mubr.f32.gmra.mrb[14].mxu1 %v126_v9 }
  0x8c   :  { %v219_v10 = vpop.permute.xlu0 %218 }
  0x8d   :  { %v229_v26 = vpop.permute.xlu1 %228 }
  0x9d   :  { %v224_v25 = vpop.permute.xlu0 %223 }
  0x9e   :  { %v234_v49 = vpop.permute.xlu1 %233 }
  0xa1   :  { %v239_v63 = vpop.permute.xlu0 %238 }
  0xf7   :  { %v1043_v11 = vpop.f32.mrb[0].mxu0 }
  0xf8   :  { %v1044_v13 = vpop.f32.mrb[1].mxu0 }
  0xf9   :  { %v1099_v12 = vpop.f32.mrb[0].mxu1  ;;  %v1045_v15 = vadd.f32 %v1044_v13, %v1043_v11  ;;  %v244_v13 = vpop.permute.xlu1 %243 }
  0xfa   :  { %v1100_v14 = vpop.f32.mrb[1].mxu1 }
  0xfb   :  { %v1101_v16 = vadd.f32 %v1100_v14, %v1099_v12  ;;  %v323_v17 = vadd.f32 %v1045_v15, %v219_v10  ;;  %v1046_v18 = vpop.f32.mrb[2].mxu0 }
  0xfc   :  { %v1047_v20 = vpop.f32.mrb[3].mxu0 }
  0xfd   :  { %v1102_v19 = vpop.f32.mrb[2].mxu1  ;;  %v428_v22 = vadd.f32 %v1101_v16, %v323_v17  ;;  %v1048_v23 = vadd.f32 %v1047_v20, %v1046_v18 }
  0xfe   :  { %v1103_v21 = vpop.f32.mrb[3].mxu1 }
  0xff   :  { %v1104_v24 = vadd.f32 %v1103_v21, %v1102_v19  ;;  %v474_v27 = vmul.f32 0.2, %v428_v22  ;;  %v328_v28 = vadd.f32 %v1048_v23, %v224_v25  ;;  %v1049_v29 = vpop.f32.mrb[4].mxu0  ;;  %vm466_vm0 = vcmp.ge.f32.partialorder %v428_v22, 0.0 }
 0x100   :  { %v1050_v31 = vpop.f32.mrb[5].mxu0 }
 0x101   :  { %v1105_v30 = vpop.f32.mrb[4].mxu1  ;;  %v433_v33 = vadd.f32 %v1104_v24, %v328_v28  ;;  %v1051_v34 = vadd.f32 %v1050_v31, %v1049_v29  ;;  %v1527_v36 = vsel %vm466_vm0, %v428_v22, %v474_v27  ;;  %v249_v27 = vpop.permute.xlu0 %248 }
 0x102   :  { %v1106_v32 = vpop.f32.mrb[5].mxu1  ;;  %v491_v37 = vsel %vm490_vm1, %v1527_v36, 0.0  ;;  %v523_v38 = vmul.f32 %v1527_v36, %v1527_v36 }
 0x103   :  { %v1107_v35 = vadd.f32 %v1106_v32, %v1105_v30  ;;  %v475_v39 = vmul.f32 0.2, %v433_v33  ;;  %v333_v40 = vadd.f32 %v1051_v34, %v229_v26  ;;  %v1052_v41 = vpop.f32.mrb[6].mxu0  ;;  %492 = vadd.xlane.f32.xlu0 %v491_v37  ;;  %vm467_vm2 = vcmp.ge.f32.partialorder %v433_v33, 0.0 }
 0x104   :  { %v1053_v43 = vpop.f32.mrb[7].mxu0  ;;  %v531_v51 = vsel %vm490_vm1, %v523_v38, 0.0 }
 0x105   :  { %v1108_v42 = vpop.f32.mrb[6].mxu1  ;;  %v438_v45 = vadd.f32 %v1107_v35, %v333_v40  ;;  %v1054_v46 = vadd.f32 %v1053_v43, %v1052_v41  ;;  %v1533_v48 = vsel %vm467_vm2, %v433_v33, %v475_v39 }
 0x106   :  { %v1109_v44 = vpop.f32.mrb[7].mxu1  ;;  %v494_v50 = vsel %vm490_vm1, %v1533_v48, 0.0  ;;  %v524_v52 = vmul.f32 %v1533_v48, %v1533_v48 }
 0x107   :  { %v1110_v47 = vadd.f32 %v1109_v44, %v1108_v42  ;;  %v476_v53 = vmul.f32 0.2, %v438_v45  ;;  %v338_v54 = vadd.f32 %v1054_v46, %v234_v49  ;;  %v1055_v55 = vpop.f32.mrb[8].mxu0  ;;  %495 = vadd.xlane.f32.xlu1 %v494_v50  ;;  %532 = vadd.xlane.f32.xlu0 %v531_v51  ;;  %vm468_vm3 = vcmp.ge.f32.partialorder %v438_v45, 0.0  ;;  %v254_v42 = vpop.permute.xlu1 %253 }
 0x108   :  { %v1056_v57 = vpop.f32.mrb[9].mxu0  ;;  %v534_v0 = vsel %vm490_vm1, %v524_v52, 0.0 }
 0x109   :  { %v1111_v56 = vpop.f32.mrb[8].mxu1  ;;  %v443_v59 = vadd.f32 %v1110_v47, %v338_v54  ;;  %v1057_v60 = vadd.f32 %v1056_v57, %v1055_v55  ;;  %v1540_v62 = vsel %vm468_vm3, %v438_v45, %v476_v53 }
 0x10a   :  { %v1112_v58 = vpop.f32.mrb[9].mxu1  ;;  %v497_v1 = vsel %vm490_vm1, %v1540_v62, 0.0  ;;  %v525_v2 = vmul.f32 %v1540_v62, %v1540_v62 }
 0x10b   :  { %v1113_v61 = vadd.f32 %v1112_v58, %v1111_v56  ;;  %v477_v3 = vmul.f32 0.2, %v443_v59  ;;  %v343_v4 = vadd.f32 %v1057_v60, %v239_v63  ;;  %v1058_v5 = vpop.f32.mrb[10].mxu0  ;;  %535 = vadd.xlane.f32.xlu1 %v534_v0  ;;  %498 = vadd.xlane.f32.xlu0 %v497_v1  ;;  %vm469_vm4 = vcmp.ge.f32.partialorder %v443_v59, 0.0  ;;  %v144_v60 = vld [vmem:[%s1740_s4] sm:$0xff]  ;;  %v146_v63 = vld [vmem:[%s1740_s4 + $0x10] sm:$0xff] }
 0x10c   :  { %v1059_v7 = vpop.f32.mrb[11].mxu0  ;;  %v537_v14 = vsel %vm490_vm1, %v525_v2, 0.0  ;;  %v147_v0 = vld [vmem:[%s1740_s4 + $0x18] sm:$0xff] }
 0x10d   :  { %v1114_v6 = vpop.f32.mrb[10].mxu1  ;;  %v448_v9 = vadd.f32 %v1113_v61, %v343_v4  ;;  %v1060_v10 = vadd.f32 %v1059_v7, %v1058_v5  ;;  %v1547_v12 = vsel %vm469_vm4, %v443_v59, %v477_v3  ;;  %v145_v61 = vld [vmem:[%s1740_s4 + $0x8] sm:$0xff] }
 0x10e   :  { %v1115_v8 = vpop.f32.mrb[11].mxu1  ;;  %v500_v15 = vsel %vm490_vm1, %v1547_v12, 0.0  ;;  %v526_v16 = vmul.f32 %v1547_v12, %v1547_v12 }
 0x10f   :  { %v1116_v11 = vadd.f32 %v1115_v8, %v1114_v6  ;;  %v478_v17 = vmul.f32 0.2, %v448_v9  ;;  %v348_v18 = vadd.f32 %v1060_v10, %v244_v13  ;;  %v1061_v19 = vpop.f32.mrb[12].mxu0  ;;  %538 = vadd.xlane.f32.xlu1 %v537_v14  ;;  %501 = vadd.xlane.f32.xlu0 %v500_v15  ;;  %vm470_vm5 = vcmp.ge.f32.partialorder %v448_v9, 0.0 }
 0x110   :  { %v1062_v21 = vpop.f32.mrb[13].mxu0  ;;  %v540_v28 = vsel %vm490_vm1, %v526_v16, 0.0 }
 0x111   :  { %v1117_v20 = vpop.f32.mrb[12].mxu1  ;;  %v453_v23 = vadd.f32 %v1116_v11, %v348_v18  ;;  %v1063_v24 = vadd.f32 %v1062_v21, %v1061_v19  ;;  %v1554_v26 = vsel %vm470_vm5, %v448_v9, %v478_v17 }
 0x112   :  { %v1118_v22 = vpop.f32.mrb[13].mxu1  ;;  %v503_v29 = vsel %vm490_vm1, %v1554_v26, 0.0  ;;  %v527_v30 = vmul.f32 %v1554_v26, %v1554_v26 }
 0x113   :  { %v1119_v25 = vadd.f32 %v1118_v22, %v1117_v20  ;;  %v479_v31 = vmul.f32 0.2, %v453_v23  ;;  %v353_v32 = vadd.f32 %v1063_v24, %v249_v27  ;;  %v1064_v33 = vpop.f32.mrb[14].mxu0  ;;  %541 = vadd.xlane.f32.xlu1 %v540_v28  ;;  %504 = vadd.xlane.f32.xlu0 %v503_v29  ;;  %vm471_vm6 = vcmp.ge.f32.partialorder %v453_v23, 0.0 }
 0x114   :  { %v1065_v35 = vpop.f32.mrb[15].mxu0  ;;  %v543_v43 = vsel %vm490_vm1, %v527_v30, 0.0 }
 0x115   :  { %v1120_v34 = vpop.f32.mrb[14].mxu1  ;;  %v458_v38 = vadd.f32 %v1119_v25, %v353_v32  ;;  %v1066_v39 = vadd.f32 %v1065_v35, %v1064_v33  ;;  %v1561_v41 = vsel %vm471_vm6, %v453_v23, %v479_v31  ;;  %v136_v32 = vld [vmem:[%s1739_s3] sm:$0xff] }
 0x116   :  { %v1121_v37 = vpop.f32.mrb[15].mxu1  ;;  %v506_v44 = vsel %vm490_vm1, %v1561_v41, 0.0  ;;  %v528_v45 = vmul.f32 %v1561_v41, %v1561_v41 }
 0x117   :  { %v1122_v40 = vadd.f32 %v1121_v37, %v1120_v34  ;;  %v480_v46 = vmul.f32 0.2, %v458_v38  ;;  %v358_v47 = vadd.f32 %v1066_v39, %v254_v42  ;;  %544 = vadd.xlane.f32.xlu1 %v543_v43  ;;  %507 = vadd.xlane.f32.xlu0 %v506_v44  ;;  %vm472_vm7 = vcmp.ge.f32.partialorder %v458_v38, 0.0  ;;  %v137_v44 = vld [vmem:[%s1739_s3 + $0x8] sm:$0xff] }
 0x118   :  { %v546_v51 = vsel %vm490_vm1, %v528_v45, 0.0 }
 0x119   :  { %v463_v49 = vadd.f32 %v1122_v40, %v358_v47  ;;  %v1568_v50 = vsel %vm472_vm7, %v458_v38, %v480_v46 }
 0x11a   :  { %v509_v52 = vsel %vm490_vm1, %v1568_v50, 0.0  ;;  %v529_v53 = vmul.f32 %v1568_v50, %v1568_v50 }
 0x11b   :  { %v481_v54 = vmul.f32 0.2, %v463_v49  ;;  %547 = vadd.xlane.f32.xlu1 %v546_v51  ;;  %510 = vadd.xlane.f32.xlu0 %v509_v52  ;;  %vm473_vm8 = vcmp.ge.f32.partialorder %v463_v49, 0.0 }
 0x11c   :  { %v549_v56 = vsel %vm490_vm1, %v529_v53, 0.0 }
 0x11d   :  { %v1575_v55 = vsel %vm473_vm8, %v463_v49, %v481_v54 }
 0x11e   :  { %v512_v57 = vsel %vm490_vm1, %v1575_v55, 0.0  ;;  %v530_v58 = vmul.f32 %v1575_v55, %v1575_v55 }
 0x11f   :  { %550 = vadd.xlane.f32.xlu1 %v549_v56  ;;  %513 = vadd.xlane.f32.xlu0 %v512_v57  ;;  %v138_v57 = vld [vmem:[%s1739_s3 + $0x10] sm:$0xff] }
 0x120   :  { %v552_v59 = vsel %vm490_vm1, %v530_v58, 0.0 }
 0x123   :  { %553 = vadd.xlane.f32.xlu0 %v552_v59 }
 0x130   :  { %661 = vperm.xlu1 %1215, %v144_v60  }
 0x139   :  { %666 = vperm.xlu0 %1214, %v145_v61  }
 0x13d   :  { %671 = vperm.xlu0 %1214, %v146_v63  }
 0x141   :  { %676 = vperm.xlu0 %1214, %v147_v0  }
 0x190   :  { %v493_v1 = vpop.xlane.xlu0 %492 }
 0x191   :  { %v1595_v2 = vmul.f32 0.03125, %v493_v1 }
 0x193   :  { %v563_v5 = vmul.f32 %v1595_v2, %v1595_v2 }
 0x194   :  { %v496_v3 = vpop.xlane.xlu1 %495  ;;  %v533_v4 = vpop.xlane.xlu0 %532 }
 0x195   :  { %v1599_v6 = vmul.f32 0.03125, %v496_v3  ;;  %v555_v7 = vmul.f32 0.03125, %v533_v4  ;;  %v148_v3 = vld [vmem:[%s1740_s4 + $0x20] sm:$0xff] }
 0x197   :  { %v571_v8 = vsub.f32 %v555_v7, %v563_v5  ;;  %v564_v11 = vmul.f32 %v1599_v6, %v1599_v6  ;;  %v139_v7 = vld [vmem:[%s1739_s3 + $0x18] sm:$0xff] }
 0x198   :  { %v536_v9 = vpop.xlane.xlu1 %535  ;;  %v499_v10 = vpop.xlane.xlu0 %498 }
 0x199   :  { %v579_v13 = vadd.f32 1e-05, %v571_v8  ;;  %v556_v14 = vmul.f32 0.03125, %v536_v9  ;;  %v1603_v15 = vmul.f32 0.03125, %v499_v10 }
 0x19b   :  { %1216 = vrsqrt.f32 %v579_v13  ;;  %v572_v16 = vsub.f32 %v556_v14, %v564_v11  ;;  %v565_v20 = vmul.f32 %v1603_v15, %v1603_v15  ;;  %v149_v14 = vld [vmem:[%s1740_s4 + $0x28] sm:$0xff] }
 0x19c   :  { %v539_v17 = vpop.xlane.xlu1 %538  ;;  %v502_v18 = vpop.xlane.xlu0 %501 }
 0x19d   :  { %v580_v19 = vadd.f32 1e-05, %v572_v16  ;;  %v557_v21 = vmul.f32 0.03125, %v539_v17  ;;  %v1607_v22 = vmul.f32 0.03125, %v502_v18  ;;  %v140_v18 = vld [vmem:[%s1739_s3 + $0x20] sm:$0xff] }
 0x19f   :  { %1218 = vrsqrt.f32 %v580_v19  ;;  %v573_v23 = vsub.f32 %v557_v21, %v565_v20  ;;  %v566_v28 = vmul.f32 %v1607_v22, %v1607_v22  ;;  %v150_v21 = vld [vmem:[%s1740_s4 + $0x30] sm:$0xff] }
 0x1a0   :  { %v542_v24 = vpop.xlane.xlu1 %541  ;;  %v505_v25 = vpop.xlane.xlu0 %504 }
 0x1a1   :  { %v581_v27 = vadd.f32 1e-05, %v573_v23  ;;  %v558_v29 = vmul.f32 0.03125, %v542_v24  ;;  %v1611_v30 = vmul.f32 0.03125, %v505_v25  ;;  %v141_v24 = vld [vmem:[%s1739_s3 + $0x28] sm:$0xff] }
 0x1a3   :  { %1220 = vrsqrt.f32 %v581_v27  ;;  %v574_v31 = vsub.f32 %v558_v29, %v566_v28  ;;  %v567_v38 = vmul.f32 %v1611_v30, %v1611_v30  ;;  %v748_v27 = vld [vmem:[#allocation2] sm:$0x1]  ;;  %v142_v29 = vld [vmem:[%s1739_s3 + $0x30] sm:$0xff] }
 0x1a4   :  { %v545_v33 = vpop.xlane.xlu1 %544  ;;  %v508_v34 = vpop.xlane.xlu0 %507 }
 0x1a5   :  { %v1217_v35 = vpop.eup %1216  ;;  %v582_v37 = vadd.f32 1e-05, %v574_v31  ;;  %v559_v39 = vmul.f32 0.03125, %v545_v33  ;;  %v1618_v40 = vmul.f32 0.03125, %v508_v34  ;;  %v143_v33 = vld [vmem:[%s1739_s3 + $0x38] sm:$0xff]  ;;  %v744_v34 = vld [vmem:[%s1743_s7] sm:$0xff] }
 0x1a6   :  { %v603_v42 = vmul.f32 %v1217_v35, %v136_v32  ;;  %v745_v35 = vld [vmem:[%s1743_s7 + $0x8] sm:$0xff] }
 0x1a7   :  { %1222 = vrsqrt.f32 %v582_v37  ;;  %v575_v43 = vsub.f32 %v559_v39, %v567_v38  ;;  %v568_v51 = vmul.f32 %v1618_v40, %v1618_v40  ;;  %v1259_v37 = vmov 0.0|0.0  }
 0x1a8   :  { %v548_v45 = vpop.xlane.xlu1 %547  ;;  %613 = vperm.xlu1 %1215, %v603_v42   ;;  %v511_v46 = vpop.xlane.xlu0 %510  ;;  %1203 = vmatprep.subr.bf16.mxu0 %v1259_v37  ;;  %v1204_v38 = vpack.c.bf16 %v745_v35, %v744_v34 }
 0x1a9   :  { %v1219_v47 = vpop.eup %1218  ;;  %v583_v49 = vadd.f32 1e-05, %v575_v43  ;;  %v560_v52 = vmul.f32 0.03125, %v548_v45  ;;  %v1625_v53 = vmul.f32 0.03125, %v511_v46  ;;  %v151_v43 = vld [vmem:[%s1740_s4 + $0x38] sm:$0xff] }
 0x1aa   :  { %v604_v54 = vmul.f32 %v1219_v47, %v137_v44  ;;  %1205 = vmatpush3.bf16.msra.mxu0 %v1204_v38  ;;  %v746_v44 = vld [vmem:[%s1743_s7 + $0x10] sm:$0xff]  ;;  %v747_v45 = vld [vmem:[%s1743_s7 + $0x18] sm:$0xff]  ;;  %v1261_v47 = vmov 0.0  }
 0x1ab   :  { %1224 = vrsqrt.f32 %v583_v49  ;;  %v576_v56 = vsub.f32 %v560_v52, %v568_v51  ;;  %v569_v63 = vmul.f32 %v1625_v53, %v1625_v53  ;;  %1206 = vmatprep.subr.bf16.mxu0 %v1259_v37  ;;  %v1207_v46 = vpack.c.bf16 %v747_v45, %v746_v44  ;;  %1136 = vmatprep.mubr.msk.f32.mxu0 %vm1260_vm9, %v1261_v47 }
 0x1ac   :  { %v551_v58 = vpop.xlane.xlu1 %550  ;;  %618 = vperm.xlu0 %1214, %v604_v54   ;;  %v514_v59 = vpop.xlane.xlu0 %513  ;;  %v595_v54 = vsub.f32 %v1527_v36, %v1595_v2  ;;  %v597_v36 = vsub.f32 %v1540_v62, %v1603_v15  ;;  %v710_v15 = vld [vmem:[%s1741_s5 + $0x18] sm:$0xff]  ;;  %v601_v37 = vsub.f32 %v1568_v50, %v1625_v53 }
 0x1ad   :  { %v1221_v60 = vpop.eup %1220  ;;  %v584_v61 = vadd.f32 1e-05, %v576_v56  ;;  %v561_v0 = vmul.f32 0.03125, %v551_v58  ;;  %v1632_v1 = vmul.f32 0.03125, %v514_v59 }
 0x1ae   :  { %v605_v4 = vmul.f32 %v1221_v60, %v138_v57  ;;  %1208 = vmatpush3.bf16.msra.mxu0 %v1207_v46  ;;  %v596_v60 = vsub.f32 %v1533_v48, %v1599_v6  ;;  %v709_v48 = vld [vmem:[%s1741_s5 + $0x10] sm:$0xff] }
 0x1af   :  { %1226 = vrsqrt.f32 %v584_v61  ;;  %v577_v5 = vsub.f32 %v561_v0, %v569_v63  ;;  %v570_v11 = vmul.f32 %v1632_v1, %v1632_v1  ;;  %v707_v61 = vld [vmem:[%s1741_s5] sm:$0xff] }
 0x1b0   :  { %681 = vperm.xlu0 %1214, %v148_v3   ;;  %623 = vperm.xlu1 %1215, %v605_v4   ;;  %v554_v8 = vpop.xlane.xlu0 %553  ;;  %v662_v52 = vpop.permute.xlu1 %661  ;;  %v708_v3 = vld [vmem:[%s1741_s5 + $0x8] sm:$0xff] }
 0x1b1   :  { %v1223_v9 = vpop.eup %1222  ;;  %v585_v10 = vadd.f32 1e-05, %v577_v5  ;;  %v562_v13 = vmul.f32 0.03125, %v554_v8 }
 0x1b2   :  { %v606_v16 = vmul.f32 %v1223_v9, %v139_v7 }
 0x1b3   :  { %1228 = vrsqrt.f32 %v585_v10  ;;  %v578_v17 = vsub.f32 %v562_v13, %v570_v11  ;;  %v598_v11 = vsub.f32 %v1547_v12, %v1607_v22  ;;  %v711_v12 = vld [vmem:[%s1741_s5 + $0x20] sm:$0xff] }
 0x1b4   :  { %686 = vperm.xlu0 %1214, %v149_v14   ;;  %628 = vperm.xlu1 %1215, %v606_v16  }
 0x1b5   :  { %v1225_v19 = vpop.eup %1224  ;;  %v586_v20 = vadd.f32 1e-05, %v578_v17 }
 0x1b6   :  { %v607_v23 = vmul.f32 %v1225_v19, %v140_v18 }
 0x1b7   :  { %1230 = vrsqrt.f32 %v586_v20  ;;  %v599_v20 = vsub.f32 %v1554_v26, %v1611_v30  ;;  %v712_v26 = vld [vmem:[%s1741_s5 + $0x28] sm:$0xff] }
 0x1b8   :  { %691 = vperm.xlu0 %1214, %v150_v21   ;;  %633 = vperm.xlu1 %1215, %v607_v23   ;;  %v667_v49 = vpop.permute.xlu0 %666 }
 0x1b9   :  { %v1227_v25 = vpop.eup %1226 }
 0x1ba   :  { %v608_v28 = vmul.f32 %v1227_v25, %v141_v24 }
 0x1bc   :  { %751 = vperm.xlu0 %1214, %v748_v27   ;;  %638 = vperm.xlu1 %1215, %v608_v28   ;;  %v672_v51 = vpop.permute.xlu0 %671  ;;  %v600_v28 = vsub.f32 %v1561_v41, %v1618_v40  ;;  %v713_v40 = vld [vmem:[%s1741_s5 + $0x30] sm:$0xff] }
 0x1bd   :  { %v1229_v31 = vpop.eup %1228 }
 0x1be   :  { %v609_v32 = vmul.f32 %v1229_v31, %v142_v29 }
 0x1c0   :  { %643 = vperm.xlu1 %1215, %v609_v32   ;;  %v677_v56 = vpop.permute.xlu0 %676 }
 0x1c1   :  { %v1231_v39 = vpop.eup %1230 }
 0x1c2   :  { %v610_v42 = vmul.f32 %v1231_v39, %v143_v33 }
 0x1c4   :  { %648 = vperm.xlu1 %1215, %v610_v42  }
 0x1c8   :  { %696 = vperm.xlu1 %1215, %v151_v43  }
 0x227   :  { %v614_v57 = vpop.permute.xlu1 %613 }
 0x228   :  { %v651_v58 = vmul.f32 %v614_v57, %v595_v54 }
 0x22a   :  { %v699_v59 = vadd.f32 %v662_v52, %v651_v58  ;;  %v714_v52 = vld [vmem:[%s1741_s5 + $0x38] sm:$0xff]  ;;  %s1262_s5 = smov [#allocation3]  }
 0x22b   :  { %v619_v63 = vpop.permute.xlu0 %618  ;;  %s843_s30 = sshll.u32 %s1262_s5, 4  ;;  %s844_s30 = int_to_ptr.vmem [resolvable:$true] %s843_s30 }
 0x22c   :  { %v652_v0 = vmul.f32 %v619_v63, %v596_v60  ;;  %v715_v4 = vmul.f32 %v707_v61, %v699_v59  ;;  %s1234_s9 = scalar_lea.vmem %s844_s30, 16  ;;  %s1238_s10 = scalar_lea.vmem %s844_s30, 32 }
 0x22d   :  { %p1235_p0 = scmp.ne.s32.totalorder %s844_s30, %s1234_s9  ;;  %p1239_p1 = scmp.lt.s32.totalorder %s844_s30, %s844_s30 }
 0x22e   :  { %v700_v5 = vadd.f32 %v667_v49, %v652_v0  ;;  %v723_v6 = vsel %vm490_vm1, %v715_v4, 0.0  ;;  %p1240_p2 = scmp.lt.s32.totalorder %s1238_s10, %s1234_s9 }
 0x22f   :  { %v624_v2 = vpop.permute.xlu1 %623  ;;  %v682_v62 = vpop.permute.xlu0 %681 }
 0x230   :  { %v716_v7 = vmul.f32 %v708_v3, %v700_v5  ;;  %v653_v8 = vmul.f32 %v624_v2, %v597_v36  ;;  %p1241_p3 = por %p1240_p2, %p1239_p1 }
 0x232   :  { %v724_v9 = vsel %vm490_vm1, %v716_v7, 0.0  ;;  %v701_v10 = vadd.f32 %v672_v51, %v653_v8  ;;  %v602_v51 = vsub.f32 %v1575_v55, %v1632_v1  ;;  %v754_v1 = vlaneseq  ;;  %p1242_p4 = pnand %p1241_p3, %p1235_p0 }
 0x233   :  { %v725_v13 = vadd.f32 %v724_v9, %v723_v6  ;;  %v629_v14 = vpop.permute.xlu1 %628  ;;  %v687_v31 = vpop.permute.xlu0 %686 }
 0x234   :  { %v717_v16 = vmul.f32 %v709_v48, %v701_v10  ;;  %v654_v17 = vmul.f32 %v629_v14, %v598_v11  ;;  %v755_v5 = vshrl.u32 %v754_v1, 7 }
 0x236   :  { %v726_v18 = vsel %vm490_vm1, %v717_v16, 0.0  ;;  %v702_v19 = vadd.f32 %v677_v56, %v654_v17  ;;  %v756_v36 = vsub.s32 0, %v755_v5 }
 0x237   :  { %v727_v21 = vadd.f32 %v726_v18, %v725_v13  ;;  %v634_v23 = vpop.permute.xlu1 %633  ;;  %v692_v41 = vpop.permute.xlu0 %691 }
 0x238   :  { %v718_v24 = vmul.f32 %v710_v15, %v702_v19  ;;  %v655_v25 = vmul.f32 %v634_v23, %v599_v20 }
 0x23a   :  { %v728_v22 = vsel %vm490_vm1, %v718_v24, 0.0  ;;  %v703_v27 = vadd.f32 %v682_v62, %v655_v25 }
 0x23b   :  { %v729_v29 = vadd.f32 %v728_v22, %v727_v21  ;;  %v639_v32 = vpop.permute.xlu1 %638  ;;  %v752_v2 = vpop.permute.xlu0 %751 }
 0x23c   :  { %v719_v33 = vmul.f32 %v711_v12, %v703_v27  ;;  %v656_v34 = vmul.f32 %v639_v32, %v600_v28  ;;  %v757_v7 = vrot.slane %v752_v2, %v756_v36 }
 0x23e   :  { %v730_v30 = vsel %vm490_vm1, %v719_v33, 0.0  ;;  %v704_v35 = vadd.f32 %v687_v31, %v656_v34 }
 0x23f   :  { %v731_v38 = vadd.f32 %v730_v30, %v729_v29  ;;  %v644_v39 = vpop.permute.xlu1 %643 }
 0x240   :  { %v720_v42 = vmul.f32 %v712_v26, %v704_v35  ;;  %v657_v43 = vmul.f32 %v644_v39, %v601_v37 }
 0x242   :  { %v732_v44 = vsel %vm490_vm1, %v720_v42, 0.0  ;;  %v705_v45 = vadd.f32 %v692_v41, %v657_v43 }
 0x243   :  { %v733_v46 = vadd.f32 %v732_v44, %v731_v38  ;;  %v649_v47 = vpop.permute.xlu1 %648 }
 0x244   :  { %v721_v49 = vmul.f32 %v713_v40, %v705_v45  ;;  %v658_v53 = vmul.f32 %v649_v47, %v602_v51 }
 0x246   :  { %v734_v50 = vsel %vm490_vm1, %v721_v49, 0.0 }
 0x247   :  { %v697_v54 = vpop.permute.xlu1 %696  ;;  %v735_v56 = vadd.f32 %v734_v50, %v733_v46 }
 0x248   :  { %v706_v57 = vadd.f32 %v697_v54, %v658_v53 }
 0x24a   :  { %v722_v58 = vmul.f32 %v714_v52, %v706_v57 }
 0x24c   :  { %v736_v59 = vsel %vm490_vm1, %v722_v58, 0.0 }
 0x24d   :  { %v737_v60 = vadd.f32 %v736_v59, %v735_v56 }
 0x24f   :  { %v738_v61 = vrot.slane %v737_v60, 4 }
 0x251   :  { %v739_v63 = vadd.f32 %v738_v61, %v737_v60 }
 0x253   :  { %v740_v0 = vrot.slane %v739_v63, 2 }
 0x255   :  { %v741_v3 = vadd.f32 %v740_v0, %v739_v63 }
 0x257   :  { %v742_v4 = vrot.slane %v741_v3, 1 }
 0x259   :  { %v743_v55 = vadd.f32 %v742_v4, %v741_v3 }
 0x25b   :  { %1137 = vmatmul.mubr.msk.f32.vlgmr.msra.gmra.mrb[16].mxu0 %vm490_vm1, %v743_v55 }
 0x32e   :  { %v827_v8 = vpop.f32.mrb[16].mxu0 }
 0x32f   :  { %v828_v48 = vadd.f32 %v827_v8, %v757_v7  ;;  %v1138_v6 = vpop.f32.mrb[17].mxu0 }
 0x331   :  { %v831_v9 = vmul.f32 0.5, %v828_v48 }
 0x333   :  { %1232 = vtanh.f32 %v831_v9 }
 0x33d   :  { %v1233_v10 = vpop.eup %1232 }
 0x33e   :  { %v833_v11 = vadd.f32 1.0, %v1233_v10 }
 0x340   :  { %v834_v13 = vmul.f32 0.5, %v833_v11 }
 0x342   :  { %836 = vst.msk [vmem:[#allocation3] sm:$0x1] %vm835_vm10, %v834_v13 }
 0x343   :  { %1245 = shalt.err (!%p1242_p4)
}
 0x344   :  { %s1246_s13 = scalar_lea.hbm %s1744_s8, 16 }
 0x345   :  { %p1247_p5 = scmp.ne.s32.totalorder %s1744_s8, %s1246_s13  ;;  %p1250_p6 = scmp.lt.u32.totalorder %s1246_s13, %s1744_s8 }
 0x347   :  { %p1252_p7 = pnand %p1250_p6, %p1247_p5 }
 0x349   :  { %1255 = shalt.err (!%p1252_p7)
}
 0x34a   :  { %846 = dma.vmem_to_hbm [thread:$0]  %s844_s30, 16, %s1744_s8, [#allocation4]  }
 0x34b   :  { %1256 = dma.done.wait [#allocation4], 16  }
 0x34c   :  { %1257 = vsyncadd [#allocation4], 4294967280 }
 0x34d   :  { %850 = vsyncpa [#allocation4], 1 }

</bundles_post_ra>
